<compile_context>
chip_gen: v5e
topology: v5e:2x2
jax: 0.10.0
libtpu: 0.0.40
codegen_flags: <defaults>
</compile_context>

<pallas_src>
import functools
import math

import jax
import jax.numpy as jnp
from jax.experimental import pallas as pl
from jax.experimental.pallas import tpu as pltpu


def _center_embedding_kernel(x_ref, labels_ref, awT_ref, ab_ref,
                             psum_x_ref, psum_w_ref,
                             *, n_valid, tn, steps_per_split, max_blk,
                             num_classes):
    s = pl.program_id(0)          # split index ("parallel": megacore on v7x)
    i = pl.program_id(1)          # step within the split (reduction axis)

    @pl.when(i == 0)
    def _init():
        psum_x_ref[...] = jnp.zeros_like(psum_x_ref)
        psum_w_ref[...] = jnp.zeros_like(psum_w_ref)

    # Global block index, clamped exactly like the x BlockSpec index_map so the
    # row-validity mask lines up with the rows actually DMA'd into x_ref.
    blk = jnp.minimum(s * steps_per_split + i, max_blk)
    row_ids = jax.lax.broadcasted_iota(jnp.int32, (tn, 1), 0) + blk * tn
    valid = row_ids < n_valid                                   # (tn, 1)

    # Zero out-of-bounds rows of the (possibly partial) tile: x is not padded on
    # the host, so those rows are garbage and could be NaN/Inf (0 * NaN = NaN).
    x = jnp.where(valid, x_ref[...], 0.0)                       # (tn, C) f32

    labels = labels_ref[...]                                    # (1, tn) i32; pad = -1
    class_ids = jax.lax.broadcasted_iota(jnp.int32, (num_classes, tn), 0)
    onehot = (class_ids == labels).astype(jnp.float32)          # (L, tn)

    # sum_x += onehot @ x   (f32 MXU: keeps the un-prompted center path exact)
    psum_x_ref[...] += jnp.dot(onehot, x,
                               preferred_element_type=jnp.float32)[None]

    # GPFplusAtt attention scores: bf16 MXU operands, f32 accumulation.
    score = jnp.dot(x.astype(jnp.bfloat16), awT_ref[...],
                    preferred_element_type=jnp.float32) + ab_ref[...]   # (tn, P)
    score = score - jnp.max(score, axis=1, keepdims=True)
    e = jnp.exp(score)
    denom = jnp.sum(e, axis=1, keepdims=True)
    weight = e * (1.0 / denom)                                  # exact normalize

    # sum_w += onehot @ weight.  Softmax rows sum to 1, so per-class counts are
    # recovered later as sum_w.sum(-1): no separate counts accumulator needed.
    psum_w_ref[...] += jnp.dot(onehot, weight,
                               preferred_element_type=jnp.float32)[None]


def center_embedding_forward(x, labels, params, num_classes, *,
                             tn=4096, num_splits=2):
    """CenterEmbedding forward.  x: (N, C) f32, labels: (N,) int."""
    N, C = x.shape
    P = params["a_weight"].shape[0]

    # Tile size: lane dim of the labels block is tn -> multiple of 128; don't
    # exceed the (rounded-up) problem size.
    tn = max(128, (tn // 128) * 128)
    tn = min(tn, ((N + 127) // 128) * 128)
    n_blocks = pl.cdiv(N, tn)
    num_splits = max(1, min(num_splits, n_blocks))
    steps_per_split = pl.cdiv(n_blocks, num_splits)
    total_steps = num_splits * steps_per_split
    max_blk = n_blocks - 1

    # x is NOT padded (read from HBM exactly once).  Only the tiny labels vector
    # is padded, with -1 so padded rows never match any class.
    n_lab = total_steps * tn
    labels_i32 = labels.astype(jnp.int32)
    if n_lab != N:
        labels_i32 = jnp.pad(labels_i32, (0, n_lab - N), constant_values=-1)
    labels2d = labels_i32.reshape(1, n_lab)

    awT_bf16 = params["a_weight"].T.astype(jnp.bfloat16)        # (C, P), resident
    ab = params["a_bias"].reshape(1, P).astype(jnp.float32)     # (1, P), resident

    kernel = functools.partial(
        _center_embedding_kernel,
        n_valid=N, tn=tn, steps_per_split=steps_per_split, max_blk=max_blk,
        num_classes=num_classes)

    grid_spec = pltpu.PrefetchScalarGridSpec(
        num_scalar_prefetch=0,
        grid=(num_splits, steps_per_split),
        in_specs=[
            # x: streamed over N; clamp the block index so grid steps past the
            # last real block just re-read it (their labels are all -1).
            pl.BlockSpec(
                (tn, C),
                lambda s, i: (jnp.minimum(s * steps_per_split + i, max_blk), 0)),
            # labels: streamed over N (padded, so never out of bounds).
            pl.BlockSpec((1, tn), lambda s, i: (0, s * steps_per_split + i)),
            pl.BlockSpec((C, P), lambda s, i: (0, 0)),           # a weight^T (bf16)
            pl.BlockSpec((1, P), lambda s, i: (0, 0)),           # a bias
        ],
        out_specs=[
            # Per-split partial sums; the block is resident across the inner
            # (reduction) axis and acts as the accumulator.
            pl.BlockSpec((1, num_classes, C), lambda s, i: (s, 0, 0)),
            pl.BlockSpec((1, num_classes, P), lambda s, i: (s, 0, 0)),
        ],
    )

    psum_x, psum_w = pl.pallas_call(
        kernel,
        out_shape=(
            jax.ShapeDtypeStruct((num_splits, num_classes, C), jnp.float32),
            jax.ShapeDtypeStruct((num_splits, num_classes, P), jnp.float32),
        ),
        grid_spec=grid_spec,
        compiler_params=pltpu.CompilerParams(
            dimension_semantics=("parallel", "arbitrary"),
            vmem_limit_bytes=32 * 1024 * 1024,
        ),
    )(x, labels2d, awT_bf16, ab)

    # Tiny (L x C) combine epilogue, outside the streaming kernel so the split
    # axis can use both v7x TensorCores (negligible cost: L=num_classes rows).
    sum_x = psum_x.sum(axis=0)                                   # (L, C)
    sum_w = psum_w.sum(axis=0)                                   # (L, P)
    counts = sum_w.sum(axis=1, keepdims=True)                    # rows sum to 1
    inv = 1.0 / (counts + 1e-7)
    c_emb = sum_x * inv
    c_emb_p = c_emb + jnp.dot(sum_w, params["p_list"]) * inv
    w = params["layer_weight"]
    # cat(c_emb, c_emb_p) @ W^T == c_emb @ W[:, :C]^T + c_emb_p @ W[:, C:]^T
    return (jnp.dot(c_emb, w[:, :C].T) + jnp.dot(c_emb_p, w[:, C:].T)
            + params["layer_bias"].reshape(1, C))


def _reference(x, labels, params, num_classes):
    def center_emb(inp, idx):
        onehot = jax.nn.one_hot(idx, num_classes, dtype=jnp.float32).T   # (L, N)
        counts = onehot.sum(axis=1, keepdims=True)
        return (onehot @ inp) / (counts + 1e-7)

    score = x @ params["a_weight"].T + params["a_bias"]
    w = jax.nn.softmax(score, axis=1)
    xp = x + w @ params["p_list"]
    c1 = center_emb(x, labels)
    c2 = center_emb(xp, labels)
    cat = jnp.concatenate([c1, c2], axis=1)
    return cat @ params["layer_weight"].T + params["layer_bias"]


def _init_params(key, in_channels, p_num):
    C, P = in_channels, p_num
    ks = jax.random.split(key, 5)

    # gpf.p_list: glorot uniform over (P, C)
    stdv_p = math.sqrt(6.0 / (P + C))
    p_list = jax.random.uniform(ks[0], (P, C), jnp.float32, -stdv_p, stdv_p)

    # gpf.a = Linear(C, P): PyTorch default uniform(-1/sqrt(fan_in), +...)
    b_a = 1.0 / math.sqrt(C)
    a_weight = jax.random.uniform(ks[1], (P, C), jnp.float32, -b_a, b_a)
    a_bias = jax.random.uniform(ks[2], (P,), jnp.float32, -b_a, b_a)

    # layer = Linear(2C, C)
    b_l = 1.0 / math.sqrt(2 * C)
    layer_weight = jax.random.uniform(ks[3], (C, 2 * C), jnp.float32, -b_l, b_l)
    layer_bias = jax.random.uniform(ks[4], (C,), jnp.float32, -b_l, b_l)

    return {
        "p_list": p_list,
        "a_weight": a_weight,
        "a_bias": a_bias,
        "layer_weight": layer_weight,
        "layer_bias": layer_bias,
    }


if __name__ == "__main__":
    # N=500 is ragged vs both tested tiles, so the unpadded-x masking path is
    # exercised; C=128 keeps the output lane-dense.
    N, C, P, NUM_CLASSES = 500, 128, 8, 8

    key = jax.random.PRNGKey(0)
    k_x, k_lab, k_params = jax.random.split(key, 3)

    x = jax.random.normal(k_x, (N, C), jnp.float32)
    labels = jax.random.randint(k_lab, (N,), 0, NUM_CLASSES, jnp.int32)
    params = _init_params(k_params, C, P)

    ref = _reference(x, labels, params, NUM_CLASSES)

    # 1) Default config (tile clamps to the small problem, single split).
    out = center_embedding_forward(x, labels, params, NUM_CLASSES)
    out = jax.block_until_ready(out)
    assert out.shape == (NUM_CLASSES, C)
    assert jnp.allclose(out, ref, atol=2e-3, rtol=2e-3), "mismatch (default cfg)"

    # 2) Multi-block, multi-split config: exercises the streaming reduction,
    #    the ragged last tile, and the clamped (duplicate) out-of-range steps.
    out2 = center_embedding_forward(x, labels, params, NUM_CLASSES,
                                    tn=128, num_splits=3)
    out2 = jax.block_until_ready(out2)
    assert jnp.allclose(out2, ref, atol=2e-3, rtol=2e-3), "mismatch (split cfg)"

    print("KERNEL_OK")
</pallas_src>

<mosaic_0001>
module attributes {stable_mosaic.version = 11 : i64} {
  func.func @_center_embedding_kernel(%arg0: i32, %arg1: i32, %arg2: memref<512x128xf32, #tpu.memory_space<vmem>>, %arg3: memref<1x512xi32, #tpu.memory_space<vmem>>, %arg4: memref<128x8xbf16, #tpu.memory_space<vmem>>, %arg5: memref<1x8xf32, #tpu.memory_space<vmem>>, %arg6: memref<1x8x128xf32, #tpu.memory_space<vmem>>, %arg7: memref<1x8x8xf32, #tpu.memory_space<vmem>>) attributes {dimension_semantics = [#tpu.dimension_semantics<parallel>, #tpu.dimension_semantics<arbitrary>], iteration_bounds = array<i64: 1, 1>, scalar_prefetch = 0 : i64, scratch_operands = 0 : i64, tpu.core_type = #tpu.core_type<tc>, window_params = [{transform_indices = @transform_0, window_bounds = array<i64: 512, 128>}, {transform_indices = @transform_1, window_bounds = array<i64: 1, 512>}, {pipeline_mode = #tpu.pipeline_mode<synchronous>, transform_indices = @transform_2, window_bounds = array<i64: 128, 8>}, {pipeline_mode = #tpu.pipeline_mode<synchronous>, transform_indices = @transform_3, window_bounds = array<i64: 1, 8>}, {transform_indices = @transform_4, window_bounds = array<i64: 1, 8, 128>}, {transform_indices = @transform_5, window_bounds = array<i64: 1, 8, 8>}]} {
    %c0_i32 = arith.constant 0 : i32
    %0 = arith.cmpi eq, %arg1, %c0_i32 : i32
    %1 = arith.extui %0 : i1 to i32
    %c0_i32_0 = arith.constant 0 : i32
    %2 = arith.cmpi ne, %1, %c0_i32_0 : i32
    scf.if %2 {
      %cst_27 = arith.constant 0.000000e+00 : f32
      %50 = vector.broadcast %cst_27 : f32 to vector<1x8x128xf32>
      %c0_28 = arith.constant 0 : index
      %c0_29 = arith.constant 0 : index
      %c0_30 = arith.constant 0 : index
      %51 = vector.load %arg6[%c0_28, %c0_29, %c0_30] : memref<1x8x128xf32, #tpu.memory_space<vmem>>, vector<1x8x128xf32>
      tpu.vector_store %arg6[%c0_28, %c0_29, %c0_30], %50 {strides = array<i32>} : memref<1x8x128xf32, #tpu.memory_space<vmem>>, vector<1x8x128xf32>,
      %cst_31 = arith.constant 0.000000e+00 : f32
      %52 = vector.broadcast %cst_31 : f32 to vector<1x8x8xf32>
      %c0_32 = arith.constant 0 : index
      %c0_33 = arith.constant 0 : index
      %c0_34 = arith.constant 0 : index
      %53 = vector.load %arg7[%c0_32, %c0_33, %c0_34] : memref<1x8x8xf32, #tpu.memory_space<vmem>>, vector<1x8x8xf32>
      tpu.vector_store %arg7[%c0_32, %c0_33, %c0_34], %52 {strides = array<i32>} : memref<1x8x8xf32, #tpu.memory_space<vmem>>, vector<1x8x8xf32>,
    } else {
    }
    %c1_i32 = arith.constant 1 : i32
    %3 = arith.muli %arg0, %c1_i32 : i32
    %4 = arith.addi %3, %arg1 : i32
    %c0_i32_1 = arith.constant 0 : i32
    %5 = arith.minsi %4, %c0_i32_1 : i32
    %6 = tpu.iota {dimensions = array<i32: 0>} : vector<512x1xi32>
    %c512_i32 = arith.constant 512 : i32
    %7 = arith.muli %5, %c512_i32 : i32
    %8 = vector.broadcast %7 : i32 to vector<512x1xi32>
    %9 = arith.addi %6, %8 : vector<512x1xi32>
    %c500_i32 = arith.constant 500 : i32
    %10 = vector.broadcast %c500_i32 : i32 to vector<512x1xi32>
    %11 = arith.cmpi slt, %9, %10 : vector<512x1xi32>
    %c0 = arith.constant 0 : index
    %c0_2 = arith.constant 0 : index
    %12 = vector.load %arg2[%c0, %c0_2] : memref<512x128xf32, #tpu.memory_space<vmem>>, vector<512x128xf32>
    %cst = arith.constant 0.000000e+00 : f32
    %13 = vector.shape_cast %11 : vector<512x1xi1> to vector<512x1xi1>
    %14 = vector.broadcast %13 : vector<512x1xi1> to vector<512x128xi1>
    %15 = vector.broadcast %cst : f32 to vector<512x128xf32>
    %16 = arith.select %14, %12, %15 : vector<512x128xi1>, vector<512x128xf32>
    %c0_3 = arith.constant 0 : index
    %c0_4 = arith.constant 0 : index
    %17 = vector.load %arg3[%c0_3, %c0_4] : memref<1x512xi32, #tpu.memory_space<vmem>>, vector<1x512xi32>
    %18 = tpu.iota {dimensions = array<i32: 0>} : vector<8x512xi32>
    %19 = vector.broadcast %17 : vector<1x512xi32> to vector<8x512xi32>
    %20 = arith.cmpi eq, %18, %19 : vector<8x512xi32>
    %21 = arith.extui %20 : vector<8x512xi1> to vector<8x512xi32>
    %22 = arith.sitofp %21 : vector<8x512xi32> to vector<8x512xf32>
    %c0_5 = arith.constant 0 : index
    %c0_6 = arith.constant 0 : index
    %c0_7 = arith.constant 0 : index
    %23 = vector.load %arg6[%c0_5, %c0_6, %c0_7] : memref<1x8x128xf32, #tpu.memory_space<vmem>>, vector<1x8x128xf32>
    %cst_8 = arith.constant dense<0.000000e+00> : vector<8x128xf32>
    %24 = tpu.matmul %22, %16, %cst_8 {dimension_numbers = #tpu.dot_dimension_numbers<[1], [0], [0], [1], [0, 0, 1, 1], [], []>} : vector<8x512xf32>, vector<512x128xf32>, vector<8x128xf32> -> vector<8x128xf32>
    %25 = vector.shape_cast %24 : vector<8x128xf32> to vector<1x8x128xf32>
    %26 = arith.addf %23, %25 : vector<1x8x128xf32>
    %c0_9 = arith.constant 0 : index
    %c0_10 = arith.constant 0 : index
    %c0_11 = arith.constant 0 : index
    %27 = vector.load %arg6[%c0_9, %c0_10, %c0_11] : memref<1x8x128xf32, #tpu.memory_space<vmem>>, vector<1x8x128xf32>
    tpu.vector_store %arg6[%c0_9, %c0_10, %c0_11], %26 {strides = array<i32>} : memref<1x8x128xf32, #tpu.memory_space<vmem>>, vector<1x8x128xf32>,
    %28 = arith.truncf %16 : vector<512x128xf32> to vector<512x128xbf16>
    %c0_12 = arith.constant 0 : index
    %c0_13 = arith.constant 0 : index
    %29 = vector.load %arg4[%c0_12, %c0_13] : memref<128x8xbf16, #tpu.memory_space<vmem>>, vector<128x8xbf16>
    %cst_14 = arith.constant dense<0.000000e+00> : vector<512x8xf32>
    %30 = tpu.matmul %28, %29, %cst_14 {dimension_numbers = #tpu.dot_dimension_numbers<[1], [0], [0], [1], [0, 0, 1, 1], [], []>} : vector<512x128xbf16>, vector<128x8xbf16>, vector<512x8xf32> -> vector<512x8xf32>
    %c0_15 = arith.constant 0 : index
    %c0_16 = arith.constant 0 : index
    %31 = vector.load %arg5[%c0_15, %c0_16] : memref<1x8xf32, #tpu.memory_space<vmem>>, vector<1x8xf32>
    %32 = vector.broadcast %31 : vector<1x8xf32> to vector<512x8xf32>
    %33 = arith.addf %30, %32 : vector<512x8xf32>
    %cst_17 = arith.constant dense<0xFF800000> : vector<512xf32>
    %34 = vector.multi_reduction <maximumf>, %33, %cst_17 [1] : vector<512x8xf32> to vector<512xf32>
    %35 = vector.shape_cast %34 : vector<512xf32> to vector<512x1xf32>
    %36 = vector.broadcast %35 : vector<512x1xf32> to vector<512x8xf32>
    %37 = arith.subf %33, %36 : vector<512x8xf32>
    %38 = math.exp %37 : vector<512x8xf32>
    %cst_18 = arith.constant dense<0.000000e+00> : vector<512xf32>
    %39 = vector.multi_reduction <add>, %38, %cst_18 [1] : vector<512x8xf32> to vector<512xf32>
    %40 = vector.shape_cast %39 : vector<512xf32> to vector<512x1xf32>
    %cst_19 = arith.constant 1.000000e+00 : f32
    %41 = vector.broadcast %cst_19 : f32 to vector<512x1xf32>
    %42 = arith.divf %41, %40 : vector<512x1xf32>
    %43 = vector.broadcast %42 : vector<512x1xf32> to vector<512x8xf32>
    %44 = arith.mulf %38, %43 : vector<512x8xf32>
    %c0_20 = arith.constant 0 : index
    %c0_21 = arith.constant 0 : index
    %c0_22 = arith.constant 0 : index
    %45 = vector.load %arg7[%c0_20, %c0_21, %c0_22] : memref<1x8x8xf32, #tpu.memory_space<vmem>>, vector<1x8x8xf32>
    %cst_23 = arith.constant dense<0.000000e+00> : vector<8x8xf32>
    %46 = tpu.matmul %22, %44, %cst_23 {dimension_numbers = #tpu.dot_dimension_numbers<[1], [0], [0], [1], [0, 0, 1, 1], [], []>} : vector<8x512xf32>, vector<512x8xf32>, vector<8x8xf32> -> vector<8x8xf32>
    %47 = vector.shape_cast %46 : vector<8x8xf32> to vector<1x8x8xf32>
    %48 = arith.addf %45, %47 : vector<1x8x8xf32>
    %c0_24 = arith.constant 0 : index
    %c0_25 = arith.constant 0 : index
    %c0_26 = arith.constant 0 : index
    %49 = vector.load %arg7[%c0_24, %c0_25, %c0_26] : memref<1x8x8xf32, #tpu.memory_space<vmem>>, vector<1x8x8xf32>
    tpu.vector_store %arg7[%c0_24, %c0_25, %c0_26], %48 {strides = array<i32>} : memref<1x8x8xf32, #tpu.memory_space<vmem>>, vector<1x8x8xf32>,
    return
  }
  func.func @transform_0(%arg0: i32, %arg1: i32) -> (i32, i32) {
    %c1_i32 = arith.constant 1 : i32
    %0 = arith.muli %arg0, %c1_i32 : i32
    %1 = arith.addi %0, %arg1 : i32
    %c0_i32 = arith.constant 0 : i32
    %2 = arith.minsi %1, %c0_i32 : i32
    %c0_i32_0 = arith.constant 0 : i32
    %c0_i32_1 = arith.constant 0 : i32
    return %2, %c0_i32_0 : i32, i32
  }
  func.func @transform_1(%arg0: i32, %arg1: i32) -> (i32, i32) {
    %c1_i32 = arith.constant 1 : i32
    %0 = arith.muli %arg0, %c1_i32 : i32
    %1 = arith.addi %0, %arg1 : i32
    %c0_i32 = arith.constant 0 : i32
    %c0_i32_0 = arith.constant 0 : i32
    return %c0_i32, %1 : i32, i32
  }
  func.func @transform_2(%arg0: i32, %arg1: i32) -> (i32, i32) {
    %c0_i32 = arith.constant 0 : i32
    %c0_i32_0 = arith.constant 0 : i32
    %c0_i32_1 = arith.constant 0 : i32
    return %c0_i32, %c0_i32_0 : i32, i32
  }
  func.func @transform_3(%arg0: i32, %arg1: i32) -> (i32, i32) {
    %c0_i32 = arith.constant 0 : i32
    %c0_i32_0 = arith.constant 0 : i32
    %c0_i32_1 = arith.constant 0 : i32
    return %c0_i32, %c0_i32_0 : i32, i32
  }
  func.func @transform_4(%arg0: i32, %arg1: i32) -> (i32, i32, i32) {
    %c0_i32 = arith.constant 0 : i32
    %c0_i32_0 = arith.constant 0 : i32
    %c0_i32_1 = arith.constant 0 : i32
    return %arg0, %c0_i32, %c0_i32_0 : i32, i32, i32
  }
  func.func @transform_5(%arg0: i32, %arg1: i32) -> (i32, i32, i32) {
    %c0_i32 = arith.constant 0 : i32
    %c0_i32_0 = arith.constant 0 : i32
    %c0_i32_1 = arith.constant 0 : i32
    return %arg0, %c0_i32, %c0_i32_0 : i32, i32, i32
  }
}

</mosaic_0001>

<bundles_post_ra>
// kernel: tpu_custom_call.1
= control target key start
LH: loop header
LB: loop body
LE: loop exit
PB: predicated region body
PF: predicated region fallthrough
CT: control target
= control target key end

     0   :  { %11 = vsyncpa [#allocation3], 0  ;;  %s5815_s0 = inlined_call_operand.hbm [shape: f32[500,128], index: 0, kind: input, shape index: {}]   ;;  %s5816_s1 = inlined_call_operand.vmem [shape: s32[1,512], index: 1, kind: input, shape index: {}]   ;;  %s5817_s2 = inlined_call_operand.vmem [shape: bf16[128,8], index: 2, kind: input, shape index: {}]   ;;  %s5818_s3 = inlined_call_operand.vmem [shape: f32[1,8], index: 3, kind: input, shape index: {}]   ;;  %s5819_s4 = inlined_call_operand.hbm [shape: f32[1,8,128], index: 4, kind: output, shape index: {0}]   ;;  %s5820_s5 = inlined_call_operand.hbm [shape: f32[1,8,8], index: 5, kind: output, shape index: {1}]  }
   0x1   :  { %12 = vsyncpa [#allocation4], 0 }
   0x2   :  { %13 = vsyncpa [#allocation7], 0 }
   0x3   :  { %24 = vsyncadd [#allocation3], 128  ;;  %s29_s20 = sshll.u32 %s5815_s0, 4  ;;  %s3048_s21 = smov [#allocation2]   ;;  %s30_s20 = int_to_ptr.hbm [resolvable:$true] %s29_s20 }
   0x4   :  { %s31_s22 = sshll.u32 %s3048_s21, 4  ;;  %s3049_s23 = smov 128   ;;  %s32_s22 = int_to_ptr.vmem [resolvable:$true] %s31_s22 }
   0x5   :  { %s3050_s24 = smov 8  }
   0x6   :  { %37 = dma.hbm_to_vmem [thread:$0]  %s30_s20, 8064, %s32_s22, [#allocation3], %s3049_s23, %s3049_s23, %s3050_s24  }
   0x7   :  { %3042 = dma.done.wait [#allocation3], 8192  }
   0x8   :  { %3043 = vsyncadd [#allocation3], 4294959104  ;;  %v83_v0 = vlaneseq  ;;  %v3095_v3 = vld [vmem:[#allocation2 + $0x78] sm:$0xff]  ;;  %v3103_v6 = vld [vmem:[#allocation2 + $0x1f0] sm:$0xff]  ;;  %vm5963_vm5 = vcmask 64512   ;;  %vm3053_vm6 = vmmov 1  }
   0x9   :  { %v3097_v4 = vld [vmem:[#allocation2 + $0xf8] sm:$0xff]  ;;  %552 = vmatpush.msra.mxu0 %v3095_v3  ;;  %5965 = vst [vmem:[#allocation12_spill] sm:$0xff] %v3103_v6  ;;  %v3105_v7 = vld [vmem:[#allocation2 + $0x70] sm:$0xff]  ;;  %v3115_v10 = vld [vmem:[#allocation2 + $0x1e8] sm:$0xff]  ;;  %s2594_s18 = sshll.u32 %s5819_s4, 4  ;;  %s3054_s19 = smov [#allocation5]   ;;  %s2595_s18 = int_to_ptr.hbm [resolvable:$true] %s2594_s18 }
   0xa   :  { %v3089_v1 = vshrl.u32 %v83_v0, 7  ;;  %v3099_v5 = vld [vmem:[#allocation2 + $0x178] sm:$0xff]  ;;  %572 = vmatpush.msra.mxu1 %v3097_v4  ;;  %v3111_v8 = vld [vmem:[#allocation2 + $0xf0] sm:$0xff]  ;;  %5966 = vst [vmem:[#allocation13_spill] sm:$0xff] %v3115_v10  ;;  %v3119_v11 = vld [vmem:[#allocation2 + $0x68] sm:$0xff]  ;;  %s2592_s20 = sshll.u32 %s3054_s19, 4  ;;  %s2593_s20 = int_to_ptr.vmem [resolvable:$true] %s2592_s20 }
   0xb   :  { %592 = vmatpush.msra.mxu2 %v3099_v5  ;;  %v3113_v9 = vld [vmem:[#allocation2 + $0x170] sm:$0xff]  ;;  %553 = vmatpush.msra.mxu0 %v3105_v7  ;;  %v3121_v12 = vld [vmem:[#allocation2 + $0xe8] sm:$0xff]  ;;  %v3127_v14 = vld [vmem:[#allocation2 + $0x1e0] sm:$0xff]  ;;  %s3055_s21 = smov [#allocation6]   ;;  %s2605_s0 = sshll.u32 %s5820_s5, 4  ;;  %s2606_s0 = int_to_ptr.hbm [resolvable:$true] %s2605_s0 }
   0xc   :  { %v3092_v2 = vadd.s32 496, %v3089_v1  ;;  %573 = vmatpush.msra.mxu1 %v3111_v8  ;;  %v3123_v13 = vld [vmem:[#allocation2 + $0x168] sm:$0xff]  ;;  %v3129_v15 = vld [vmem:[#allocation2 + $0x60] sm:$0xff]  ;;  %v3137_v18 = vld [vmem:[#allocation2 + $0x1d8] sm:$0xff]  ;;  %s2603_s22 = sshll.u32 %s3055_s21, 4  ;;  %s2604_s22 = int_to_ptr.vmem [resolvable:$true] %s2603_s22 }
   0xd   :  { %5967 = vst [vmem:[#allocation14_spill] sm:$0xff] %v3123_v13  ;;  %593 = vmatpush.msra.mxu2 %v3113_v9  ;;  %v3131_v16 = vld [vmem:[#allocation2 + $0xe0] sm:$0xff]  ;;  %554 = vmatpush.msra.mxu0 %v3119_v11  ;;  %v3141_v19 = vld [vmem:[#allocation2 + $0x58] sm:$0xff]  ;;  %v3149_v22 = vld [vmem:[#allocation2 + $0x1d0] sm:$0xff] }
   0xe   :  { %5964 = vst [vmem:[#allocation11_spill] sm:$0xff] %v3092_v2  ;;  %vm276_vm0 = vcmp.lt.s32.totalorder %v3092_v2, 500  ;;  %574 = vmatpush.msra.mxu1 %v3121_v12  ;;  %v3135_v17 = vld [vmem:[#allocation2 + $0x160] sm:$0xff]  ;;  %v3143_v20 = vld [vmem:[#allocation2 + $0xd8] sm:$0xff]  ;;  %v3153_v23 = vld [vmem:[#allocation2 + $0x50] sm:$0xff] }
   0xf   :  { %2632 = vmatpush.msk.msra.mxu3 %vm276_vm0, %v3103_v6  ;;  %5968 = vst [vmem:[#allocation15_spill] sm:$0xff] %v3135_v17  ;;  %594 = vmatpush.msra.mxu2 %v3123_v13  ;;  %v3147_v21 = vld [vmem:[#allocation2 + $0x158] sm:$0xff]  ;;  %v3155_v24 = vld [vmem:[#allocation2 + $0xd0] sm:$0xff]  ;;  %v3161_v26 = vld [vmem:[#allocation2 + $0x1c8] sm:$0xff] }
  0x10   :  { %5969 = vst [vmem:[#allocation16_spill] sm:$0xff] %v3143_v20  ;;  %555 = vmatpush.msra.mxu0 %v3129_v15  ;;  %575 = vmatpush.msra.mxu1 %v3131_v16  ;;  %v3159_v25 = vld [vmem:[#allocation2 + $0x150] sm:$0xff]  ;;  %v3165_v27 = vld [vmem:[#allocation2 + $0x48] sm:$0xff]  ;;  %v3173_v30 = vld [vmem:[#allocation2 + $0x1c0] sm:$0xff] }
  0x11   :  { %614 = vmatpush.msra.mxu3 %v3115_v10  ;;  %5970 = vst [vmem:[#allocation17_spill] sm:$0xff] %v3147_v21  ;;  %595 = vmatpush.msra.mxu2 %v3135_v17  ;;  %v3167_v28 = vld [vmem:[#allocation2 + $0xc8] sm:$0xff]  ;;  %v3177_v31 = vld [vmem:[#allocation2 + $0x40] sm:$0xff]  ;;  %v3185_v34 = vld [vmem:[#allocation2 + $0x1b8] sm:$0xff]  ;;  %v5832_v10 = vmov 1.0  }
  0x12   :  { %5971 = vst [vmem:[#allocation18_spill] sm:$0xff] %v3155_v24  ;;  %556 = vmatpush.msra.mxu0 %v3141_v19  ;;  %576 = vmatpush.msra.mxu1 %v3143_v20  ;;  %v3171_v29 = vld [vmem:[#allocation2 + $0x148] sm:$0xff]  ;;  %v3179_v32 = vld [vmem:[#allocation2 + $0xc0] sm:$0xff]  ;;  %v3189_v35 = vld [vmem:[#allocation2 + $0x38] sm:$0xff] }
  0x13   :  { %615 = vmatpush.msra.mxu3 %v3127_v14  ;;  %5972 = vst [vmem:[#allocation19_spill] sm:$0xff] %v3159_v25  ;;  %596 = vmatpush.msra.mxu2 %v3147_v21  ;;  %v3183_v33 = vld [vmem:[#allocation2 + $0x140] sm:$0xff]  ;;  %v3191_v36 = vld [vmem:[#allocation2 + $0xb8] sm:$0xff]  ;;  %v3197_v38 = vld [vmem:[#allocation2 + $0x1b0] sm:$0xff] }
  0x14   :  { %5973 = vst [vmem:[#allocation20_spill] sm:$0xff] %v3167_v28  ;;  %557 = vmatpush.msra.mxu0 %v3153_v23  ;;  %577 = vmatpush.msra.mxu1 %v3155_v24  ;;  %v3195_v37 = vld [vmem:[#allocation2 + $0x138] sm:$0xff]  ;;  %v3201_v39 = vld [vmem:[#allocation2 + $0x30] sm:$0xff]  ;;  %v3209_v42 = vld [vmem:[#allocation2 + $0x1a8] sm:$0xff] }
  0x15   :  { %616 = vmatpush.msra.mxu3 %v3137_v18  ;;  %597 = vmatpush.msra.mxu2 %v3159_v25  ;;  %5974 = vst [vmem:[#allocation21_spill] sm:$0xff] %v3179_v32  ;;  %v3203_v40 = vld [vmem:[#allocation2 + $0xb0] sm:$0xff]  ;;  %v3213_v43 = vld [vmem:[#allocation2 + $0x28] sm:$0xff]  ;;  %v3221_v46 = vld [vmem:[#allocation2 + $0x1a0] sm:$0xff] }
  0x16   :  { %558 = vmatpush.msra.mxu0 %v3165_v27  ;;  %578 = vmatpush.msra.mxu1 %v3167_v28  ;;  %v3207_v41 = vld [vmem:[#allocation2 + $0x130] sm:$0xff]  ;;  %v3215_v44 = vld [vmem:[#allocation2 + $0xa8] sm:$0xff]  ;;  %v3225_v47 = vld [vmem:[#allocation2 + $0x20] sm:$0xff]  ;;  %v5975_v28 = vmov 0 }
  0x17   :  { %617 = vmatpush.msra.mxu3 %v3149_v22  ;;  %598 = vmatpush.msra.mxu2 %v3171_v29  ;;  %v3219_v45 = vld [vmem:[#allocation2 + $0x128] sm:$0xff]  ;;  %v3227_v48 = vld [vmem:[#allocation2 + $0xa0] sm:$0xff]  ;;  %v3233_v50 = vld [vmem:[#allocation2 + $0x198] sm:$0xff] }
  0x18   :  { %559 = vmatpush.msra.mxu0 %v3177_v31  ;;  %579 = vmatpush.msra.mxu1 %v3179_v32  ;;  %v3231_v49 = vld [vmem:[#allocation2 + $0x120] sm:$0xff]  ;;  %v3237_v51 = vld [vmem:[#allocation2 + $0x18] sm:$0xff]  ;;  %v3245_v54 = vld [vmem:[#allocation2 + $0x190] sm:$0xff]  ;;  %v5981_v32 = vmov 0 }
  0x19   :  { %618 = vmatpush.msra.mxu3 %v3161_v26  ;;  %599 = vmatpush.msra.mxu2 %v3183_v33  ;;  %v3239_v52 = vld [vmem:[#allocation2 + $0x98] sm:$0xff]  ;;  %v3249_v55 = vld [vmem:[#allocation2 + $0x10] sm:$0xff]  ;;  %v3257_v58 = vld [vmem:[#allocation2 + $0x188] sm:$0xff] }
  0x1a   :  { %560 = vmatpush.msra.mxu0 %v3189_v35  ;;  %580 = vmatpush.msra.mxu1 %v3191_v36  ;;  %v3243_v53 = vld [vmem:[#allocation2 + $0x118] sm:$0xff]  ;;  %v3251_v56 = vld [vmem:[#allocation2 + $0x90] sm:$0xff]  ;;  %v534_v59 = vld [vmem:[%s5816_s1] sm:$0xf] }
  0x1b   :  { %619 = vmatpush.msra.mxu3 %v3173_v30  ;;  %600 = vmatpush.msra.mxu2 %v3195_v37  ;;  %v3255_v57 = vld [vmem:[#allocation2 + $0x110] sm:$0xff]  ;;  %v3264_v60 = vld [vmem:[#allocation2 + $0x8] sm:$0xff]  ;;  %v3272_v63 = vld [vmem:[#allocation2 + $0x180] sm:$0xff]  ;;  %v538_v13 = vperm.slane %v534_v59, 3  ;;  %v537_v20 = vperm.slane %v534_v59, 2  ;;  %v535_v6 = vperm.slane %v534_v59, 0 }
  0x1c   :  { %561 = vmatpush.msra.mxu0 %v3201_v39  ;;  %581 = vmatpush.msra.mxu1 %v3203_v40  ;;  %v3266_v61 = vld [vmem:[#allocation2 + $0x88] sm:$0xff]  ;;  %v2680_v0 = vld [vmem:[%s5817_s2 + $0x38] sm:$0xff]  ;;  %v3279_v17 = vld [vmem:[#allocation2] sm:$0xff]  ;;  %v536_v21 = vperm.slane %v534_v59, 1  ;;  %v5978_v59 = vmov 0 }
  0x1d   :  { %620 = vmatpush.msra.mxu3 %v3185_v34  ;;  %601 = vmatpush.msra.mxu2 %v3207_v41  ;;  %v3270_v62 = vld [vmem:[#allocation2 + $0x108] sm:$0xff]  ;;  %v3283_v24 = vld [vmem:[#allocation2 + $0x80] sm:$0xff]  ;;  %v2679_v25 = vld [vmem:[%s5817_s2 + $0x30] sm:$0xff]  ;;  %vm3294_vm1 = vcmp.eq.s32.totalorder %v3089_v1, %v538_v13  ;;  %vm3301_vm2 = vcmp.eq.s32.totalorder %v3089_v1, %v537_v20  ;;  %vm3306_vm3 = vcmp.eq.s32.totalorder %v3089_v1, %v535_v6  ;;  %v5984_v13 = vmov 0 }
  0x1e   :  { %562 = vmatpush.msra.mxu0 %v3213_v43  ;;  %582 = vmatpush.msra.mxu1 %v3215_v44  ;;  %v3285_v2 = vld [vmem:[#allocation2 + $0x100] sm:$0xff]  ;;  %v5976_v28 = vsel %vm3294_vm1, 4294967295, %v5975_v28  ;;  %v5979_v59 = vsel %vm3301_vm2, 4294967295, %v5978_v59  ;;  %v5982_v32 = vsel %vm3306_vm3, 4294967295, %v5981_v32  ;;  %vm3311_vm4 = vcmp.eq.s32.totalorder %v3089_v1, %v536_v21  ;;  %v2678_v20 = vld [vmem:[%s5817_s2 + $0x28] sm:$0xff]  ;;  %v2676_v6 = vld [vmem:[%s5817_s2 + $0x18] sm:$0xff] }
  0x1f   :  { %621 = vmatpush.msra.mxu3 %v3197_v38  ;;  %602 = vmatpush.msra.mxu2 %v3219_v45  ;;  %5977 = vst [vmem:[#allocation22_spill] sm:$0xff] %v5976_v28  ;;  %v5985_v13 = vsel %vm3311_vm4, 4294967295, %v5984_v13  ;;  %v2677_v1 = vld [vmem:[%s5817_s2 + $0x20] sm:$0xff]  ;;  %v2675_v21 = vld [vmem:[%s5817_s2 + $0x10] sm:$0xff]  ;;  %vm2666_vm7 = vmpackc.low %vm3053_vm6, %vm276_vm0 }
  0x20   :  { %563 = vmatpush.msra.mxu0 %v3225_v47  ;;  %583 = vmatpush.msra.mxu1 %v3227_v48  ;;  %5980 = vst [vmem:[#allocation23_spill] sm:$0xff] %v5979_v59 }
  0x21   :  { %622 = vmatpush.msra.mxu3 %v3209_v42  ;;  %603 = vmatpush.msra.mxu2 %v3231_v49  ;;  %5983 = vst [vmem:[#allocation24_spill] sm:$0xff] %v5982_v32 }
  0x22   :  { %564 = vmatpush.msra.mxu0 %v3237_v51  ;;  %584 = vmatpush.msra.mxu1 %v3239_v52  ;;  %5986 = vst [vmem:[#allocation25_spill] sm:$0xff] %v5985_v13 }
  0x23   :  { %623 = vmatpush.msra.mxu3 %v3221_v46  ;;  %604 = vmatpush.msra.mxu2 %v3243_v53 }
  0x24   :  { %565 = vmatpush.msra.mxu0 %v3249_v55  ;;  %585 = vmatpush.msra.mxu1 %v3251_v56 }
  0x25   :  { %624 = vmatpush.msra.mxu3 %v3233_v50  ;;  %605 = vmatpush.msra.mxu2 %v3255_v57 }
  0x26   :  { %566 = vmatpush.msra.mxu0 %v3264_v60  ;;  %586 = vmatpush.msra.mxu1 %v3266_v61 }
  0x27   :  { %625 = vmatpush.msra.mxu3 %v3245_v54  ;;  %606 = vmatpush.msra.mxu2 %v3270_v62 }
  0x28   :  { %567 = vmatpush.msra.mxu0 %v3279_v17  ;;  %587 = vmatpush.msra.mxu1 %v3283_v24 }
  0x29   :  { %626 = vmatpush.msra.mxu3 %v3257_v58  ;;  %607 = vmatpush.msra.mxu2 %v3285_v2 }
  0x2a   :  { %734 = vmatpush.bf16.msrb.mxu0 %v2680_v0  ;;  %2681 = vmatpush.bf16.msrb.mxu1 %v2680_v0 }
  0x2b   :  { %627 = vmatpush.msra.mxu3 %v3272_v63  ;;  %2682 = vmatpush.bf16.msrb.mxu2 %v2680_v0 }
  0x2c   :  { %2633 = vmatmul.msk.f32.vlgmr.msra.gmra.mxu3 %vm3294_vm1, %v5832_v10  ;;  %2631 = vmatmul.msk.f32.vlgmr.msra.gmra.mxu2 %vm3301_vm2, %v5832_v10 }
  0x2d   :  { %2683 = vmatpush.bf16.msrb.mxu3 %v2680_v0  ;;  %2629 = vmatmul.msk.f32.vlgmr.msra.gmra.mxu0 %vm3306_vm3, %v5832_v10  ;;  %v649_v0 = vpack.c.bf16 %v3097_v4, %v3111_v8  ;;  %v657_v4 = vpack.c.bf16 %v3099_v5, %v3113_v9  ;;  %v639_v8 = vpack.c.bf16 %v3141_v19, %v3153_v23 }
  0x2e   :  { %2630 = vmatmul.msk.f32.vlgmr.msra.gmra.mxu1 %vm3311_vm4, %v5832_v10  ;;  %735 = vmatpush.bf16.msrb.mxu0 %v2679_v25  ;;  %v659_v5 = vpack.c.bf16 %v3233_v50, %v3245_v54  ;;  %v642_v9 = vpack.c.bf16 %v3266_v61, %v3283_v24  ;;  %v643_v19 = vpack.c.bf16 %v3239_v52, %v3251_v56 }
  0x2f   :  { %2684 = vmatpush.bf16.msrb.mxu1 %v2679_v25  ;;  %2685 = vmatpush.bf16.msrb.mxu2 %v2679_v25  ;;  %v650_v23 = vpack.c.bf16 %v3270_v62, %v3285_v2  ;;  %v661_v24 = vpack.c.bf16 %v3185_v34, %v3197_v38  ;;  %v662_v2 = vpack.c.bf16 %v3161_v26, %v3173_v30  ;;  %v3052_v38 = vmov 0.0   ;;  %v5997_v62 = vld [vmem:[#allocation15_spill] sm:$0xff] }
  0x30   :  { %v654_v34 = vpack.c.bf16 %v3171_v29, %v3183_v33  ;;  %79 = vst.msk [vmem:[#allocation6] sm:$0xff] %vm5963_vm5, %v3052_v38  ;;  %v5990_v33 = vld [vmem:[#allocation19_spill] sm:$0xff] }
  0x31   :  { %2686 = vmatpush.bf16.msrb.mxu3 %v2679_v25  ;;  %v640_v25 = vpack.c.bf16 %v3119_v11, %v3129_v15  ;;  %v2673_v11 = vld [vmem:[%s5817_s2] sm:$0xff]  ;;  %v634_v15 = vpack.c.bf16 %v3264_v60, %v3279_v17  ;;  %v658_v17 = vpack.c.bf16 %v3257_v58, %v3272_v63  ;;  %v5998_v63 = vld [vmem:[#allocation14_spill] sm:$0xff] }
  0x32   :  { %736 = vmatpush.bf16.msrb.mxu0 %v2678_v20 }
  0x33   :  { %2687 = vmatpush.bf16.msrb.mxu1 %v2678_v20  ;;  %2688 = vmatpush.bf16.msrb.mxu2 %v2678_v20 }
  0x35   :  { %2689 = vmatpush.bf16.msrb.mxu3 %v2678_v20  ;;  %v636_v20 = vpack.c.bf16 %v3213_v43, %v3225_v47  ;;  %v648_v43 = vpack.c.bf16 %v3121_v12, %v3131_v16  ;;  %v641_v47 = vpack.c.bf16 %v3095_v3, %v3105_v7  ;;  %v635_v12 = vpack.c.bf16 %v3237_v51, %v3249_v55  ;;  %v5992_v51 = vld [vmem:[#allocation12_spill] sm:$0xff] }
  0x36   :  { %737 = vmatpush.bf16.msrb.mxu0 %v2677_v1  ;;  %v651_v3 = vpack.c.bf16 %v3243_v53, %v3255_v57  ;;  %v637_v7 = vpack.c.bf16 %v3189_v35, %v3201_v39  ;;  %v660_v16 = vpack.c.bf16 %v3209_v42, %v3221_v46  ;;  %v638_v35 = vpack.c.bf16 %v3165_v27, %v3177_v31  ;;  %v3408_v53 = vld [vmem:[%s5818_s3] ss:$0 sm:$0xff]  ;;  %v5995_v55 = vld [vmem:[#allocation16_spill] sm:$0xff] }
  0x37   :  { %2690 = vmatpush.bf16.msrb.mxu1 %v2677_v1  ;;  %2691 = vmatpush.bf16.msrb.mxu2 %v2677_v1  ;;  %v652_v39 = vpack.c.bf16 %v3219_v45, %v3231_v49  ;;  %v644_v42 = vpack.c.bf16 %v3215_v44, %v3227_v48  ;;  %v653_v46 = vpack.c.bf16 %v3195_v37, %v3207_v41  ;;  %v5989_v48 = vld [vmem:[#allocation20_spill] sm:$0xff]  ;;  %v5991_v49 = vld [vmem:[#allocation17_spill] sm:$0xff]  ;;  %v2667_v52 = vpack.c.bf16 0.0, %v5992_v51 }
  0x38   :  { %v663_v27 = vpack.c.bf16 %v3137_v18, %v3149_v22  ;;  %v645_v31 = vpack.c.bf16 %v3191_v36, %v3203_v40  ;;  %v5987_v22 = vld [vmem:[#allocation13_spill] sm:$0xff]  ;;  %v655_v50 = vpack.c.bf16 %v5991_v49, %v5990_v33 }
  0x39   :  { %2692 = vmatpush.bf16.msrb.mxu3 %v2677_v1  ;;  %v2674_v1 = vld [vmem:[%s5817_s2 + $0x8] sm:$0xff]  ;;  %v664_v36 = vpack.c.bf16 %v5987_v22, %v3127_v14  ;;  %v5988_v40 = vld [vmem:[#allocation21_spill] sm:$0xff] }
  0x3a   :  { %738 = vmatpush.bf16.msrb.mxu0 %v2676_v6  ;;  %v646_v29 = vpack.c.bf16 %v5989_v48, %v5988_v40  ;;  %v5994_v14 = vld [vmem:[#allocation18_spill] sm:$0xff] }
  0x3b   :  { %2693 = vmatpush.bf16.msrb.mxu1 %v2676_v6  ;;  %2694 = vmatpush.bf16.msrb.mxu2 %v2676_v6  ;;  %v647_v56 = vpack.c.bf16 %v5995_v55, %v5994_v14 }
  0x3d   :  { %2695 = vmatpush.bf16.msrb.mxu3 %v2676_v6  ;;  %v656_v6 = vpack.c.bf16 %v5998_v63, %v5997_v62 }
  0x3e   :  { %739 = vmatpush.bf16.msrb.mxu0 %v2675_v21 }
  0x3f   :  { %2696 = vmatpush.bf16.msrb.mxu1 %v2675_v21  ;;  %2697 = vmatpush.bf16.msrb.mxu2 %v2675_v21 }
  0x41   :  { %2698 = vmatpush.bf16.msrb.mxu3 %v2675_v21 }
  0x42   :  { %740 = vmatpush.bf16.msrb.mxu0 %v2674_v1 }
  0x43   :  { %2699 = vmatpush.bf16.msrb.mxu1 %v2674_v1  ;;  %2700 = vmatpush.bf16.msrb.mxu2 %v2674_v1 }
  0x45   :  { %2701 = vmatpush.bf16.msrb.mxu3 %v2674_v1 }
  0x46   :  { %741 = vmatpush.bf16.msrb.mxu0 %v2673_v11 }
  0x47   :  { %2702 = vmatpush.bf16.msrb.mxu1 %v2673_v11  ;;  %2703 = vmatpush.bf16.msrb.mxu2 %v2673_v11 }
  0x49   :  { %2704 = vmatpush.bf16.msrb.mxu3 %v2673_v11  ;;  %742 = vmatmul.bf16.vlgmr.msrb.gmra.mxu0 %v634_v15 }
  0x4a   :  { %767 = vmatmul.bf16.vlgmr.msrb.gmra.mxu1 %v639_v8  ;;  %812 = vmatmul.bf16.vlgmr.msrb.gmra.mxu2 %v648_v43 }
  0x4c   :  { %857 = vmatmul.bf16.vlgmr.msrb.gmra.mxu3 %v657_v4 }
  0x59   :  { %747 = vmatmul.bf16.gmra.mxu0 %v635_v12 }
  0x5a   :  { %772 = vmatmul.bf16.gmra.mxu1 %v640_v25  ;;  %817 = vmatmul.bf16.gmra.mxu2 %v649_v0 }
  0x5c   :  { %862 = vmatmul.bf16.gmra.mxu3 %v658_v17 }
  0x69   :  { %752 = vmatmul.bf16.gmra.mxu0 %v636_v20 }
  0x6a   :  { %777 = vmatmul.bf16.gmra.mxu1 %v641_v47  ;;  %822 = vmatmul.bf16.gmra.mxu2 %v650_v23 }
  0x6c   :  { %867 = vmatmul.bf16.gmra.mxu3 %v659_v5 }
  0x79   :  { %757 = vmatmul.bf16.gmra.mxu0 %v637_v7 }
  0x7a   :  { %782 = vmatmul.bf16.gmra.mxu1 %v642_v9  ;;  %827 = vmatmul.bf16.gmra.mxu2 %v651_v3 }
  0x7c   :  { %872 = vmatmul.bf16.gmra.mxu3 %v660_v16 }
  0x89   :  { %762 = vmatmul.bf16.gmra.mxu0 %v638_v35 }
  0x8a   :  { %787 = vmatmul.bf16.gmra.mxu1 %v643_v19  ;;  %832 = vmatmul.bf16.gmra.mxu2 %v652_v39 }
  0x8c   :  { %877 = vmatmul.bf16.gmra.mxu3 %v661_v24 }
  0x9a   :  { %792 = vmatmul.bf16.gmra.mxu1 %v644_v42  ;;  %837 = vmatmul.bf16.gmra.mxu2 %v653_v46 }
  0x9c   :  { %882 = vmatmul.bf16.gmra.mxu3 %v662_v2 }
  0xaa   :  { %797 = vmatmul.bf16.gmra.mxu1 %v645_v31  ;;  %842 = vmatmul.bf16.gmra.mxu2 %v654_v34  ;;  %v569_v26 = vpop.f32.mrf.mxu0 }
  0xab   :  { %v589_v30 = vpop.f32.mrf.mxu1 }
  0xac   :  { %887 = vmatmul.bf16.gmra.mxu3 %v663_v27  ;;  %v590_v37 = vadd.f32 %v589_v30, %v569_v26 }
  0xaf   :  { %v609_v41 = vpop.f32.mrf.mxu2  ;;  %v629_v44 = vpop.f32.mrf.mxu3 }
  0xb0   :  { %v610_v45 = vadd.f32 %v609_v41, %v590_v37 }
  0xb2   :  { %v630_v18 = vadd.f32 %v629_v44, %v610_v45 }
  0xb4   :  { %633 = vst [vmem:[#allocation5] sm:$0xff] %v630_v18 }
  0xb5   :  { %2597 = dma.vmem_to_hbm [thread:$0]  %s2593_s20, 128, %s2595_s18, [#allocation4]  }
  0xba   :  { %802 = vmatmul.bf16.gmra.mxu1 %v646_v29  ;;  %847 = vmatmul.bf16.gmra.mxu2 %v655_v50 }
  0xbc   :  { %892 = vmatmul.bf16.gmra.mxu3 %v664_v36 }
  0xc6   :  { %v743_v57 = vpop.f32.mrf.mxu0 }
  0xc7   :  { %v768_v58 = vpop.f32.mrf.mxu1  ;;  %v3415_v60 = vadd.f32 %v3408_v53, %v743_v57 }
  0xc8   :  { %v3418_v61 = vadd.f32 %v3408_v53, %v768_v58 }
  0xc9   :  { %5996 = vst [vmem:[#allocation13_spill] sm:$0xff] %v3415_v60  ;;  %v904_v25 = vsel %vm5963_vm5, %v3415_v60, -inf }
  0xca   :  { %v934_v21 = vsel %vm5963_vm5, %v3418_v61, -inf  ;;  %807 = vmatmul.bf16.gmra.mxu1 %v647_v56  ;;  %905 = vmax.xlane.f32.xlu0 %v904_v25 }
  0xcb   :  { %935 = vmax.xlane.f32.xlu1 %v934_v21  ;;  %852 = vmatmul.bf16.gmra.mxu2 %v656_v6 }
  0xcc   :  { %2668 = vmatmul.msk.bf16.gmra.mxu3 %vm2666_vm7, %v2667_v52 }
  0xcd   :  { %v813_v1 = vpop.f32.mrf.mxu2 }
  0xce   :  { %v3430_v11 = vadd.f32 %v3408_v53, %v813_v1  ;;  %v745_v4 = vpop.f32.mrf.mxu0 }
  0xcf   :  { %v858_v0 = vpop.f32.mrf.mxu3  ;;  %v770_v8 = vpop.f32.mrf.mxu1  ;;  %v3445_v3 = vadd.f32 %v3408_v53, %v745_v4 }
  0xd0   :  { %v3427_v20 = vadd.f32 %v3408_v53, %v858_v0  ;;  %v3433_v15 = vadd.f32 %v3408_v53, %v770_v8  ;;  %v988_v43 = vsel %vm5963_vm5, %v3430_v11, -inf }
  0xd1   :  { %v907_v39 = vsel %vm5963_vm5, %v3445_v3, -inf }
  0xd2   :  { %v1042_v47 = vsel %vm5963_vm5, %v3427_v20, -inf  ;;  %v937_v5 = vsel %vm5963_vm5, %v3433_v15, -inf }
  0xd3   :  { %938 = vmax.xlane.f32.xlu2 %v937_v5  ;;  %989 = vmax.xlane.f32.xlu1 %v988_v43 }
  0xd4   :  { %1043 = vmax.xlane.f32.xlu0 %v1042_v47 }
  0xd5   :  { %v815_v12 = vpop.f32.mrf.mxu2 }
  0xd6   :  { %v748_v7 = vpop.f32.mrf.mxu0  ;;  %v3460_v42 = vadd.f32 %v3408_v53, %v815_v12 }
  0xd7   :  { %v860_v9 = vpop.f32.mrf.mxu3  ;;  %v773_v16 = vpop.f32.mrf.mxu1  ;;  %v3448_v19 = vadd.f32 %v3408_v53, %v748_v7 }
  0xd8   :  { %v3442_v17 = vadd.f32 %v3408_v53, %v860_v9  ;;  %v3457_v2 = vadd.f32 %v3408_v53, %v773_v16  ;;  %v991_v30 = vsel %vm5963_vm5, %v3460_v42, -inf }
  0xd9   :  { %v910_v24 = vsel %vm5963_vm5, %v3448_v19, -inf }
  0xda   :  { %v1045_v23 = vsel %vm5963_vm5, %v3442_v17, -inf  ;;  %v940_v26 = vsel %vm5963_vm5, %v3457_v2, -inf }
  0xdb   :  { %1046 = vmax.xlane.f32.xlu2 %v1045_v23  ;;  %911 = vmax.xlane.f32.xlu1 %v910_v24 }
  0xdc   :  { %908 = vmax.xlane.f32.xlu0 %v907_v39 }
  0xdd   :  { %v818_v46 = vpop.f32.mrf.mxu2 }
  0xde   :  { %v750_v27 = vpop.f32.mrf.mxu0  ;;  %v3493_v52 = vadd.f32 %v3408_v53, %v818_v46 }
  0xdf   :  { %v863_v35 = vpop.f32.mrf.mxu3  ;;  %v775_v31 = vpop.f32.mrf.mxu1  ;;  %v3463_v34 = vadd.f32 %v3408_v53, %v750_v27 }
  0xe0   :  { %v3472_v41 = vadd.f32 %v3408_v53, %v775_v31  ;;  %v3478_v18 = vadd.f32 %v3408_v53, %v863_v35  ;;  %v994_v56 = vsel %vm5963_vm5, %v3493_v52, -inf }
  0xe1   :  { %v913_v38 = vsel %vm5963_vm5, %v3463_v34, -inf }
  0xe2   :  { %6000 = vst [vmem:[#allocation20_spill] sm:$0xff] %v3478_v18  ;;  %v943_v40 = vsel %vm5963_vm5, %v3472_v41, -inf  ;;  %v1048_v29 = vsel %vm5963_vm5, %v3478_v18, -inf }
  0xe3   :  { %992 = vmax.xlane.f32.xlu2 %v991_v30  ;;  %914 = vmax.xlane.f32.xlu1 %v913_v38 }
  0xe4   :  { %941 = vmax.xlane.f32.xlu0 %v940_v26 }
  0xe5   :  { %v820_v45 = vpop.f32.mrf.mxu2 }
  0xe6   :  { %v753_v48 = vpop.f32.mrf.mxu0  ;;  %v3490_v50 = vadd.f32 %v3408_v53, %v820_v45 }
  0xe7   :  { %v865_v37 = vpop.f32.mrf.mxu3  ;;  %v778_v22 = vpop.f32.mrf.mxu1  ;;  %v3487_v49 = vadd.f32 %v3408_v53, %v753_v48 }
  0xe8   :  { %v3475_v44 = vadd.f32 %v3408_v53, %v865_v37  ;;  %v997_v55 = vsel %vm5963_vm5, %v3490_v50, -inf  ;;  %v3505_v62 = vadd.f32 %v3408_v53, %v778_v22 }
  0xe9   :  { %v916_v54 = vsel %vm5963_vm5, %v3487_v49, -inf }
  0xea   :  { %5999 = vst [vmem:[#allocation21_spill] sm:$0xff] %v3475_v44  ;;  %v1051_v36 = vsel %vm5963_vm5, %v3475_v44, -inf  ;;  %v946_v0 = vsel %vm5963_vm5, %v3505_v62, -inf }
  0xeb   :  { %1052 = vmax.xlane.f32.xlu2 %v1051_v36  ;;  %944 = vmax.xlane.f32.xlu1 %v943_v40 }
  0xec   :  { %1049 = vmax.xlane.f32.xlu0 %v1048_v29 }
  0xed   :  { %v823_v51 = vpop.f32.mrf.mxu2 }
  0xee   :  { %v755_v25 = vpop.f32.mrf.mxu0  ;;  %v3520_v47 = vadd.f32 %v3408_v53, %v823_v51 }
  0xef   :  { %v868_v33 = vpop.f32.mrf.mxu3  ;;  %v780_v14 = vpop.f32.mrf.mxu1  ;;  %v3535_v39 = vadd.f32 %v3408_v53, %v755_v25 }
  0xf0   :  { %v3502_v58 = vadd.f32 %v3408_v53, %v868_v33  ;;  %v3508_v6 = vadd.f32 %v3408_v53, %v780_v14  ;;  %6003 = vst [vmem:[#allocation12_spill] sm:$0xff] %v3520_v47  ;;  %v1000_v16 = vsel %vm5963_vm5, %v3520_v47, -inf }
  0xf1   :  { %v919_v30 = vsel %vm5963_vm5, %v3535_v39, -inf }
  0xf2   :  { %6001 = vst [vmem:[#allocation19_spill] sm:$0xff] %v3502_v58  ;;  %v1054_v21 = vsel %vm5963_vm5, %v3502_v58, -inf  ;;  %v949_v4 = vsel %vm5963_vm5, %v3508_v6, -inf }
  0xf3   :  { %917 = vmax.xlane.f32.xlu2 %v916_v54  ;;  %998 = vmax.xlane.f32.xlu1 %v997_v55 }
  0xf4   :  { %995 = vmax.xlane.f32.xlu0 %v994_v56 }
  0xf5   :  { %v825_v63 = vpop.f32.mrf.mxu2 }
  0xf6   :  { %v758_v7 = vpop.f32.mrf.mxu0  ;;  %v3538_v46 = vadd.f32 %v3408_v53, %v825_v63 }
  0xf7   :  { %v870_v57 = vpop.f32.mrf.mxu3  ;;  %v783_v1 = vpop.f32.mrf.mxu1  ;;  %v3553_v36 = vadd.f32 %v3408_v53, %v758_v7 }
  0xf8   :  { %v3517_v43 = vadd.f32 %v3408_v53, %v783_v1  ;;  %v3523_v5 = vadd.f32 %v3408_v53, %v870_v57  ;;  %6005 = vst [vmem:[#allocation18_spill] sm:$0xff] %v3538_v46  ;;  %v1003_v37 = vsel %vm5963_vm5, %v3538_v46, -inf }
  0xf9   :  { %v922_v54 = vsel %vm5963_vm5, %v3553_v36, -inf }
  0xfa   :  { %6002 = vst [vmem:[#allocation17_spill] sm:$0xff] %v3517_v43  ;;  %v952_v12 = vsel %vm5963_vm5, %v3517_v43, -inf  ;;  %v1057_v23 = vsel %vm5963_vm5, %v3523_v5, -inf }
  0xfb   :  { %947 = vmax.xlane.f32.xlu2 %v946_v0  ;;  %1055 = vmax.xlane.f32.xlu1 %v1054_v21  ;;  %6004 = vst [vmem:[#allocation11_spill] sm:$0xff] %v3523_v5 }
  0xfc   :  { %950 = vmax.xlane.f32.xlu0 %v949_v4 }
  0xfd   :  { %v828_v9 = vpop.f32.mrf.mxu2 }
  0xfe   :  { %v3532_v24 = vadd.f32 %v3408_v53, %v828_v9  ;;  %v760_v38 = vpop.f32.mrf.mxu0 }
  0xff   :  { %v873_v8 = vpop.f32.mrf.mxu3  ;;  %v785_v27 = vpop.f32.mrf.mxu1  ;;  %v3550_v22 = vadd.f32 %v3408_v53, %v760_v38 }
 0x100   :  { %v1006_v31 = vsel %vm5963_vm5, %v3532_v24, -inf  ;;  %v3547_v45 = vadd.f32 %v3408_v53, %v873_v8  ;;  %v3565_v55 = vadd.f32 %v3408_v53, %v785_v27 }
 0x101   :  { %v925_v51 = vsel %vm5963_vm5, %v3550_v22, -inf }
 0x102   :  { %6006 = vst [vmem:[#allocation16_spill] sm:$0xff] %v3547_v45  ;;  %v1060_v29 = vsel %vm5963_vm5, %v3547_v45, -inf  ;;  %v955_v0 = vsel %vm5963_vm5, %v3565_v55, -inf }
 0x103   :  { %1001 = vmax.xlane.f32.xlu2 %v1000_v16  ;;  %953 = vmax.xlane.f32.xlu1 %v952_v12  ;;  %6008 = vst [vmem:[#allocation14_spill] sm:$0xff] %v3565_v55 }
 0x104   :  { %1058 = vmax.xlane.f32.xlu0 %v1057_v23 }
 0x105   :  { %v830_v26 = vpop.f32.mrf.mxu2 }
 0x106   :  { %v763_v25 = vpop.f32.mrf.mxu0  ;;  %v3583_v12 = vadd.f32 %v3408_v53, %v830_v26 }
 0x107   :  { %v875_v35 = vpop.f32.mrf.mxu3  ;;  %v788_v40 = vpop.f32.mrf.mxu1  ;;  %v3577_v8 = vadd.f32 %v3408_v53, %v763_v25 }
 0x108   :  { %v3562_v14 = vadd.f32 %v3408_v53, %v788_v40  ;;  %v3568_v56 = vadd.f32 %v3408_v53, %v875_v35  ;;  %v1009_v35 = vsel %vm5963_vm5, %v3583_v12, -inf }
 0x109   :  { %v928_v7 = vsel %vm5963_vm5, %v3577_v8, -inf }
 0x10a   :  { %6007 = vst [vmem:[#allocation15_spill] sm:$0xff] %v3562_v14  ;;  %v958_v63 = vsel %vm5963_vm5, %v3562_v14, -inf  ;;  %v1063_v1 = vsel %vm5963_vm5, %v3568_v56, -inf }
 0x10b   :  { %920 = vmax.xlane.f32.xlu2 %v919_v30  ;;  %1007 = vmax.xlane.f32.xlu1 %v1006_v31  ;;  %6009 = vst [vmem:[#allocation26_spill] sm:$0xff] %v3568_v56 }
 0x10c   :  { %1004 = vmax.xlane.f32.xlu0 %v1003_v37 }
 0x10d   :  { %v833_v33 = vpop.f32.mrf.mxu2 }
 0x10e   :  { %v765_v31 = vpop.f32.mrf.mxu0  ;;  %v3595_v26 = vadd.f32 %v3408_v53, %v833_v33 }
 0x10f   :  { %v878_v48 = vpop.f32.mrf.mxu3  ;;  %v790_v57 = vpop.f32.mrf.mxu1  ;;  %v3598_v37 = vadd.f32 %v3408_v53, %v765_v31 }
 0x110   :  { %v3580_v9 = vadd.f32 %v3408_v53, %v878_v48  ;;  %v3592_v38 = vadd.f32 %v3408_v53, %v790_v57  ;;  %v1012_v40 = vsel %vm5963_vm5, %v3595_v26, -inf }
 0x112   :  { %v1066_v16 = vsel %vm5963_vm5, %v3580_v9, -inf  ;;  %6010 = vst [vmem:[#allocation27_spill] sm:$0xff] %v3592_v38  ;;  %v961_v48 = vsel %vm5963_vm5, %v3592_v38, -inf }
 0x113   :  { %1061 = vmax.xlane.f32.xlu2 %v1060_v29  ;;  %926 = vmax.xlane.f32.xlu1 %v925_v51  ;;  %v931_v29 = vsel %vm5963_vm5, %v3598_v37, -inf }
 0x114   :  { %923 = vmax.xlane.f32.xlu0 %v922_v54 }
 0x115   :  { %v835_v4 = vpop.f32.mrf.mxu2 }
 0x117   :  { %v880_v21 = vpop.f32.mrf.mxu3  ;;  %v793_v23 = vpop.f32.mrf.mxu1 }
 0x118   :  { %v3610_v57 = vadd.f32 %v3408_v53, %v880_v21  ;;  %v3622_v21 = vadd.f32 %v3408_v53, %v793_v23 }
 0x11b   :  { %956 = vmax.xlane.f32.xlu2 %v955_v0  ;;  %1064 = vmax.xlane.f32.xlu1 %v1063_v1  ;;  %v1069_v1 = vsel %vm5963_vm5, %v3610_v57, -inf }
 0x11c   :  { %959 = vmax.xlane.f32.xlu0 %v958_v63  ;;  %v3613_v63 = vadd.f32 %v3408_v53, %v835_v4 }
 0x11d   :  { %v838_v30 = vpop.f32.mrf.mxu2 }
 0x11e   :  { %v3607_v54 = vadd.f32 %v3408_v53, %v838_v30 }
 0x11f   :  { %v883_v27 = vpop.f32.mrf.mxu3  ;;  %v795_v51 = vpop.f32.mrf.mxu1 }
 0x120   :  { %v1018_v0 = vsel %vm5963_vm5, %v3607_v54, -inf }
 0x123   :  { %929 = vmax.xlane.f32.xlu2 %v928_v7  ;;  %1010 = vmax.xlane.f32.xlu1 %v1009_v35  ;;  %v1015_v7 = vsel %vm5963_vm5, %v3613_v63, -inf  ;;  %v3628_v35 = vadd.f32 %v3408_v53, %v883_v27 }
 0x124   :  { %1067 = vmax.xlane.f32.xlu0 %v1066_v16 }
 0x125   :  { %v840_v25 = vpop.f32.mrf.mxu2  ;;  %v1072_v23 = vsel %vm5963_vm5, %v3628_v35, -inf }
 0x126   :  { %v3640_v27 = vadd.f32 %v3408_v53, %v840_v25 }
 0x127   :  { %v885_v33 = vpop.f32.mrf.mxu3  ;;  %v798_v16 = vpop.f32.mrf.mxu1 }
 0x128   :  { %v3625_v4 = vadd.f32 %v3408_v53, %v885_v33  ;;  %v1021_v10 = vsel %vm5963_vm5, %v3640_v27, -inf }
 0x12b   :  { %1013 = vmax.xlane.f32.xlu2 %v1012_v40  ;;  %962 = vmax.xlane.f32.xlu1 %v961_v48  ;;  %v964_v40 = vsel %vm5963_vm5, %v3622_v21, -inf  ;;  %v1075_v48 = vsel %vm5963_vm5, %v3625_v4, -inf }
 0x12c   :  { %932 = vmax.xlane.f32.xlu0 %v931_v29  ;;  %v3637_v29 = vadd.f32 %v3408_v53, %v798_v16 }
 0x12d   :  { %v843_v30 = vpop.f32.mrf.mxu2 }
 0x12e   :  { %v3662_v59 = vadd.f32 %v3408_v53, %v843_v30 }
 0x12f   :  { %v888_v31 = vpop.f32.mrf.mxu3 }
 0x133   :  { %1070 = vmax.xlane.f32.xlu2 %v1069_v1  ;;  %1019 = vmax.xlane.f32.xlu1 %v1018_v0  ;;  %v3645_v1 = vadd.f32 %v3408_v53, %v795_v51 }
 0x134   :  { %1016 = vmax.xlane.f32.xlu0 %v1015_v7  ;;  %v800_v7 = vpop.f32.mrf.mxu1 }
 0x135   :  { %v845_v16 = vpop.f32.mrf.mxu2  ;;  %v967_v25 = vsel %vm5963_vm5, %v3645_v1, -inf  ;;  %v3674_v30 = vadd.f32 %v3408_v53, %v800_v7 }
 0x136   :  { %v3657_v51 = vadd.f32 %v3408_v53, %v845_v16 }
 0x138   :  { %6012 = vst [vmem:[#allocation29_spill] sm:$0xff] %v3657_v51 }
 0x13b   :  { %965 = vmax.xlane.f32.xlu2 %v964_v40  ;;  %1076 = vmax.xlane.f32.xlu1 %v1075_v48  ;;  %v970_v40 = vsel %vm5963_vm5, %v3637_v29, -inf  ;;  %v890_v48 = vpop.f32.mrf.mxu3 }
 0x13c   :  { %1073 = vmax.xlane.f32.xlu0 %v1072_v23  ;;  %v3654_v23 = vadd.f32 %v3408_v53, %v888_v31  ;;  %v803_v14 = vpop.f32.mrf.mxu1  ;;  %v1024_v31 = vsel %vm5963_vm5, %v3662_v59, -inf  ;;  %v3681_v55 = vadd.f32 %v3408_v53, %v890_v48 }
 0x13d   :  { %v3642_v0 = vpop.xlane.xlu0 %905 }
 0x13e   :  { %v936_v33 = vpop.xlane.xlu1 %935  ;;  %6011 = vst [vmem:[#allocation28_spill] sm:$0xff] %v3642_v0  ;;  %v1081_v46 = vsel %vm5963_vm5, %v3681_v55, -inf }
 0x143   :  { %1022 = vmax.xlane.f32.xlu2 %v1021_v10  ;;  %971 = vmax.xlane.f32.xlu1 %v970_v40  ;;  %v1078_v10 = vsel %vm5963_vm5, %v3654_v23, -inf  ;;  %v1027_v40 = vsel %vm5963_vm5, %v3657_v51, -inf }
 0x144   :  { %968 = vmax.xlane.f32.xlu0 %v967_v25  ;;  %v893_v25 = vpop.f32.mrf.mxu3  ;;  %v805_v7 = vpop.f32.mrf.mxu1 }
 0x145   :  { %v3671_v16 = vadd.f32 %v3408_v53, %v893_v25  ;;  %v848_v25 = vpop.f32.mrf.mxu2  ;;  %v3696_v43 = vadd.f32 %v3408_v53, %v805_v7 }
 0x146   :  { %v3659_v28 = vpop.xlane.xlu2 %938  ;;  %v990_v13 = vpop.xlane.xlu1 %989  ;;  %v3693_v48 = vadd.f32 %v3408_v53, %v848_v25 }
 0x147   :  { %v1044_v32 = vpop.xlane.xlu0 %1043  ;;  %v1124_v25 = vsub.f32 %v3430_v11, %v990_v13  ;;  %v979_v7 = vsel %vm5963_vm5, %v3696_v43, -inf }
 0x148   :  { %6013 = vst [vmem:[#allocation30_spill] sm:$0xff] %v3693_v48 }
 0x149   :  { %v1216_v18 = vmul.f32 1.442695, %v1124_v25 }
 0x14b   :  { %1079 = vmax.xlane.f32.xlu2 %v1078_v10  ;;  %1028 = vmax.xlane.f32.xlu1 %v1027_v40  ;;  %v1084_v10 = vsel %vm5963_vm5, %v3671_v16, -inf  ;;  %v1142_v40 = vsub.f32 %v3427_v20, %v1044_v32  ;;  %v3703_v20 = vadd.f32 %v3408_v53, %v803_v14 }
 0x14c   :  { %1025 = vmax.xlane.f32.xlu0 %v1024_v31  ;;  %v973_v31 = vsel %vm5963_vm5, %v3674_v30, -inf }
 0x14d   :  { %v1252_v5 = vmul.f32 1.442695, %v1142_v40  ;;  %v1106_v40 = vsub.f32 %v3418_v61, %v936_v33  ;;  %v976_v14 = vsel %vm5963_vm5, %v3703_v20, -inf  ;;  %v850_v58 = vpop.f32.mrf.mxu2 }
 0x14e   :  { %v3676_v38 = vpop.xlane.xlu2 %1046  ;;  %v3678_v56 = vpop.xlane.xlu1 %911 }
 0x14f   :  { %v3683_v45 = vpop.xlane.xlu0 %908  ;;  %2714 = vpow2.f32 %v1252_v5  ;;  %v1180_v44 = vmul.f32 1.442695, %v1106_v40  ;;  %v3725_v5 = vadd.f32 %v3408_v53, %v850_v58  ;;  %v808_v40 = vpop.f32.mrf.mxu1 }
 0x150   :  { %2716 = vpow2.f32 %v1216_v18  ;;  %v3736_v58 = vadd.f32 %v3408_v53, %v808_v40 }
 0x151   :  { %6016 = vst [vmem:[#allocation33_spill] sm:$0xff] %v3725_v5  ;;  %2718 = vpow2.f32 %v1180_v44 }
 0x152   :  { %6018 = vst [vmem:[#allocation35_spill] sm:$0xff] %v3736_v58 }
 0x153   :  { %974 = vmax.xlane.f32.xlu2 %v973_v31  ;;  %1085 = vmax.xlane.f32.xlu1 %v1084_v10  ;;  %v1030_v10 = vsel %vm5963_vm5, %v3693_v48, -inf }
 0x154   :  { %1082 = vmax.xlane.f32.xlu0 %v1081_v46  ;;  %v895_v46 = vpop.f32.mrf.mxu3 }
 0x155   :  { %v3716_v60 = vadd.f32 %v3408_v53, %v895_v46  ;;  %v3722_v61 = vpop.eup %2714 }
 0x156   :  { %v3698_v47 = vpop.xlane.xlu2 %992  ;;  %v3700_v32 = vpop.xlane.xlu1 %914  ;;  %6015 = vst [vmem:[#allocation32_spill] sm:$0xff] %v3722_v61  ;;  %v1426_v46 = vsel %vm5963_vm5, %v3722_v61, 0.0 }
 0x157   :  { %v3705_v31 = vpop.xlane.xlu0 %941  ;;  %v1087_v25 = vsel %vm5963_vm5, %v3716_v60, -inf  ;;  %v3742_v44 = vpop.eup %2716 }
 0x158   :  { %6019 = vst [vmem:[#allocation36_spill] sm:$0xff] %v3742_v44  ;;  %v853_v61 = vpop.f32.mrf.mxu2  ;;  %v1372_v40 = vsel %vm5963_vm5, %v3742_v44, 0.0 }
 0x15b   :  { %1031 = vmax.xlane.f32.xlu2 %v1030_v10  ;;  %980 = vmax.xlane.f32.xlu1 %v979_v7  ;;  %v1033_v7 = vsel %vm5963_vm5, %v3725_v5, -inf  ;;  %v3757_v5 = vadd.f32 %v3408_v53, %v853_v61 }
 0x15c   :  { %977 = vmax.xlane.f32.xlu0 %v976_v14  ;;  %v898_v10 = vpop.f32.mrf.mxu3 }
 0x15d   :  { %6021 = vst [vmem:[#allocation38_spill] sm:$0xff] %v3757_v5  ;;  %v1036_v61 = vsel %vm5963_vm5, %v3757_v5, -inf }
 0x15e   :  { %v3718_v13 = vpop.xlane.xlu2 %1052  ;;  %v3720_v11 = vpop.xlane.xlu1 %944 }
 0x15f   :  { %6014 = vst [vmem:[#allocation31_spill] sm:$0xff] %v3718_v13  ;;  %v3727_v33 = vpop.xlane.xlu0 %1049  ;;  %v3746_v13 = vpop.eup %2718 }
 0x160   :  { %6017 = vst [vmem:[#allocation34_spill] sm:$0xff] %v3727_v33  ;;  %v1318_v0 = vsel %vm5963_vm5, %v3746_v13, 0.0 }
 0x161   :  { %6020 = vst [vmem:[#allocation37_spill] sm:$0xff] %v3746_v13  ;;  %v1143_v13 = vsub.f32 %v3442_v17, %v3676_v38  ;;  %v810_v38 = vpop.f32.mrf.mxu1 }
 0x163   :  { %1088 = vmax.xlane.f32.xlu2 %v1087_v25  ;;  %1427 = vadd.xlane.f32.xlu1 %v1426_v46  ;;  %v982_v25 = vsel %vm5963_vm5, %v3736_v58, -inf  ;;  %v1107_v46 = vsub.f32 %v3433_v15, %v3659_v28  ;;  %v3767_v15 = vadd.f32 %v3408_v53, %v898_v10  ;;  %v1254_v17 = vmul.f32 1.442695, %v1143_v13 }
 0x164   :  { %1034 = vmax.xlane.f32.xlu0 %v1033_v7  ;;  %v900_v7 = vpop.f32.mrf.mxu3  ;;  %v1108_v13 = vsub.f32 %v3457_v2, %v3705_v31 }
 0x165   :  { %v1182_v48 = vmul.f32 1.442695, %v1107_v46  ;;  %v3760_v58 = vadd.f32 %v3408_v53, %v900_v7  ;;  %v1097_v46 = vsub.f32 %v3445_v3, %v3683_v45  ;;  %v855_v7 = vpop.f32.mrf.mxu2  ;;  %v1090_v10 = vsel %vm5963_vm5, %v3767_v15, -inf }
 0x166   :  { %v3738_v14 = vpop.xlane.xlu2 %917  ;;  %v3740_v18 = vpop.xlane.xlu1 %998  ;;  %v3782_v5 = vadd.f32 %v3408_v53, %v855_v7 }
 0x167   :  { %v3744_v33 = vpop.xlane.xlu0 %995  ;;  %2720 = vpow2.f32 %v1182_v48  ;;  %v1162_v48 = vmul.f32 1.442695, %v1097_v46  ;;  %v1125_v46 = vsub.f32 %v3460_v42, %v3698_v47 }
 0x168   :  { %2722 = vpow2.f32 %v1254_v17 }
 0x16b   :  { %983 = vmax.xlane.f32.xlu2 %v982_v25  ;;  %1373 = vadd.xlane.f32.xlu1 %v1372_v40  ;;  %v1093_v40 = vsel %vm5963_vm5, %v3760_v58, -inf }
 0x16c   :  { %1319 = vadd.xlane.f32.xlu0 %v1318_v0  ;;  %v1099_v0 = vsub.f32 %v3463_v34, %v3700_v32  ;;  %v3791_v32 = vadd.f32 %v3408_v53, %v810_v38  ;;  %v1039_v53 = vsel %vm5963_vm5, %v3782_v5, -inf  ;;  %v1098_v38 = vsub.f32 %v3448_v19, %v3678_v56 }
 0x16d   :  { %v3788_v45 = vpop.eup %2720 }
 0x16e   :  { %v3762_v51 = vpop.xlane.xlu2 %947  ;;  %v3764_v28 = vpop.xlane.xlu1 %1055  ;;  %v1166_v44 = vmul.f32 1.442695, %v1099_v0  ;;  %v985_v7 = vsel %vm5963_vm5, %v3791_v32, -inf }
 0x16f   :  { %v951_v25 = vpop.xlane.xlu0 %950  ;;  %v3806_v31 = vpop.eup %2722 }
 0x170   :  { %2724 = vpow2.f32 %v1166_v44  ;;  %v1111_v0 = vsub.f32 %v3508_v6, %v951_v25  ;;  %v1218_v6 = vmul.f32 1.442695, %v1125_v46 }
 0x171   :  { %2726 = vpow2.f32 %v1162_v48  ;;  %v1126_v48 = vsub.f32 %v3493_v52, %v3744_v33 }
 0x172   :  { %v1190_v2 = vmul.f32 1.442695, %v1111_v0 }
 0x173   :  { %1037 = vmax.xlane.f32.xlu2 %v1036_v61  ;;  %1094 = vmax.xlane.f32.xlu1 %v1093_v40  ;;  %v1321_v40 = vsel %vm5963_vm5, %v3788_v45, 0.0  ;;  %v1220_v19 = vmul.f32 1.442695, %v1126_v48  ;;  %v1127_v48 = vsub.f32 %v3490_v50, %v3740_v18 }
 0x174   :  { %1091 = vmax.xlane.f32.xlu0 %v1090_v10  ;;  %v1184_v10 = vmul.f32 1.442695, %v1108_v13  ;;  %v1429_v13 = vsel %vm5963_vm5, %v3806_v31, 0.0 }
 0x176   :  { %v3784_v34 = vpop.xlane.xlu2 %1001  ;;  %v3786_v3 = vpop.xlane.xlu1 %953  ;;  %2728 = vpow2.f32 %v1184_v10 }
 0x177   :  { %v3793_v61 = vpop.xlane.xlu0 %1058  ;;  %v3808_v42 = vpop.eup %2724  ;;  %2730 = vpow2.f32 %v1190_v2 }
 0x178   :  { %v3812_v17 = vpop.eup %2726  ;;  %2732 = vpow2.f32 %v1218_v6  ;;  %v1297_v0 = vsel %vm5963_vm5, %v3808_v42, 0.0  ;;  %v1109_v6 = vsub.f32 %v3472_v41, %v3720_v11  ;;  %v1222_v11 = vmul.f32 1.442695, %v1127_v48 }
 0x179   :  { %6022 = vst [vmem:[#allocation39_spill] sm:$0xff] %v3812_v17  ;;  %v1291_v46 = vsel %vm5963_vm5, %v3812_v17, 0.0 }
 0x17a   :  { %v1186_v41 = vmul.f32 1.442695, %v1109_v6 }
 0x17b   :  { %1322 = vadd.xlane.f32.xlu2 %v1321_v40  ;;  %1040 = vmax.xlane.f32.xlu1 %v1039_v53  ;;  %v1164_v40 = vmul.f32 1.442695, %v1098_v38 }
 0x17c   :  { %986 = vmax.xlane.f32.xlu0 %v985_v7  ;;  %v3824_v53 = vpop.eup %2728 }
 0x17d   :  { %v3830_v52 = vpop.eup %2730  ;;  %2734 = vpow2.f32 %v1164_v40  ;;  %v1324_v38 = vsel %vm5963_vm5, %v3824_v53, 0.0 }
 0x17e   :  { %v921_v44 = vpop.xlane.xlu2 %920  ;;  %v1008_v25 = vpop.xlane.xlu1 %1007  ;;  %2736 = vpow2.f32 %v1220_v19 }
 0x17f   :  { %v3810_v47 = vpop.xlane.xlu0 %1004  ;;  %v3832_v10 = vpop.eup %2732 }
 0x183   :  { %1430 = vadd.xlane.f32.xlu2 %v1429_v13  ;;  %1298 = vadd.xlane.f32.xlu1 %v1297_v0  ;;  %v1333_v0 = vsel %vm5963_vm5, %v3830_v52, 0.0  ;;  %v3850_v50 = vpop.eup %2734 }
 0x184   :  { %1292 = vadd.xlane.f32.xlu0 %v1291_v46  ;;  %v1130_v46 = vsub.f32 %v3532_v24, %v1008_v25  ;;  %v1101_v24 = vsub.f32 %v3535_v39, %v921_v44  ;;  %v1110_v25 = vsub.f32 %v3505_v62, %v3762_v51  ;;  %v1294_v6 = vsel %vm5963_vm5, %v3850_v50, 0.0 }
 0x186   :  { %v3826_v56 = vpop.xlane.xlu2 %1061  ;;  %v3828_v7 = vpop.xlane.xlu1 %926  ;;  %v1228_v18 = vmul.f32 1.442695, %v1130_v46  ;;  %v1188_v39 = vmul.f32 1.442695, %v1110_v25 }
 0x187   :  { %v924_v33 = vpop.xlane.xlu0 %923 }
 0x188   :  { %v1102_v2 = vsub.f32 %v3553_v36, %v924_v33  ;;  %v1375_v36 = vsel %vm5963_vm5, %v3832_v10, 0.0 }
 0x18a   :  { %v1172_v13 = vmul.f32 1.442695, %v1102_v2  ;;  %v3854_v2 = vpop.eup %2736 }
 0x18b   :  { %1325 = vadd.xlane.f32.xlu2 %v1324_v38  ;;  %1334 = vadd.xlane.f32.xlu1 %v1333_v0  ;;  %v1378_v48 = vsel %vm5963_vm5, %v3854_v2, 0.0  ;;  %v1170_v0 = vmul.f32 1.442695, %v1101_v24 }
 0x18c   :  { %1376 = vadd.xlane.f32.xlu0 %v1375_v36  ;;  %2738 = vpow2.f32 %v1172_v13 }
 0x18d   :  { %2740 = vpow2.f32 %v1186_v41 }
 0x18e   :  { %v3846_v40 = vpop.xlane.xlu2 %956  ;;  %v3848_v33 = vpop.xlane.xlu1 %1064  ;;  %2742 = vpow2.f32 %v1222_v11 }
 0x18f   :  { %v3852_v19 = vpop.xlane.xlu0 %959  ;;  %2744 = vpow2.f32 %v1228_v18  ;;  %v1100_v18 = vsub.f32 %v3487_v49, %v3738_v14 }
 0x190   :  { %2746 = vpow2.f32 %v1170_v0 }
 0x191   :  { %2748 = vpow2.f32 %v1188_v39 }
 0x192   :  { %v3861_v38 = vpop.eup %2738 }
 0x193   :  { %1295 = vadd.xlane.f32.xlu2 %v1294_v6  ;;  %v1306_v13 = vsel %vm5963_vm5, %v3861_v38, 0.0  ;;  %v3867_v62 = vpop.eup %2740 }
 0x194   :  { %1379 = vadd.xlane.f32.xlu0 %v1378_v48  ;;  %1307 = vadd.xlane.f32.xlu1 %v1306_v13  ;;  %v3869_v36 = vpop.eup %2742  ;;  %v1327_v24 = vsel %vm5963_vm5, %v3867_v62, 0.0  ;;  %v1168_v13 = vmul.f32 1.442695, %v1100_v18 }
 0x195   :  { %v3871_v41 = vpop.eup %2744  ;;  %v1381_v25 = vsel %vm5963_vm5, %v3869_v36, 0.0 }
 0x196   :  { %v930_v44 = vpop.xlane.xlu2 %929  ;;  %v1011_v46 = vpop.xlane.xlu1 %1010  ;;  %6023 = vst [vmem:[#allocation40_spill] sm:$0xff] %v3871_v41  ;;  %v1390_v6 = vsel %vm5963_vm5, %v3871_v41, 0.0 }
 0x197   :  { %v1068_v51 = vpop.xlane.xlu0 %1067  ;;  %v1104_v11 = vsub.f32 %v3577_v8, %v930_v44  ;;  %v3884_v44 = vpop.eup %2746 }
 0x198   :  { %v3886_v14 = vpop.eup %2748  ;;  %v1303_v18 = vsel %vm5963_vm5, %v3884_v44, 0.0 }
 0x199   :  { %v1176_v48 = vmul.f32 1.442695, %v1104_v11 }
 0x19b   :  { %1328 = vadd.xlane.f32.xlu2 %v1327_v24  ;;  %2750 = vpow2.f32 %v1176_v48  ;;  %v1150_v24 = vsub.f32 %v3580_v9, %v1068_v51 }
 0x19c   :  { %1382 = vadd.xlane.f32.xlu0 %v1381_v25  ;;  %1391 = vadd.xlane.f32.xlu1 %v1390_v6  ;;  %2752 = vpow2.f32 %v1168_v13  ;;  %v1103_v25 = vsub.f32 %v3550_v22, %v3828_v7  ;;  %v1330_v6 = vsel %vm5963_vm5, %v3886_v14, 0.0 }
 0x19d   :  { %v1268_v41 = vmul.f32 1.442695, %v1150_v24 }
 0x19e   :  { %v1014_v0 = vpop.xlane.xlu2 %1013  ;;  %v3882_v8 = vpop.xlane.xlu1 %962  ;;  %v1174_v17 = vmul.f32 1.442695, %v1103_v25 }
 0x19f   :  { %v933_v49 = vpop.xlane.xlu0 %932  ;;  %v1132_v13 = vsub.f32 %v3595_v26, %v1014_v0 }
 0x1a0   :  { %v1105_v39 = vsub.f32 %v3598_v37, %v933_v49 }
 0x1a1   :  { %v3898_v9 = vpop.eup %2750 }
 0x1a2   :  { %v1178_v11 = vmul.f32 1.442695, %v1105_v39  ;;  %v3901_v7 = vpop.eup %2752  ;;  %v1131_v39 = vsub.f32 %v3583_v12, %v1011_v46  ;;  %v1312_v24 = vsel %vm5963_vm5, %v3898_v9, 0.0 }
 0x1a3   :  { %1304 = vadd.xlane.f32.xlu2 %v1303_v18 }
 0x1a4   :  { %1331 = vadd.xlane.f32.xlu0 %v1330_v6  ;;  %2754 = vpow2.f32 %v1178_v11 }
 0x1a5   :  { %2756 = vpow2.f32 %v1268_v41  ;;  %v1232_v41 = vmul.f32 1.442695, %v1132_v13 }
 0x1a6   :  { %v1071_v37 = vpop.xlane.xlu2 %1070  ;;  %v3896_v48 = vpop.xlane.xlu1 %1019  ;;  %2758 = vpow2.f32 %v1174_v17  ;;  %v1230_v17 = vmul.f32 1.442695, %v1131_v39 }
 0x1a7   :  { %v1151_v51 = vsub.f32 %v3610_v57, %v1071_v37  ;;  %v1017_v22 = vpop.xlane.xlu0 %1016  ;;  %v1300_v57 = vsel %vm5963_vm5, %v3901_v7, 0.0 }
 0x1a8   :  { %v1133_v11 = vsub.f32 %v3613_v63, %v1017_v22 }
 0x1a9   :  { %v1270_v49 = vmul.f32 1.442695, %v1151_v51 }
 0x1aa   :  { %v3907_v25 = vpop.eup %2754  ;;  %v1234_v18 = vmul.f32 1.442695, %v1133_v11 }
 0x1ab   :  { %2760 = vpow2.f32 %v1270_v49  ;;  %1313 = vadd.xlane.f32.xlu2 %v1312_v24  ;;  %v1315_v26 = vsel %vm5963_vm5, %v3907_v25, 0.0  ;;  %v3914_v0 = vpop.eup %2756 }
 0x1ac   :  { %1301 = vadd.xlane.f32.xlu0 %v1300_v57  ;;  %1316 = vadd.xlane.f32.xlu1 %v1315_v26  ;;  %6024 = vst [vmem:[#allocation41_spill] sm:$0xff] %v3914_v0  ;;  %v3916_v37 = vpop.eup %2758  ;;  %2762 = vpow2.f32 %v1232_v41  ;;  %v1450_v22 = vsel %vm5963_vm5, %v3914_v0, 0.0 }
 0x1ad   :  { %2764 = vpow2.f32 %v1230_v17  ;;  %v1309_v49 = vsel %vm5963_vm5, %v3916_v37, 0.0 }
 0x1ae   :  { %v966_v12 = vpop.xlane.xlu2 %965  ;;  %v1077_v46 = vpop.xlane.xlu1 %1076  ;;  %2766 = vpow2.f32 %v1234_v18 }
 0x1af   :  { %v1074_v6 = vpop.xlane.xlu0 %1073  ;;  %v1116_v51 = vsub.f32 %v3622_v21, %v966_v12  ;;  %v1153_v18 = vsub.f32 %v3625_v4, %v1077_v46 }
 0x1b1   :  { %v3918_v63 = vpop.eup %2760  ;;  %v1200_v39 = vmul.f32 1.442695, %v1116_v51 }
 0x1b2   :  { %6025 = vst [vmem:[#allocation42_spill] sm:$0xff] %v3918_v63  ;;  %v1453_v13 = vsel %vm5963_vm5, %v3918_v63, 0.0  ;;  %v3927_v57 = vpop.eup %2762 }
 0x1b3   :  { %1451 = vadd.xlane.f32.xlu2 %v1450_v22  ;;  %6026 = vst [vmem:[#allocation43_spill] sm:$0xff] %v3927_v57  ;;  %v3930_v41 = vpop.eup %2764  ;;  %2768 = vpow2.f32 %v1200_v39  ;;  %v1152_v22 = vsub.f32 %v3628_v35, %v1074_v6 }
 0x1b4   :  { %1310 = vadd.xlane.f32.xlu0 %v1309_v49  ;;  %1454 = vadd.xlane.f32.xlu1 %v1453_v13  ;;  %6027 = vst [vmem:[#allocation44_spill] sm:$0xff] %v3930_v41  ;;  %v3933_v12 = vpop.eup %2766  ;;  %v1396_v13 = vsel %vm5963_vm5, %v3927_v57, 0.0  ;;  %v1274_v49 = vmul.f32 1.442695, %v1153_v18 }
 0x1b5   :  { %6028 = vst [vmem:[#allocation45_spill] sm:$0xff] %v3933_v12  ;;  %v1272_v4 = vmul.f32 1.442695, %v1152_v22 }
 0x1b6   :  { %v1023_v24 = vpop.xlane.xlu2 %1022  ;;  %v972_v11 = vpop.xlane.xlu1 %971 }
 0x1b7   :  { %v1118_v21 = vsub.f32 %v3637_v29, %v972_v11  ;;  %v969_v26 = vpop.xlane.xlu0 %968  ;;  %v1393_v29 = vsel %vm5963_vm5, %v3930_v41, 0.0  ;;  %v6054_v41 = vld [vmem:[#allocation35_spill] sm:$0xff] }
 0x1b8   :  { %v1117_v17 = vsub.f32 %v3645_v1, %v969_v26  ;;  %v1399_v1 = vsel %vm5963_vm5, %v3933_v12, 0.0 }
 0x1b9   :  { %v1204_v0 = vmul.f32 1.442695, %v1118_v21  ;;  %v3946_v11 = vpop.eup %2768  ;;  %v1134_v21 = vsub.f32 %v3607_v54, %v3896_v48 }
 0x1ba   :  { %v1202_v51 = vmul.f32 1.442695, %v1117_v17  ;;  %6029 = vst [vmem:[#allocation46_spill] sm:$0xff] %v3946_v11  ;;  %v1135_v17 = vsub.f32 %v3640_v27, %v1023_v24 }
 0x1bb   :  { %1397 = vadd.xlane.f32.xlu2 %v1396_v13  ;;  %2770 = vpow2.f32 %v1204_v0  ;;  %v1236_v48 = vmul.f32 1.442695, %v1134_v21 }
 0x1bc   :  { %1394 = vadd.xlane.f32.xlu0 %v1393_v29  ;;  %2772 = vpow2.f32 %v1202_v51  ;;  %1400 = vadd.xlane.f32.xlu1 %v1399_v1  ;;  %v1238_v13 = vmul.f32 1.442695, %v1135_v17 }
 0x1bd   :  { %2774 = vpow2.f32 %v1274_v49 }
 0x1be   :  { %v1080_v46 = vpop.xlane.xlu2 %1079  ;;  %v3943_v39 = vpop.xlane.xlu1 %1028  ;;  %2776 = vpow2.f32 %v1272_v4 }
 0x1bf   :  { %v1154_v35 = vsub.f32 %v3654_v23, %v1080_v46  ;;  %v1026_v6 = vpop.xlane.xlu0 %1025  ;;  %v1348_v23 = vsel %vm5963_vm5, %v3946_v11, 0.0 }
 0x1c0   :  { %v1136_v22 = vsub.f32 %v3662_v59, %v1026_v6 }
 0x1c1   :  { %v1276_v0 = vmul.f32 1.442695, %v1154_v35  ;;  %v3950_v26 = vpop.eup %2770 }
 0x1c2   :  { %6030 = vst [vmem:[#allocation47_spill] sm:$0xff] %v3950_v26  ;;  %v3953_v18 = vpop.eup %2772  ;;  %v1354_v51 = vsel %vm5963_vm5, %v3950_v26, 0.0  ;;  %v1240_v1 = vmul.f32 1.442695, %v1136_v22 }
 0x1c3   :  { %6031 = vst [vmem:[#allocation48_spill] sm:$0xff] %v3953_v18  ;;  %2778 = vpow2.f32 %v1276_v0  ;;  %v1351_v54 = vsel %vm5963_vm5, %v3953_v18, 0.0  ;;  %v3962_v29 = vpop.eup %2774 }
 0x1c4   :  { %1349 = vadd.xlane.f32.xlu0 %v1348_v23  ;;  %1355 = vadd.xlane.f32.xlu1 %v1354_v51  ;;  %6032 = vst [vmem:[#allocation49_spill] sm:$0xff] %v3962_v29  ;;  %v3964_v49 = vpop.eup %2776  ;;  %2780 = vpow2.f32 %v1236_v48  ;;  %v1459_v21 = vsel %vm5963_vm5, %v3962_v29, 0.0 }
 0x1c5   :  { %1352 = vadd.xlane.f32.xlu2 %v1351_v54  ;;  %6033 = vst [vmem:[#allocation50_spill] sm:$0xff] %v3964_v49  ;;  %2782 = vpow2.f32 %v1238_v13  ;;  %v1456_v6 = vsel %vm5963_vm5, %v3964_v49, 0.0 }
 0x1c6   :  { %v975_v27 = vpop.xlane.xlu2 %974  ;;  %v1086_v24 = vpop.xlane.xlu1 %1085  ;;  %2784 = vpow2.f32 %v1240_v1 }
 0x1c7   :  { %v1083_v59 = vpop.xlane.xlu0 %1082  ;;  %v1119_v46 = vsub.f32 %v3674_v30, %v975_v27  ;;  %v1156_v27 = vsub.f32 %v3671_v16, %v1086_v24 }
 0x1c9   :  { %v3966_v4 = vpop.eup %2778  ;;  %v1206_v0 = vmul.f32 1.442695, %v1119_v46 }
 0x1ca   :  { %6034 = vst [vmem:[#allocation51_spill] sm:$0xff] %v3966_v4  ;;  %v1462_v35 = vsel %vm5963_vm5, %v3966_v4, 0.0  ;;  %v3975_v23 = vpop.eup %2780 }
 0x1cb   :  { %6035 = vst [vmem:[#allocation52_spill] sm:$0xff] %v3975_v23  ;;  %v3978_v54 = vpop.eup %2782  ;;  %2786 = vpow2.f32 %v1206_v0 }
 0x1cc   :  { %1457 = vadd.xlane.f32.xlu0 %v1456_v6  ;;  %1463 = vadd.xlane.f32.xlu1 %v1462_v35  ;;  %6036 = vst [vmem:[#allocation53_spill] sm:$0xff] %v3978_v54  ;;  %v3981_v13 = vpop.eup %2784  ;;  %v1155_v35 = vsub.f32 %v3681_v55, %v1083_v59  ;;  %v1402_v6 = vsel %vm5963_vm5, %v3975_v23, 0.0 }
 0x1cd   :  { %1460 = vadd.xlane.f32.xlu2 %v1459_v21  ;;  %6037 = vst [vmem:[#allocation54_spill] sm:$0xff] %v3981_v13  ;;  %v1280_v21 = vmul.f32 1.442695, %v1156_v27  ;;  %v6041_v27 = vld [vmem:[#allocation30_spill] sm:$0xff] }
 0x1ce   :  { %v1032_v17 = vpop.xlane.xlu2 %1031  ;;  %v981_v22 = vpop.xlane.xlu1 %980  ;;  %v1278_v16 = vmul.f32 1.442695, %v1155_v35  ;;  %v6043_v35 = vld [vmem:[#allocation33_spill] sm:$0xff] }
 0x1cf   :  { %v1121_v30 = vsub.f32 %v3696_v43, %v981_v22  ;;  %v978_v51 = vpop.xlane.xlu0 %977  ;;  %v1405_v43 = vsel %vm5963_vm5, %v3978_v54, 0.0 }
 0x1d0   :  { %v1120_v48 = vsub.f32 %v3703_v20, %v978_v51  ;;  %v1408_v20 = vsel %vm5963_vm5, %v3981_v13, 0.0 }
 0x1d1   :  { %v1210_v1 = vmul.f32 1.442695, %v1121_v30  ;;  %v3994_v22 = vpop.eup %2786  ;;  %v6039_v30 = vld [vmem:[#allocation29_spill] sm:$0xff] }
 0x1d2   :  { %v1208_v46 = vmul.f32 1.442695, %v1120_v48  ;;  %6038 = vst [vmem:[#allocation55_spill] sm:$0xff] %v3994_v22  ;;  %v1137_v51 = vsub.f32 %v6039_v30, %v3943_v39 }
 0x1d3   :  { %2788 = vpow2.f32 %v1210_v1 }
 0x1d4   :  { %1403 = vadd.xlane.f32.xlu0 %v1402_v6  ;;  %2790 = vpow2.f32 %v1208_v46  ;;  %1409 = vadd.xlane.f32.xlu1 %v1408_v20  ;;  %v1138_v46 = vsub.f32 %v6041_v27, %v1032_v17  ;;  %v6045_v17 = vld [vmem:[#allocation13_spill] sm:$0xff]  ;;  %v6047_v27 = vld [vmem:[#allocation31_spill] sm:$0xff] }
 0x1d5   :  { %1406 = vadd.xlane.f32.xlu2 %v1405_v43  ;;  %2792 = vpow2.f32 %v1280_v21  ;;  %v1242_v21 = vmul.f32 1.442695, %v1137_v51  ;;  %v6050_v51 = vld [vmem:[#allocation34_spill] sm:$0xff] }
 0x1d6   :  { %v1089_v24 = vpop.xlane.xlu2 %1088  ;;  %v3991_v0 = vpop.xlane.xlu1 %1427  ;;  %2794 = vpow2.f32 %v1278_v16  ;;  %v6044_v16 = vld [vmem:[#allocation28_spill] sm:$0xff] }
 0x1d7   :  { %v1157_v55 = vsub.f32 %v3716_v60, %v1089_v24  ;;  %v1035_v59 = vpop.xlane.xlu0 %1034  ;;  %v1357_v60 = vsel %vm5963_vm5, %v3994_v22, 0.0  ;;  %v1096_v24 = vsub.f32 %v6045_v17, %v6044_v16  ;;  %vm2175_vm10 = vweird.f32 %v3991_v0 }
 0x1d8   :  { %v1139_v43 = vsub.f32 %v6043_v35, %v1035_v59  ;;  %v6048_v35 = vld [vmem:[#allocation21_spill] sm:$0xff] }
 0x1d9   :  { %v1282_v48 = vmul.f32 1.442695, %v1157_v55  ;;  %v3998_v1 = vpop.eup %2788  ;;  %v1244_v55 = vmul.f32 1.442695, %v1138_v46  ;;  %v1145_v63 = vsub.f32 %v6048_v35, %v6047_v27  ;;  %v6053_v46 = vld [vmem:[#allocation19_spill] sm:$0xff] }
 0x1da   :  { %6040 = vst [vmem:[#allocation29_spill] sm:$0xff] %v3998_v1  ;;  %v4001_v6 = vpop.eup %2790  ;;  %v1363_v20 = vsel %vm5963_vm5, %v3998_v1, 0.0  ;;  %v1246_v49 = vmul.f32 1.442695, %v1139_v43  ;;  %v1146_v16 = vsub.f32 %v6053_v46, %v3764_v28  ;;  %v1160_v17 = vmul.f32 1.442695, %v1096_v24 }
 0x1db   :  { %6042 = vst [vmem:[#allocation30_spill] sm:$0xff] %v4001_v6  ;;  %2796 = vpow2.f32 %v1282_v48  ;;  %v1360_v39 = vsel %vm5963_vm5, %v4001_v6, 0.0  ;;  %v4014_v59 = vpop.eup %2792  ;;  %v1258_v27 = vmul.f32 1.442695, %v1145_v63  ;;  %v6056_v24 = vld [vmem:[#allocation17_spill] sm:$0xff]  ;;  %v6059_v46 = vld [vmem:[#allocation38_spill] sm:$0xff] }
 0x1dc   :  { %1358 = vadd.xlane.f32.xlu0 %v1357_v60  ;;  %1364 = vadd.xlane.f32.xlu1 %v1363_v20  ;;  %6046 = vst [vmem:[#allocation33_spill] sm:$0xff] %v4014_v59  ;;  %v4020_v29 = vpop.eup %2794  ;;  %v6051_v20 = vld [vmem:[#allocation20_spill] sm:$0xff]  ;;  %2798 = vpow2.f32 %v1242_v21  ;;  %v1468_v28 = vsel %vm5963_vm5, %v4014_v59, 0.0  ;;  %v1260_v21 = vmul.f32 1.442695, %v1146_v16 }
 0x1dd   :  { %1361 = vadd.xlane.f32.xlu2 %v1360_v39  ;;  %6049 = vst [vmem:[#allocation28_spill] sm:$0xff] %v4020_v29  ;;  %v1144_v39 = vsub.f32 %v6051_v20, %v6050_v51  ;;  %2800 = vpow2.f32 %v1244_v55  ;;  %v1465_v35 = vsel %vm5963_vm5, %v4020_v29, 0.0  ;;  %v6055_v51 = vld [vmem:[#allocation12_spill] sm:$0xff] }
 0x1de   :  { %v984_v30 = vpop.xlane.xlu2 %983  ;;  %v4012_v48 = vpop.xlane.xlu1 %1373  ;;  %2802 = vpow2.f32 %v1246_v49  ;;  %v1128_v20 = vsub.f32 %v6055_v51, %v3784_v34  ;;  %v6058_v34 = vld [vmem:[#allocation11_spill] sm:$0xff] }
 0x1df   :  { %v4018_v60 = vpop.xlane.xlu0 %1319  ;;  %v1122_v57 = vsub.f32 %v6054_v41, %v984_v30  ;;  %v1256_v12 = vmul.f32 1.442695, %v1144_v39  ;;  %v1112_v41 = vsub.f32 %v6056_v24, %v3786_v3  ;;  %2804 = vpow2.f32 %v1160_v17  ;;  %v6063_v24 = vld [vmem:[#allocation16_spill] sm:$0xff] }
 0x1e0   :  { %2806 = vpow2.f32 %v1258_v27  ;;  %v1147_v39 = vsub.f32 %v6058_v34, %v3793_v61  ;;  %v1224_v3 = vmul.f32 1.442695, %v1128_v20  ;;  %v1148_v27 = vsub.f32 %v6063_v24, %v3826_v56 }
 0x1e1   :  { %v4024_v4 = vpop.eup %2796  ;;  %v1212_v63 = vmul.f32 1.442695, %v1122_v57  ;;  %2808 = vpow2.f32 %v1256_v12  ;;  %vm1905_vm15 = vweird.f32 %v4012_v48  ;;  %vm1635_vm0 = vweird.f32 %v4018_v60 }
 0x1e2   :  { %6052 = vst [vmem:[#allocation13_spill] sm:$0xff] %v4024_v4  ;;  %v1471_v43 = vsel %vm5963_vm5, %v4024_v4, 0.0  ;;  %v4041_v30 = vpop.eup %2798  ;;  %2810 = vpow2.f32 %v1260_v21 }
 0x1e3   :  { %6057 = vst [vmem:[#allocation31_spill] sm:$0xff] %v4041_v30  ;;  %v4046_v16 = vpop.eup %2800  ;;  %2812 = vpow2.f32 %v1212_v63  ;;  %v1411_v12 = vsel %vm5963_vm5, %v4041_v30, 0.0 }
 0x1e4   :  { %1466 = vadd.xlane.f32.xlu0 %v1465_v35  ;;  %1472 = vadd.xlane.f32.xlu1 %v1471_v43  ;;  %6060 = vst [vmem:[#allocation21_spill] sm:$0xff] %v4046_v16  ;;  %v6061_v43 = vld [vmem:[#allocation18_spill] sm:$0xff]  ;;  %v4050_v57 = vpop.eup %2802  ;;  %v1414_v21 = vsel %vm5963_vm5, %v4046_v16, 0.0 }
 0x1e5   :  { %1469 = vadd.xlane.f32.xlu2 %v1468_v28  ;;  %v1129_v17 = vsub.f32 %v6061_v43, %v3810_v47  ;;  %6062 = vst [vmem:[#allocation34_spill] sm:$0xff] %v4050_v57  ;;  %v1192_v28 = vmul.f32 1.442695, %v1112_v41  ;;  %v4057_v20 = vpop.eup %2804  ;;  %v1417_v56 = vsel %vm5963_vm5, %v4050_v57, 0.0  ;;  %v6069_v43 = vld [vmem:[#allocation14_spill] sm:$0xff] }
 0x1e6   :  { %v1038_v49 = vpop.xlane.xlu2 %1037  ;;  %v4039_v55 = vpop.xlane.xlu1 %1094  ;;  %6064 = vst [vmem:[#allocation20_spill] sm:$0xff] %v4057_v20 }
 0x1e7   :  { %v1140_v35 = vsub.f32 %v6059_v46, %v1038_v49  ;;  %v1092_v51 = vpop.xlane.xlu0 %1091  ;;  %v1262_v49 = vmul.f32 1.442695, %v1147_v39  ;;  %v1226_v47 = vmul.f32 1.442695, %v1129_v17  ;;  %v4063_v41 = vpop.eup %2806  ;;  %v1113_v17 = vsub.f32 %v6069_v43, %v3846_v40 }
 0x1e8   :  { %v1158_v61 = vsub.f32 %v3767_v15, %v1092_v51  ;;  %6065 = vst [vmem:[#allocation19_spill] sm:$0xff] %v4063_v41  ;;  %v1264_v15 = vmul.f32 1.442695, %v1148_v27  ;;  %v6071_v27 = vld [vmem:[#allocation26_spill] sm:$0xff] }
 0x1e9   :  { %v1248_v29 = vmul.f32 1.442695, %v1140_v35 }
 0x1ea   :  { %v1284_v63 = vmul.f32 1.442695, %v1158_v61  ;;  %v1149_v61 = vsub.f32 %v6071_v27, %v3848_v33 }
 0x1eb   :  { %2814 = vpow2.f32 %v1248_v29  ;;  %v4065_v29 = vpop.eup %2808 }
 0x1ec   :  { %2816 = vpow2.f32 %v1224_v3  ;;  %1412 = vadd.xlane.f32.xlu0 %v1411_v12  ;;  %1418 = vadd.xlane.f32.xlu1 %v1417_v56  ;;  %6066 = vst [vmem:[#allocation35_spill] sm:$0xff] %v4065_v29  ;;  %v4070_v46 = vpop.eup %2810  ;;  %v4159_v23 = vsel %vm5963_vm5, %v4065_v29, 0.0 }
 0x1ed   :  { %2818 = vpow2.f32 %v1192_v28  ;;  %1415 = vadd.xlane.f32.xlu2 %v1414_v21  ;;  %6067 = vst [vmem:[#allocation12_spill] sm:$0xff] %v4070_v46  ;;  %v4073_v3 = vpop.eup %2812 }
 0x1ee   :  { %2820 = vrcp.f32 %v3991_v0  ;;  %v4068_v34 = vpop.xlane.xlu2 %1322  ;;  %v1041_v39 = vpop.xlane.xlu1 %1040  ;;  %6068 = vst [vmem:[#allocation17_spill] sm:$0xff] %v4073_v3  ;;  %v1366_v33 = vsel %vm5963_vm5, %v4073_v3, 0.0 }
 0x1ef   :  { %2822 = vpow2.f32 %v1262_v49  ;;  %v1141_v35 = vsub.f32 %v3782_v5, %v1041_v39  ;;  %v987_v51 = vpop.xlane.xlu0 %986  ;;  %v1159_v5 = vsub.f32 %v3760_v58, %v4039_v55  ;;  %v1194_v39 = vmul.f32 1.442695, %v1113_v17 }
 0x1f0   :  { %2824 = vpow2.f32 %v1226_v47  ;;  %v1123_v28 = vsub.f32 %v3791_v32, %v987_v51  ;;  %v6074_v32 = vld [vmem:[#allocation27_spill] sm:$0xff] }
 0x1f1   :  { %v4078_v24 = vpop.eup %2814  ;;  %2826 = vpow2.f32 %v1264_v15  ;;  %v1250_v12 = vmul.f32 1.442695, %v1141_v35  ;;  %v1115_v56 = vsub.f32 %v6074_v32, %v3882_v8  ;;  %v6075_v35 = vld [vmem:[#allocation15_spill] sm:$0xff]  ;;  %v1286_v8 = vmul.f32 1.442695, %v1159_v5 }
 0x1f2   :  { %6070 = vst [vmem:[#allocation11_spill] sm:$0xff] %v4078_v24  ;;  %v4082_v21 = vpop.eup %2816  ;;  %2828 = vpow2.f32 %v1284_v63  ;;  %v1214_v49 = vmul.f32 1.442695, %v1123_v28  ;;  %v1420_v47 = vsel %vm5963_vm5, %v4078_v24, 0.0  ;;  %v1114_v58 = vsub.f32 %v6075_v35, %v3852_v19 }
 0x1f3   :  { %6072 = vst [vmem:[#allocation38_spill] sm:$0xff] %v4082_v21  ;;  %v4088_v40 = vpop.eup %2818  ;;  %2830 = vpow2.f32 %v1250_v12  ;;  %v1266_v63 = vmul.f32 1.442695, %v1149_v61  ;;  %v1198_v19 = vmul.f32 1.442695, %v1115_v56 }
 0x1f4   :  { %6073 = vst [vmem:[#allocation18_spill] sm:$0xff] %v4088_v40  ;;  %v4094_v15 = vpop.eup %2820  ;;  %2832 = vpow2.f32 %v1214_v49  ;;  %1367 = vadd.xlane.f32.xlu0 %v1366_v33  ;;  %1421 = vadd.xlane.f32.xlu1 %v1420_v47  ;;  %v1196_v49 = vmul.f32 1.442695, %v1114_v58 }
 0x1f5   :  { %v4098_v55 = vpop.eup %2822  ;;  %2834 = vrcp.f32 %v4012_v48  ;;  %v2171_v27 = vmul.f32 %v4094_v15, %v3991_v0  ;;  %vm2176_vm8 = vweird.f32 %v4094_v15 }
 0x1f6   :  { %6076 = vst [vmem:[#allocation16_spill] sm:$0xff] %v4098_v55  ;;  %v4101_v51 = vpop.eup %2824  ;;  %2836 = vrcp.f32 %v4018_v60  ;;  %v4104_v43 = vpop.xlane.xlu2 %1430  ;;  %v4182_v13 = vsel %vm5963_vm5, %v4098_v55, 0.0  ;;  %vm4224_vm12 = vmor %vm2175_vm10, %vm2176_vm8 }
 0x1f7   :  { %6077 = vst [vmem:[#allocation14_spill] sm:$0xff] %v4101_v51  ;;  %v4106_v28 = vpop.xlane.xlu1 %1298  ;;  %v4108_v17 = vpop.eup %2826  ;;  %2838 = vrcp.f32 %v4104_v43  ;;  %v2172_v33 = vsub.f32 1.0, %v2171_v27  ;;  %v1387_v29 = vsel %vm5963_vm5, %v4101_v51, 0.0  ;;  %vm2190_vm11 = vweird.f32 %v4104_v43 }
 0x1f8   :  { %6078 = vst [vmem:[#allocation26_spill] sm:$0xff] %v4108_v17  ;;  %v4113_v61 = vpop.xlane.xlu0 %1292  ;;  %v4115_v12 = vpop.eup %2828  ;;  %2840 = vpow2.f32 %v1194_v39 }
 0x1f9   :  { %6079 = vst [vmem:[#allocation27_spill] sm:$0xff] %v4115_v12  ;;  %v4117_v47 = vpop.eup %2830  ;;  %2842 = vpow2.f32 %v1266_v63  ;;  %v1474_v35 = vsel %vm5963_vm5, %v4115_v12, 0.0 }
 0x1fa   :  { %v4119_v5 = vpop.eup %2832  ;;  %2844 = vpow2.f32 %v1286_v8  ;;  %v1423_v32 = vsel %vm5963_vm5, %v4117_v47, 0.0 }
 0x1fb   :  { %v4123_v56 = vpop.eup %2834  ;;  %2846 = vpow2.f32 %v1198_v19  ;;  %v1369_v39 = vsel %vm5963_vm5, %v4119_v5, 0.0 }
 0x1fc   :  { %v4129_v58 = vpop.eup %2836  ;;  %2848 = vpow2.f32 %v1196_v49  ;;  %1475 = vadd.xlane.f32.xlu0 %v1474_v35  ;;  %1370 = vadd.xlane.f32.xlu2 %v1369_v39  ;;  %v1901_v19 = vmul.f32 %v4123_v56, %v4012_v48  ;;  %v4145_v49 = vsel %vm5963_vm5, %v4057_v20, 0.0  ;;  %v4149_v35 = vsel %vm5963_vm5, %v4063_v41, 0.0 }
 0x1fd   :  { %v4131_v63 = vpop.eup %2838  ;;  %1424 = vadd.xlane.f32.xlu1 %v1423_v32  ;;  %v2173_v39 = vmul.f32 %v4094_v15, %v2172_v33  ;;  %2850 = vrcp.f32 %v4068_v34  ;;  %v4163_v20 = vsel %vm5963_vm5, %v4070_v46, 0.0  ;;  %v1631_v41 = vmul.f32 %v4129_v58, %v4018_v60 }
 0x1fe   :  { %v4133_v8 = vpop.eup %2840  ;;  %v2186_v27 = vmul.f32 %v4131_v63, %v4104_v43  ;;  %v4139_v59 = vpop.xlane.xlu2 %1325  ;;  %v1384_v33 = vsel %vm5963_vm5, %v4082_v21, 0.0  ;;  %v4178_v46 = vsel %vm5963_vm5, %v4108_v17, 0.0  ;;  %v2181_v21 = vand.u32 2147483648, %v3991_v0 }
 0x1ff   :  { %6080 = vst [vmem:[#allocation15_spill] sm:$0xff] %v4133_v8  ;;  %v4141_v4 = vpop.xlane.xlu1 %1334  ;;  %v4151_v32 = vpop.eup %2842  ;;  %v1902_v30 = vsub.f32 1.0, %v1901_v19  ;;  %v2174_v55 = vadd.f32 %v4094_v15, %v2173_v39  ;;  %v1632_v16 = vsub.f32 1.0, %v1631_v41  ;;  %vm2191_vm9 = vweird.f32 %v4131_v63 }
 0x200   :  { %6081 = vst [vmem:[#allocation56_spill] sm:$0xff] %v4151_v32  ;;  %v4155_v12 = vpop.xlane.xlu0 %1376  ;;  %v4165_v11 = vpop.eup %2844  ;;  %v2187_v54 = vsub.f32 1.0, %v2186_v27  ;;  %2852 = vrcp.f32 %v4141_v4  ;;  %v4186_v27 = vsel %vm5963_vm5, %v4088_v40, 0.0  ;;  %v1447_v51 = vsel %vm5963_vm5, %v4151_v32, 0.0  ;;  %vm4230_vm13 = vmor %vm2190_vm11, %vm2191_vm9 }
 0x201   :  { %6082 = vst [vmem:[#allocation57_spill] sm:$0xff] %v4165_v11  ;;  %v4172_v18 = vpop.eup %2846  ;;  %v1477_v17 = vsel %vm5963_vm5, %v4165_v11, 0.0  ;;  %v2179_v40 = vand.u32 2147483647, %v3991_v0  ;;  %v2196_v39 = vand.u32 2147483648, %v4104_v43  ;;  %v2182_v11 = vor.u32 1.1754944e-38, %v2181_v21 }
 0x202   :  { %6083 = vst [vmem:[#allocation58_spill] sm:$0xff] %v4172_v18  ;;  %v4188_v26 = vpop.eup %2848  ;;  %v2188_v22 = vmul.f32 %v4131_v63, %v2187_v54  ;;  %v1345_v54 = vsel %vm5963_vm5, %v4172_v18, 0.0  ;;  %v2194_v0 = vand.u32 2147483647, %v4104_v43  ;;  %2854 = vrcp.f32 %v4155_v12 }
 0x203   :  { %6084 = vst [vmem:[#allocation59_spill] sm:$0xff] %v4188_v26  ;;  %v4203_v19 = vpop.eup %2850  ;;  %v4209_v32 = vsel %vm5963_vm5, %v4188_v26, 0.0  ;;  %v2178_v43 = vsel %vm4224_vm12, %v4094_v15, %v2174_v55  ;;  %vm4242_vm14 = vcmp.eq.f32.partialorder %v2179_v40, 8.507059e+37  ;;  %v1633_v18 = vmul.f32 %v4129_v58, %v1632_v16 }
 0x204   :  { %v2189_v6 = vadd.f32 %v4131_v63, %v2188_v22  ;;  %1448 = vadd.xlane.f32.xlu0 %v1447_v51  ;;  %1478 = vadd.xlane.f32.xlu2 %v1477_v17  ;;  %v4213_v22 = vsel %vm5963_vm5, %v4133_v8, 0.0  ;;  %v1903_v51 = vmul.f32 %v4123_v56, %v1902_v30  ;;  %v1646_v1 = vmul.f32 %v4203_v19, %v4068_v34 }
 0x205   :  { %1346 = vadd.xlane.f32.xlu1 %v1345_v54  ;;  %v1911_v54 = vand.u32 2147483648, %v4012_v48  ;;  %v2197_v15 = vor.u32 1.1754944e-38, %v2196_v39  ;;  %vm2195_vm6 = vcmp.eq.f32.partialorder %v2194_v0, 8.507059e+37  ;;  %vm1906_vm7 = vweird.f32 %v4123_v56 }
 0x206   :  { %v4215_v41 = vpop.eup %2852  ;;  %v4220_v17 = vpop.xlane.xlu2 %1295  ;;  %v2193_v57 = vsel %vm4230_vm13, %v4131_v63, %v2189_v6  ;;  %v1904_v16 = vadd.f32 %v4123_v56, %v1903_v51  ;;  %v1641_v55 = vand.u32 2147483648, %v4018_v60  ;;  %v2183_v6 = vsel %vm4242_vm14, %v2182_v11, %v2178_v43  ;;  %vm4273_vm9 = vmor %vm1905_vm15, %vm1906_vm7 }
 0x207   :  { %v1706_v30 = vmul.f32 %v4215_v41, %v4141_v4  ;;  %v2198_v3 = vsel %vm2195_vm6, %v2197_v15, %v2193_v57  ;;  %v1647_v63 = vsub.f32 1.0, %v1646_v1  ;;  %v1634_v39 = vadd.f32 %v4129_v58, %v1633_v18  ;;  %v4283_v57 = vpop.xlane.xlu1 %1307 }
 0x208   :  { %v4237_v21 = vpop.xlane.xlu0 %1379  ;;  %v2487_v8 = vmul.f32 %v3806_v31, %v2198_v3  ;;  %vm1636_vm8 = vweird.f32 %v4129_v58  ;;  %v4265_v51 = vpop.eup %2854  ;;  %v1912_v0 = vor.u32 1.1754944e-38, %v1911_v54  ;;  %v1909_v31 = vand.u32 2147483647, %v4012_v48 }
 0x209   :  { %2856 = vrcp.f32 %v4237_v21  ;;  %v1707_v40 = vsub.f32 1.0, %v1706_v30  ;;  %v1639_v26 = vand.u32 2147483647, %v4018_v60  ;;  %v1716_v1 = vand.u32 2147483648, %v4141_v4  ;;  %vm4301_vm11 = vmor %vm1635_vm0, %vm1636_vm8 }
 0x20a   :  { %2858 = vrcp.f32 %v4106_v28  ;;  %2545 = vmatpush.msra.mxu2 %v2487_v8  ;;  %vm1711_vm10 = vweird.f32 %v4215_v41  ;;  %v1714_v30 = vand.u32 2147483647, %v4141_v4  ;;  %v1638_v15 = vsel %vm4301_vm11, %v4129_v58, %v1634_v39 }
 0x20b   :  { %v1708_v24 = vmul.f32 %v4215_v41, %v1707_v40  ;;  %2860 = vrcp.f32 %v4139_v59  ;;  %v1642_v40 = vor.u32 1.1754944e-38, %v1641_v55  ;;  %vm1710_vm12 = vweird.f32 %v4141_v4 }
 0x20c   :  { %1385 = vadd.xlane.f32.xlu0 %v1384_v33  ;;  %1388 = vadd.xlane.f32.xlu2 %v1387_v29  ;;  %v6093_v29 = vld [vmem:[#allocation32_spill] sm:$0xff]  ;;  %v1908_v33 = vsel %vm4273_vm9, %v4123_v56, %v1904_v16  ;;  %v1648_v56 = vmul.f32 %v4203_v19, %v1647_v63  ;;  %v1916_v60 = vmul.f32 %v4265_v51, %v4155_v12  ;;  %vm1910_vm13 = vcmp.eq.f32.partialorder %v1909_v31, 8.507059e+37  ;;  %vm1712_vm14 = vmor %vm1710_vm12, %vm1711_vm10 }
 0x20d   :  { %1289 = vadd.xlane.f32.xlu1 %v4145_v49  ;;  %v2486_v3 = vmul.f32 %v6093_v29, %v2183_v6  ;;  %v1709_v48 = vadd.f32 %v4215_v41, %v1708_v24  ;;  %v1656_v16 = vand.u32 2147483648, %v4068_v34  ;;  %v1717_v6 = vor.u32 1.1754944e-38, %v1716_v1 }
 0x20e   :  { %v4286_v49 = vpop.xlane.xlu2 %1328  ;;  %v1654_v63 = vand.u32 2147483647, %v4068_v34  ;;  %vm1640_vm15 = vcmp.eq.f32.partialorder %v1639_v26, 8.507059e+37  ;;  %vm1715_vm0 = vcmp.eq.f32.partialorder %v1714_v30, 8.507059e+37  ;;  %v1913_v55 = vsel %vm1910_vm13, %v1912_v0, %v1908_v33 }
 0x20f   :  { %v4279_v18 = vpop.eup %2856  ;;  %2862 = vrcp.f32 %v4286_v49  ;;  %2546 = vmatpush.msra.mxu2 %v2486_v3  ;;  %v1713_v58 = vsel %vm1712_vm14, %v4215_v41, %v1709_v48  ;;  %v1643_v4 = vsel %vm1640_vm15, %v1642_v40, %v1638_v15  ;;  %v1649_v1 = vadd.f32 %v4203_v19, %v1648_v56  ;;  %v6096_v48 = vld [vmem:[#allocation36_spill] sm:$0xff]  ;;  %v6101_v15 = vld [vmem:[#allocation37_spill] sm:$0xff] }
 0x210   :  { %v4295_v43 = vpop.xlane.xlu0 %1382  ;;  %v1931_v24 = vmul.f32 %v4279_v18, %v4237_v21  ;;  %v4319_v8 = vpop.eup %2858  ;;  %v1718_v31 = vsel %vm1715_vm0, %v1717_v6, %v1713_v58  ;;  %vm1651_vm6 = vweird.f32 %v4203_v19  ;;  %vm1650_vm7 = vweird.f32 %v4068_v34 }
 0x211   :  { %2864 = vrcp.f32 %v4295_v43  ;;  %v4322_v39 = vpop.eup %2860  ;;  %v1671_v41 = vand.u32 2147483648, %v4139_v59  ;;  %v1917_v0 = vsub.f32 1.0, %v1916_v60  ;;  %v2455_v29 = vmul.f32 %v3830_v52, %v1718_v31  ;;  %vm4357_vm9 = vmor %vm1650_vm7, %vm1651_vm6  ;;  %v4367_v6 = vpop.xlane.xlu1 %1391 }
 0x212   :  { %v1932_v11 = vsub.f32 1.0, %v1931_v24  ;;  %v4340_v30 = vmul.f32 %v6096_v48, %v1913_v55  ;;  %vm4342_vm8 = vcmp.eq.f32.partialorder %v1654_v63, 8.507059e+37  ;;  %2866 = vrcp.f32 %v4113_v61  ;;  %6102 = vst [vmem:[#allocation32_spill] sm:$0xff] %v4367_v6 }
 0x213   :  { %v1661_v52 = vmul.f32 %v4322_v39, %v4139_v59  ;;  %2505 = vmatpush.msra.mxu0 %v2455_v29  ;;  %v4362_v40 = vmul.f32 %v6101_v15, %v1643_v4  ;;  %v1653_v34 = vsel %vm4357_vm9, %v4203_v19, %v1649_v1  ;;  %v4375_v63 = vmul.f32 %v4319_v8, %v4106_v28 }
 0x214   :  { %1442 = vadd.xlane.f32.xlu0 %v4182_v13  ;;  %1343 = vadd.xlane.f32.xlu2 %v4209_v32  ;;  %v1657_v13 = vor.u32 1.1754944e-38, %v1656_v16  ;;  %v1926_v32 = vand.u32 2147483648, %v4155_v12  ;;  %v1933_v60 = vmul.f32 %v4279_v18, %v1932_v11  ;;  %v4377_v58 = vor.u32 1.1754944e-38, %v1671_v41 }
 0x215   :  { %v4328_v26 = vpop.eup %2862  ;;  %1445 = vadd.xlane.f32.xlu1 %v4178_v46  ;;  %v1918_v55 = vmul.f32 %v4265_v51, %v1917_v0  ;;  %vm1920_vm10 = vweird.f32 %v4155_v12  ;;  %v1924_v31 = vand.u32 2147483647, %v4155_v12  ;;  %v1662_v48 = vsub.f32 1.0, %v1661_v52 }
 0x216   :  { %v4337_v33 = vpop.xlane.xlu2 %1304  ;;  %v1676_v16 = vmul.f32 %v4328_v26, %v4286_v49  ;;  %v1927_v11 = vor.u32 1.1754944e-38, %v1926_v32  ;;  %vm1935_vm11 = vweird.f32 %v4237_v21  ;;  %v4387_v1 = vsel %vm4342_vm8, %v1657_v13, %v1653_v34 }
 0x217   :  { %v4334_v3 = vpop.eup %2864  ;;  %v1941_v41 = vand.u32 2147483648, %v4237_v21  ;;  %v1934_v32 = vadd.f32 %v4279_v18, %v1933_v60  ;;  %vm1936_vm12 = vweird.f32 %v4279_v18  ;;  %v1919_v13 = vadd.f32 %v4265_v51, %v1918_v55 }
 0x218   :  { %v1946_v46 = vmul.f32 %v4334_v3, %v4295_v43  ;;  %v4351_v56 = vpop.xlane.xlu0 %1331  ;;  %v1677_v0 = vsub.f32 1.0, %v1676_v16  ;;  %v4394_v52 = vpop.eup %2866  ;;  %vm1921_vm13 = vweird.f32 %v4265_v51  ;;  %vm1951_vm14 = vweird.f32 %v4334_v3  ;;  %vm4420_vm0 = vmor %vm1935_vm11, %vm1936_vm12 }
 0x219   :  { %2868 = vrcp.f32 %v4351_v56  ;;  %v1939_v15 = vand.u32 2147483647, %v4237_v21  ;;  %v1663_v60 = vmul.f32 %v4322_v39, %v1662_v48  ;;  %vm1665_vm15 = vweird.f32 %v4139_v59  ;;  %vm4439_vm8 = vmor %vm1920_vm10, %vm1921_vm13 }
 0x21a   :  { %v1947_v4 = vsub.f32 1.0, %v1946_v46  ;;  %2870 = vrcp.f32 %v4283_v57  ;;  %v1956_v46 = vand.u32 2147483648, %v4295_v43  ;;  %vm4424_vm6 = vcmp.eq.f32.partialorder %v1924_v31, 8.507059e+37 }
 0x21b   :  { %v1678_v48 = vmul.f32 %v4328_v26, %v1677_v0  ;;  %vm1950_vm7 = vweird.f32 %v4295_v43  ;;  %v1938_v29 = vsel %vm4420_vm0, %v4279_v18, %v1934_v32  ;;  %vm1940_vm12 = vcmp.eq.f32.partialorder %v1939_v15, 8.507059e+37 }
 0x21c   :  { %v1948_v19 = vmul.f32 %v4334_v3, %v1947_v4  ;;  %1436 = vadd.xlane.f32.xlu0 %v4149_v35  ;;  %1340 = vadd.xlane.f32.xlu2 %v4213_v22  ;;  %v1954_v22 = vand.u32 2147483647, %v4295_v43  ;;  %v1942_v4 = vor.u32 1.1754944e-38, %v1941_v41  ;;  %vm1952_vm9 = vmor %vm1950_vm7, %vm1951_vm14  ;;  %v1957_v31 = vor.u32 1.1754944e-38, %v1956_v46 }
 0x21d   :  { %1337 = vadd.xlane.f32.xlu1 %v4186_v27  ;;  %v1923_v43 = vsel %vm4439_vm8, %v4265_v51, %v1919_v13  ;;  %vm1666_vm10 = vweird.f32 %v4322_v39  ;;  %vm1681_vm13 = vweird.f32 %v4328_v26  ;;  %vm1680_vm14 = vweird.f32 %v4286_v49 }
 0x21e   :  { %v1949_v35 = vadd.f32 %v4334_v3, %v1948_v19  ;;  %v4406_v24 = vpop.xlane.xlu2 %1313  ;;  %vm1955_vm11 = vcmp.eq.f32.partialorder %v1954_v22, 8.507059e+37  ;;  %v1943_v46 = vsel %vm1940_vm12, %v1942_v4, %v1938_v29  ;;  %v1928_v51 = vsel %vm4424_vm6, %v1927_v11, %v1923_v43  ;;  %vm4488_vm6 = vmor %vm1680_vm14, %vm1681_vm13 }
 0x21f   :  { %v4401_v54 = vpop.eup %2868  ;;  %2872 = vrcp.f32 %v4406_v24  ;;  %v4430_v19 = vpop.xlane.xlu1 %1316  ;;  %v1684_v29 = vand.u32 2147483647, %v4286_v49  ;;  %v2470_v22 = vmul.f32 %v3854_v2, %v1943_v46  ;;  %v1699_v34 = vand.u32 2147483647, %v4351_v56  ;;  %vm4504_vm7 = vmor %vm1665_vm15, %vm1666_vm10 }
 0x220   :  { %v1691_v27 = vmul.f32 %v4401_v54, %v4351_v56  ;;  %v4414_v16 = vpop.xlane.xlu0 %1301  ;;  %2874 = vrcp.f32 %v4430_v19  ;;  %v1953_v18 = vsel %vm1952_vm9, %v4334_v3, %v1949_v35  ;;  %v4451_v12 = vpop.eup %2870  ;;  %v1679_v3 = vadd.f32 %v4328_v26, %v1678_v48 }
 0x221   :  { %2876 = vrcp.f32 %v4337_v33  ;;  %v1958_v32 = vsel %vm1955_vm11, %v1957_v31, %v1953_v18  ;;  %v1686_v35 = vand.u32 2147483648, %v4286_v49  ;;  %v2469_v4 = vmul.f32 %v3832_v10, %v1928_v51 }
 0x222   :  { %v1692_v41 = vsub.f32 1.0, %v1691_v27  ;;  %v2471_v27 = vmul.f32 %v3869_v36, %v1958_v32  ;;  %v1664_v36 = vadd.f32 %v4322_v39, %v1663_v60  ;;  %vm1696_vm0 = vweird.f32 %v4401_v54 }
 0x223   :  { %v1687_v18 = vor.u32 1.1754944e-38, %v1686_v35  ;;  %vm1695_vm8 = vweird.f32 %v4351_v56  ;;  %v6115_v32 = vand.u32 2147483647, %v4139_v59  ;;  %vm1700_vm11 = vcmp.eq.f32.partialorder %v1699_v34, 8.507059e+37 }
 0x224   :  { %v1693_v0 = vmul.f32 %v4401_v54, %v1692_v41  ;;  %1439 = vadd.xlane.f32.xlu2 %v4163_v20  ;;  %v1701_v20 = vand.u32 2147483648, %v4351_v56  ;;  %2525 = vmatpush.msra.mxu1 %v2471_v27  ;;  %v1683_v41 = vsel %vm4488_vm6, %v4328_v26, %v1679_v3  ;;  %vm1697_vm15 = vmor %vm1695_vm8, %vm1696_vm0  ;;  %vm1685_vm12 = vcmp.eq.f32.partialorder %v1684_v29, 8.507059e+37 }
 0x225   :  { %v4461_v13 = vpop.eup %2872  ;;  %1433 = vadd.xlane.f32.xlu1 %v4159_v23  ;;  %v1571_v23 = vmul.f32 %v4451_v12, %v4283_v57  ;;  %vm4516_vm9 = vcmp.eq.f32.partialorder %v6115_v32, 8.507059e+37  ;;  %v1688_v51 = vsel %vm1685_vm12, %v1687_v18, %v1683_v41  ;;  %v1611_v29 = vand.u32 2147483648, %v4406_v24 }
 0x226   :  { %v1601_v11 = vmul.f32 %v4461_v13, %v4406_v24  ;;  %v4472_v15 = vpop.xlane.xlu2 %1451  ;;  %v4475_v55 = vpop.eup %2874  ;;  %v1694_v48 = vadd.f32 %v4401_v54, %v1693_v0  ;;  %2526 = vmatpush.msra.mxu1 %v2470_v22  ;;  %v1668_v0 = vsel %vm4504_vm7, %v4322_v39, %v1664_v36  ;;  %v1702_v46 = vor.u32 1.1754944e-38, %v1701_v20 }
 0x227   :  { %6109 = vst [vmem:[#allocation36_spill] sm:$0xff] %v4472_v15  ;;  %v1616_v31 = vmul.f32 %v4475_v55, %v4430_v19  ;;  %v4494_v10 = vpop.xlane.xlu1 %1454  ;;  %v4508_v43 = vpop.eup %2876  ;;  %v1572_v59 = vsub.f32 1.0, %v1571_v23  ;;  %v1626_v22 = vand.u32 2147483648, %v4430_v19  ;;  %v2453_v34 = vmul.f32 %v3867_v62, %v1688_v51 }
 0x228   :  { %v4480_v60 = vpop.xlane.xlu0 %1310  ;;  %v1602_v21 = vsub.f32 1.0, %v1601_v11  ;;  %6112 = vst [vmem:[#allocation37_spill] sm:$0xff] %v4494_v10  ;;  %2527 = vmatpush.msra.mxu1 %v2469_v4  ;;  %v1698_v39 = vsel %vm1697_vm15, %v4401_v54, %v1694_v48  ;;  %v1556_v3 = vmul.f32 %v4508_v43, %v4337_v33  ;;  %v1673_v54 = vsel %vm4516_vm9, %v4377_v58, %v1668_v0 }
 0x229   :  { %2878 = vrcp.f32 %v4480_v60  ;;  %v1617_v27 = vsub.f32 1.0, %v1616_v31  ;;  %v1703_v36 = vsel %vm1700_vm11, %v1702_v46, %v1698_v39  ;;  %vm1606_vm10 = vweird.f32 %v4461_v13 }
 0x22a   :  { %v1603_v56 = vmul.f32 %v4461_v13, %v1602_v21  ;;  %2880 = vrcp.f32 %v4414_v16  ;;  %2528 = vmatpush.msra.mxu1 %v4340_v30  ;;  %v2454_v20 = vmul.f32 %v3886_v14, %v1703_v36  ;;  %v1624_v30 = vand.u32 2147483647, %v4430_v19 }
 0x22b   :  { %v1618_v35 = vmul.f32 %v4475_v55, %v1617_v27  ;;  %2882 = vrcp.f32 %v4220_v17  ;;  %vm1621_vm13 = vweird.f32 %v4475_v55  ;;  %v1573_v62 = vmul.f32 %v4451_v12, %v1572_v59 }
 0x22c   :  { %2506 = vmatpush.msra.mxu0 %v2454_v20  ;;  %v1604_v48 = vadd.f32 %v4461_v13, %v1603_v56  ;;  %vm1575_vm14 = vweird.f32 %v4283_v57  ;;  %v1557_v2 = vsub.f32 1.0, %v1556_v3  ;;  %vm1605_vm0 = vweird.f32 %v4406_v24 }
 0x22d   :  { %v1619_v58 = vadd.f32 %v4475_v55, %v1618_v35  ;;  %vm1620_vm6 = vweird.f32 %v4430_v19  ;;  %v2452_v49 = vmul.f32 %v3824_v53, %v1673_v54  ;;  %vm4561_vm7 = vmor %vm1605_vm0, %vm1606_vm10  ;;  %v1609_v0 = vand.u32 2147483647, %v4406_v24 }
 0x22e   :  { %v4539_v23 = vpop.xlane.xlu2 %1397  ;;  %2507 = vmatpush.msra.mxu0 %v2453_v34  ;;  %v1581_v32 = vand.u32 2147483648, %v4283_v57  ;;  %v1612_v26 = vor.u32 1.1754944e-38, %v1611_v29  ;;  %v1627_v46 = vor.u32 1.1754944e-38, %v1626_v22  ;;  %v2451_v27 = vmul.f32 %v3788_v45, %v4387_v1  ;;  %vm1622_vm8 = vmor %vm1620_vm6, %vm1621_vm13 }
 0x22f   :  { %v4535_v11 = vpop.eup %2878  ;;  %6118 = vst [vmem:[#allocation60_spill] sm:$0xff] %v4539_v23  ;;  %v4553_v21 = vpop.xlane.xlu1 %1400  ;;  %v1623_v56 = vsel %vm1622_vm8, %v4475_v55, %v1619_v58  ;;  %vm1625_vm9 = vcmp.eq.f32.partialorder %v1624_v30, 8.507059e+37  ;;  %v1608_v24 = vsel %vm4561_vm7, %v4461_v13, %v1604_v48  ;;  %v1558_v39 = vmul.f32 %v4508_v43, %v1557_v2 }
 0x230   :  { %v1586_v4 = vmul.f32 %v4535_v11, %v4480_v60  ;;  %v4545_v14 = vpop.xlane.xlu0 %1394  ;;  %6120 = vst [vmem:[#allocation62_spill] sm:$0xff] %v4553_v21  ;;  %v4555_v31 = vpop.eup %2880  ;;  %2508 = vmatpush.msra.mxu0 %v2452_v49  ;;  %v1628_v1 = vsel %vm1625_vm9, %v1627_v46, %v1623_v56  ;;  %vm1576_vm15 = vweird.f32 %v4451_v12  ;;  %vm1610_vm11 = vcmp.eq.f32.partialorder %v1609_v0, 8.507059e+37 }
 0x231   :  { %6119 = vst [vmem:[#allocation61_spill] sm:$0xff] %v4545_v14  ;;  %v4571_v19 = vpop.eup %2882  ;;  %v1541_v45 = vmul.f32 %v4555_v31, %v4414_v16  ;;  %vm1591_vm12 = vweird.f32 %v4535_v11  ;;  %v1574_v55 = vadd.f32 %v4451_v12, %v1573_v62  ;;  %v1596_v13 = vand.u32 2147483648, %v4480_v60  ;;  %vm4600_vm13 = vmor %vm1575_vm14, %vm1576_vm15 }
 0x232   :  { %v1587_v41 = vsub.f32 1.0, %v1586_v4  ;;  %2509 = vmatpush.msra.mxu0 %v2451_v27  ;;  %v1511_v59 = vmul.f32 %v4571_v19, %v4220_v17  ;;  %v1613_v3 = vsel %vm1610_vm11, %v1612_v26, %v1608_v24  ;;  %v1579_v35 = vand.u32 2147483647, %v4283_v57 }
 0x233   :  { %v1566_v36 = vand.u32 2147483648, %v4337_v33  ;;  %vm1590_vm10 = vweird.f32 %v4480_v60  ;;  %v2449_v29 = vmul.f32 %v3907_v25, %v1628_v1  ;;  %v1594_v54 = vand.u32 2147483647, %v4480_v60 }
 0x234   :  { %v1588_v53 = vmul.f32 %v4535_v11, %v1587_v41  ;;  %2510 = vmatpush.msra.mxu0 %v4362_v40  ;;  %v1527_v34 = vsub.f32 1.0, %v4375_v63  ;;  %v1542_v30 = vsub.f32 1.0, %v1541_v45  ;;  %vm4611_vm0 = vmor %vm1590_vm10, %vm1591_vm12  ;;  %v1559_v60 = vadd.f32 %v4508_v43, %v1558_v39 }
 0x235   :  { %vm1561_vm14 = vweird.f32 %v4508_v43  ;;  %v2448_v57 = vmul.f32 %v3898_v9, %v1613_v3  ;;  %v1578_v58 = vsel %vm4600_vm13, %v4451_v12, %v1574_v55  ;;  %v1564_v48 = vand.u32 2147483647, %v4337_v33 }
 0x236   :  { %v1589_v51 = vadd.f32 %v4535_v11, %v1588_v53  ;;  %2511 = vmatpush.msra.mxu0 %v2449_v29  ;;  %v1496_v62 = vmul.f32 %v4394_v52, %v4113_v61  ;;  %v1582_v2 = vor.u32 1.1754944e-38, %v1581_v32  ;;  %vm1560_vm6 = vweird.f32 %v4337_v33 }
 0x237   :  { %v4605_v4 = vpop.xlane.xlu1 %1355  ;;  %v1597_v41 = vor.u32 1.1754944e-38, %v1596_v13  ;;  %v1512_v49 = vsub.f32 1.0, %v1511_v59  ;;  %v1567_v18 = vor.u32 1.1754944e-38, %v1566_v36  ;;  %vm1595_vm7 = vcmp.eq.f32.partialorder %v1594_v54, 8.507059e+37  ;;  %vm1562_vm9 = vmor %vm1560_vm6, %vm1561_vm14 }
 0x238   :  { %v4593_v20 = vpop.xlane.xlu0 %1349  ;;  %v4607_v40 = vpop.xlane.xlu2 %1352  ;;  %v1593_v63 = vsel %vm4611_vm0, %v4535_v11, %v1589_v51  ;;  %2512 = vmatpush.msra.mxu0 %v2448_v57  ;;  %vm1580_vm8 = vcmp.eq.f32.partialorder %v1579_v35, 8.507059e+37  ;;  %v1543_v9 = vmul.f32 %v4555_v31, %v1542_v30  ;;  %v1563_v0 = vsel %vm1562_vm9, %v4508_v43, %v1559_v60 }
 0x239   :  { %6123 = vst [vmem:[#allocation63_spill] sm:$0xff] %v4593_v20  ;;  %v1598_v12 = vsel %vm1595_vm7, %v1597_v41, %v1593_v63  ;;  %v1583_v11 = vsel %vm1580_vm8, %v1582_v2, %v1578_v58  ;;  %v1528_v26 = vmul.f32 %v4319_v8, %v1527_v34  ;;  %vm1565_vm15 = vcmp.eq.f32.partialorder %v1564_v48, 8.507059e+37 }
 0x23a   :  { %v2447_v32 = vmul.f32 %v3916_v37, %v1598_v12  ;;  %v1568_v33 = vsel %vm1565_vm15, %v1567_v18, %v1563_v0  ;;  %v1536_v46 = vand.u32 2147483648, %v4106_v28  ;;  %v1497_v27 = vsub.f32 1.0, %v1496_v62 }
 0x23b   :  { %v1551_v53 = vand.u32 2147483648, %v4414_v16  ;;  %v2446_v56 = vmul.f32 %v3861_v38, %v1583_v11  ;;  %v1513_v39 = vmul.f32 %v4571_v19, %v1512_v49  ;;  %v1544_v37 = vadd.f32 %v4555_v31, %v1543_v9 }
 0x23c   :  { %2513 = vmatpush.msra.mxu0 %v2447_v32  ;;  %vm1546_vm11 = vweird.f32 %v4555_v31  ;;  %v1549_v1 = vand.u32 2147483647, %v4414_v16  ;;  %v2445_v51 = vmul.f32 %v3884_v44, %v1568_v33  ;;  %v1529_v55 = vadd.f32 %v4319_v8, %v1528_v26  ;;  %v6139_v33 = vld [vmem:[#allocation39_spill] sm:$0xff] }
 0x23d   :  { %vm1531_vm12 = vweird.f32 %v4319_v8  ;;  %vm1530_vm10 = vweird.f32 %v4106_v28  ;;  %vm1545_vm13 = vweird.f32 %v4414_v16  ;;  %v1534_v38 = vand.u32 2147483647, %v4106_v28 }
 0x23e   :  { %2514 = vmatpush.msra.mxu0 %v2446_v56  ;;  %v1537_v59 = vor.u32 1.1754944e-38, %v1536_v46  ;;  %v1498_v13 = vmul.f32 %v4394_v52, %v1497_v27  ;;  %v1521_v3 = vand.u32 2147483648, %v4220_v17  ;;  %v1552_v35 = vor.u32 1.1754944e-38, %v1551_v53  ;;  %vm1547_vm0 = vmor %vm1545_vm13, %vm1546_vm11 }
 0x23f   :  { %v4640_v45 = vpop.xlane.xlu1 %1463  ;;  %2884 = vrcp.f32 %v4367_v6  ;;  %v1548_v44 = vsel %vm1547_vm0, %v4555_v31, %v1544_v37  ;;  %vm1550_vm14 = vcmp.eq.f32.partialorder %v1549_v1, 8.507059e+37  ;;  %vm1532_vm6 = vmor %vm1530_vm10, %vm1531_vm12  ;;  %v1514_v36 = vadd.f32 %v4571_v19, %v1513_v39 }
 0x240   :  { %v4637_v24 = vpop.xlane.xlu0 %1457  ;;  %6129 = vst [vmem:[#allocation65_spill] sm:$0xff] %v4640_v45  ;;  %v4642_v43 = vpop.xlane.xlu2 %1460  ;;  %2515 = vmatpush.msra.mxu0 %v2445_v51  ;;  %vm1515_vm7 = vweird.f32 %v4220_v17  ;;  %2886 = vrcp.f32 %v4472_v15  ;;  %v1553_v28 = vsel %vm1550_vm14, %v1552_v35, %v1548_v44  ;;  %v1533_v16 = vsel %vm1532_vm6, %v4319_v8, %v1529_v55 }
 0x241   :  { %6128 = vst [vmem:[#allocation64_spill] sm:$0xff] %v4637_v24  ;;  %v2444_v29 = vmul.f32 %v3901_v7, %v1553_v28  ;;  %vm1535_vm8 = vcmp.eq.f32.partialorder %v1534_v38, 8.507059e+37  ;;  %vm1516_vm9 = vweird.f32 %v4571_v19  ;;  %v1519_v54 = vand.u32 2147483647, %v4220_v17 }
 0x242   :  { %6130 = vst [vmem:[#allocation66_spill] sm:$0xff] %v4642_v43  ;;  %v1522_v22 = vor.u32 1.1754944e-38, %v1521_v3  ;;  %2888 = vrcp.f32 %v4494_v10  ;;  %v1538_v31 = vsel %vm1535_vm8, %v1537_v59, %v1533_v16  ;;  %vm1517_vm15 = vmor %vm1515_vm7, %vm1516_vm9  ;;  %v1499_v17 = vadd.f32 %v4394_v52, %v1498_v13 }
 0x243   :  { %2516 = vmatpush.msra.mxu0 %v2444_v29  ;;  %v2443_v30 = vmul.f32 %v3808_v42, %v1538_v31  ;;  %v1518_v25 = vsel %vm1517_vm15, %v4571_v19, %v1514_v36  ;;  %vm1520_vm11 = vcmp.eq.f32.partialorder %v1519_v54, 8.507059e+37  ;;  %vm1501_vm12 = vweird.f32 %v4394_v52 }
 0x244   :  { %v1523_v60 = vsel %vm1520_vm11, %v1522_v22, %v1518_v25  ;;  %v1506_v63 = vand.u32 2147483648, %v4113_v61  ;;  %2890 = vrcp.f32 %v4539_v23  ;;  %vm1500_vm10 = vweird.f32 %v4113_v61 }
 0x245   :  { %v4675_v57 = vpop.eup %2884  ;;  %2517 = vmatpush.msra.mxu0 %v2443_v30  ;;  %v2442_v42 = vmul.f32 %v3850_v50, %v1523_v60  ;;  %2892 = vrcp.f32 %v4545_v14  ;;  %vm4684_vm13 = vmor %vm1500_vm10, %vm1501_vm12  ;;  %v1504_v2 = vand.u32 2147483647, %v4113_v61  ;;  %v2001_v32 = vand.u32 2147483648, %v4367_v6 }
 0x246   :  { %6132 = vst [vmem:[#allocation68_spill] sm:$0xff] %v4675_v57  ;;  %v4680_v19 = vpop.eup %2886  ;;  %v1991_v62 = vmul.f32 %v4675_v57, %v4367_v6  ;;  %2894 = vrcp.f32 %v4553_v21  ;;  %v1503_v50 = vsel %vm4684_vm13, %v4394_v52, %v1499_v17  ;;  %v1507_v41 = vor.u32 1.1754944e-38, %v1506_v63 }
 0x247   :  { %v4671_v7 = vpop.xlane.xlu1 %1409  ;;  %6133 = vst [vmem:[#allocation69_spill] sm:$0xff] %v4680_v19  ;;  %2518 = vmatpush.msra.mxu0 %v2442_v42  ;;  %2896 = vrcp.f32 %v4593_v20  ;;  %v2291_v49 = vmul.f32 %v4680_v19, %v4472_v15  ;;  %vm1505_vm0 = vcmp.eq.f32.partialorder %v1504_v2, 8.507059e+37  ;;  %v2301_v27 = vand.u32 2147483648, %v4472_v15 }
 0x248   :  { %v4665_v34 = vpop.xlane.xlu0 %1403  ;;  %v4669_v8 = vpop.xlane.xlu2 %1406  ;;  %2898 = vrcp.f32 %v4605_v4  ;;  %v1508_v52 = vsel %vm1505_vm0, %v1507_v41, %v1503_v50  ;;  %v1992_v26 = vsub.f32 1.0, %v1991_v62  ;;  %v2316_v53 = vand.u32 2147483648, %v4494_v10 }
 0x249   :  { %6131 = vst [vmem:[#allocation67_spill] sm:$0xff] %v4665_v34  ;;  %v4688_v48 = vpop.eup %2888  ;;  %2900 = vrcp.f32 %v4607_v40  ;;  %v2441_v46 = vmul.f32 %v6139_v33, %v1508_v52  ;;  %v2292_v39 = vsub.f32 1.0, %v2291_v49  ;;  %v2031_v1 = vand.u32 2147483648, %v4539_v23 }
 0x24a   :  { %6136 = vst [vmem:[#allocation70_spill] sm:$0xff] %v4688_v48  ;;  %v4703_v9 = vpop.eup %2890  ;;  %v2306_v12 = vmul.f32 %v4688_v48, %v4494_v10  ;;  %2902 = vrcp.f32 %v4637_v24  ;;  %v4731_v13 = vmul.f32 %v4675_v57, %v1992_v26  ;;  %v4733_v3 = vor.u32 1.1754944e-38, %v2001_v32 }
 0x24b   :  { %6137 = vst [vmem:[#allocation71_spill] sm:$0xff] %v4703_v9  ;;  %v4712_v0 = vpop.eup %2892  ;;  %v2021_v37 = vmul.f32 %v4703_v9, %v4539_v23  ;;  %2519 = vmatpush.msra.mxu0 %v2441_v46  ;;  %v2046_v35 = vand.u32 2147483648, %v4553_v21  ;;  %2904 = vrcp.f32 %v4640_v45  ;;  %v4739_v36 = vor.u32 1.1754944e-38, %v2301_v27 }
 0x24c   :  { %6138 = vst [vmem:[#allocation72_spill] sm:$0xff] %v4712_v0  ;;  %v4718_v56 = vpop.eup %2894  ;;  %v2307_v55 = vsub.f32 1.0, %v2306_v12  ;;  %v2006_v38 = vmul.f32 %v4712_v0, %v4545_v14  ;;  %v2016_v16 = vand.u32 2147483648, %v4545_v14  ;;  %2906 = vrcp.f32 %v4642_v43 }
 0x24d   :  { %6140 = vst [vmem:[#allocation39_spill] sm:$0xff] %v4718_v56  ;;  %v4724_v51 = vpop.eup %2896  ;;  %v2036_v28 = vmul.f32 %v4718_v56, %v4553_v21  ;;  %v4746_v29 = vmul.f32 %v4680_v19, %v2292_v39  ;;  %v4748_v54 = vor.u32 1.1754944e-38, %v2316_v53  ;;  %v2022_v22 = vsub.f32 1.0, %v2021_v37 }
 0x24e   :  { %6141 = vst [vmem:[#allocation73_spill] sm:$0xff] %v4724_v51  ;;  %v4728_v59 = vpop.eup %2898  ;;  %v4750_v31 = vor.u32 1.1754944e-38, %v2031_v1  ;;  %v4755_v25 = vmul.f32 %v4688_v48, %v2307_v55  ;;  %v2007_v60 = vsub.f32 1.0, %v2006_v38  ;;  %v1781_v17 = vmul.f32 %v4724_v51, %v4593_v20 }
 0x24f   :  { %v4708_v61 = vpop.xlane.xlu1 %1364  ;;  %6142 = vst [vmem:[#allocation74_spill] sm:$0xff] %v4731_v13  ;;  %v4737_v44 = vpop.eup %2900  ;;  %2908 = vrcp.f32 %v4669_v8  ;;  %v4766_v62 = vor.u32 1.1754944e-38, %v2046_v35  ;;  %v1811_v50 = vmul.f32 %v4728_v59, %v4605_v4  ;;  %v2037_v41 = vsub.f32 1.0, %v2036_v28 }
 0x250   :  { %v4701_v18 = vpop.xlane.xlu0 %1358  ;;  %v4710_v11 = vpop.xlane.xlu2 %1361  ;;  %6143 = vst [vmem:[#allocation75_spill] sm:$0xff] %v4733_v3  ;;  %v1796_v2 = vmul.f32 %v4737_v44, %v4607_v40  ;;  %2910 = vrcp.f32 %v4671_v7  ;;  %v4773_v49 = vor.u32 1.1754944e-38, %v2016_v16  ;;  %v1821_v12 = vand.u32 2147483648, %v4605_v4 }
 0x251   :  { %6144 = vst [vmem:[#allocation76_spill] sm:$0xff] %v4737_v44  ;;  %v4764_v58 = vpop.eup %2902  ;;  %2912 = vrcp.f32 %v4665_v34  ;;  %v4780_v26 = vmul.f32 %v4703_v9, %v2022_v22  ;;  %v1806_v32 = vand.u32 2147483648, %v4607_v40  ;;  %v1791_v33 = vand.u32 2147483648, %v4593_v20 }
 0x252   :  { %6145 = vst [vmem:[#allocation77_spill] sm:$0xff] %v4739_v36  ;;  %v4777_v52 = vpop.eup %2904  ;;  %2914 = vrcp.f32 %v4701_v18  ;;  %v4788_v27 = vmul.f32 %v4712_v0, %v2007_v60  ;;  %v1782_v53 = vsub.f32 1.0, %v1781_v17  ;;  %v2321_v39 = vmul.f32 %v4764_v58, %v4637_v24 }
 0x253   :  { %6146 = vst [vmem:[#allocation78_spill] sm:$0xff] %v4746_v29  ;;  %v4785_v46 = vpop.eup %2906  ;;  %v2331_v37 = vand.u32 2147483648, %v4637_v24  ;;  %v1812_v1 = vsub.f32 1.0, %v1811_v50  ;;  %v1797_v55 = vsub.f32 1.0, %v1796_v2  ;;  %v2361_v38 = vand.u32 2147483648, %v4640_v45 }
 0x254   :  { %6147 = vst [vmem:[#allocation79_spill] sm:$0xff] %v4748_v54  ;;  %2916 = vrcp.f32 %v4708_v61  ;;  %v4798_v28 = vmul.f32 %v4718_v56, %v2037_v41  ;;  %v4800_v16 = vor.u32 1.1754944e-38, %v1821_v12  ;;  %v2351_v22 = vmul.f32 %v4777_v52, %v4640_v45 }
 0x255   :  { %6148 = vst [vmem:[#allocation80_spill] sm:$0xff] %v4750_v31  ;;  %v4795_v35 = vpop.eup %2908  ;;  %v2346_v60 = vand.u32 2147483648, %v4642_v43  ;;  %v4807_v50 = vor.u32 1.1754944e-38, %v1806_v32  ;;  %v4809_v2 = vor.u32 1.1754944e-38, %v1791_v33  ;;  %v2336_v36 = vmul.f32 %v4785_v46, %v4642_v43 }
 0x256   :  { %6150 = vst [vmem:[#allocation82_spill] sm:$0xff] %v4755_v25  ;;  %v4805_v17 = vpop.eup %2910  ;;  %2918 = vrcp.f32 %v4710_v11  ;;  %v4819_v19 = vmul.f32 %v4724_v51, %v1782_v53  ;;  %v2322_v29 = vsub.f32 1.0, %v2321_v39  ;;  %v4821_v54 = vor.u32 1.1754944e-38, %v2331_v37 }
 0x257   :  { %v4760_v63 = vpop.xlane.xlu1 %1472  ;;  %6153 = vst [vmem:[#allocation85_spill] sm:$0xff] %v4764_v58  ;;  %v4816_v12 = vpop.eup %2912  ;;  %v4829_v48 = vmul.f32 %v4728_v59, %v1812_v1  ;;  %v4832_v25 = vmul.f32 %v4737_v44, %v1797_v55  ;;  %v4834_v15 = vor.u32 1.1754944e-38, %v2361_v38  ;;  %v2352_v39 = vsub.f32 1.0, %v2351_v22 }
 0x258   :  { %v4752_v30 = vpop.xlane.xlu0 %1466  ;;  %6151 = vst [vmem:[#allocation83_spill] sm:$0xff] %v4760_v63  ;;  %v4762_v42 = vpop.xlane.xlu2 %1469  ;;  %v4839_v37 = vor.u32 1.1754944e-38, %v2346_v60  ;;  %v2337_v1 = vsub.f32 1.0, %v2336_v36  ;;  %v2076_v55 = vand.u32 2147483648, %v4669_v8  ;;  %v2081_v38 = vmul.f32 %v4805_v17, %v4671_v7 }
 0x259   :  { %6149 = vst [vmem:[#allocation81_spill] sm:$0xff] %v4752_v30  ;;  %2920 = vrcp.f32 %v4752_v30  ;;  %v4826_v33 = vpop.eup %2914  ;;  %v2051_v22 = vmul.f32 %v4816_v12, %v4665_v34  ;;  %v2091_v36 = vand.u32 2147483648, %v4671_v7  ;;  %v2061_v24 = vand.u32 2147483648, %v4665_v34 }
 0x25a   :  { %6152 = vst [vmem:[#allocation84_spill] sm:$0xff] %v4762_v42  ;;  %2922 = vrcp.f32 %v4760_v63  ;;  %v4844_v10 = vpop.eup %2916  ;;  %v1826_v60 = vmul.f32 %v4826_v33, %v4701_v18  ;;  %v1866_v43 = vand.u32 2147483648, %v4708_v61  ;;  %v1851_v3 = vand.u32 2147483648, %v4710_v11 }
 0x25b   :  { %6154 = vst [vmem:[#allocation86_spill] sm:$0xff] %v4766_v62  ;;  %2924 = vrcp.f32 %v4762_v42  ;;  %v1856_v45 = vmul.f32 %v4844_v10, %v4708_v61  ;;  %v4875_v57 = vmul.f32 %v4785_v46, %v2337_v1  ;;  %v4877_v13 = vor.u32 1.1754944e-38, %v2076_v55 }
 0x25c   :  { %6155 = vst [vmem:[#allocation87_spill] sm:$0xff] %v4773_v49  ;;  %v2082_v0 = vsub.f32 1.0, %v2081_v38  ;;  %v4891_v55 = vor.u32 1.1754944e-38, %v2091_v36  ;;  %v4893_v38 = vor.u32 1.1754944e-38, %v2061_v24  ;;  %v4903_v9 = vor.u32 1.1754944e-38, %v1851_v3 }
 0x25d   :  { %6156 = vst [vmem:[#allocation88_spill] sm:$0xff] %v4777_v52 }
 0x25e   :  { %6157 = vst [vmem:[#allocation89_spill] sm:$0xff] %v4780_v26  ;;  %v2406_v26 = vand.u32 2147483648, %v4760_v63 }
 0x25f   :  { %6158 = vst [vmem:[#allocation90_spill] sm:$0xff] %v4785_v46  ;;  %v4824_v32 = vpop.xlane.xlu1 %1418  ;;  %v4895_v46 = vor.u32 1.1754944e-38, %v1866_v43 }
 0x260   :  { %6159 = vst [vmem:[#allocation91_spill] sm:$0xff] %v4788_v27  ;;  %v4814_v41 = vpop.xlane.xlu0 %1412  ;;  %v4837_v53 = vpop.xlane.xlu2 %1415  ;;  %v1836_v27 = vand.u32 2147483648, %v4701_v18  ;;  %vm2130_vm14 = vweird.f32 %v4824_v32 }
 0x261   :  { %6160 = vst [vmem:[#allocation92_spill] sm:$0xff] %v4795_v35  ;;  %2926 = vrcp.f32 %v4814_v41 }
 0x262   :  { %6161 = vst [vmem:[#allocation93_spill] sm:$0xff] %v4798_v28  ;;  %2928 = vrcp.f32 %v4837_v53  ;;  %v4908_v36 = vor.u32 1.1754944e-38, %v1836_v27  ;;  %v2391_v27 = vand.u32 2147483648, %v4762_v42 }
 0x263   :  { %6162 = vst [vmem:[#allocation94_spill] sm:$0xff] %v4800_v16  ;;  %2930 = vrcp.f32 %v4824_v32 }
 0x264   :  { %6163 = vst [vmem:[#allocation95_spill] sm:$0xff] %v4805_v17 }
 0x265   :  { %6164 = vst [vmem:[#allocation96_spill] sm:$0xff] %v4807_v50  ;;  %v4960_v50 = vor.u32 1.1754944e-38, %v2391_v27 }
 0x266   :  { %6165 = vst [vmem:[#allocation97_spill] sm:$0xff] %v4809_v2 }
 0x267   :  { %6166 = vst [vmem:[#allocation98_spill] sm:$0xff] %v4816_v12  ;;  %v4886_v6 = vpop.xlane.xlu1 %1421 }
 0x268   :  { %6167 = vst [vmem:[#allocation99_spill] sm:$0xff] %v4819_v19  ;;  %v4880_v31 = vpop.xlane.xlu0 %1367 }
 0x269   :  { %6168 = vst [vmem:[#allocation100_spill] sm:$0xff] %v4821_v54  ;;  %v2066_v54 = vmul.f32 %v4795_v35, %v4669_v8  ;;  %2932 = vrcp.f32 %v4880_v31  ;;  %vm1875_vm6 = vweird.f32 %v4880_v31 }
 0x26a   :  { %6169 = vst [vmem:[#allocation101_spill] sm:$0xff] %v4832_v25  ;;  %2934 = vrcp.f32 %v4886_v6 }
 0x26b   :  { %6170 = vst [vmem:[#allocation102_spill] sm:$0xff] %v4834_v15  ;;  %v4851_v15 = vmul.f32 %v4764_v58, %v2322_v29  ;;  %v4867_v58 = vmul.f32 %v4777_v52, %v2352_v39 }
 0x26c   :  { %6171 = vst [vmem:[#allocation103_spill] sm:$0xff] %v4839_v37  ;;  %v4858_v37 = vpop.eup %2918 }
 0x26d   :  { %6172 = vst [vmem:[#allocation104_spill] sm:$0xff] %v4851_v15  ;;  %v4864_v29 = vpop.eup %2920  ;;  %v2067_v15 = vsub.f32 1.0, %v2066_v54  ;;  %v2052_v54 = vsub.f32 1.0, %v2051_v22  ;;  %v1841_v52 = vmul.f32 %v4858_v37, %v4710_v11 }
 0x26e   :  { %6173 = vst [vmem:[#allocation105_spill] sm:$0xff] %v4864_v29  ;;  %v4872_v49 = vpop.eup %2922  ;;  %v2366_v14 = vmul.f32 %v4864_v29, %v4752_v30 }
 0x26f   :  { %6174 = vst [vmem:[#allocation106_spill] sm:$0xff] %v4867_v58  ;;  %v4882_v39 = vpop.eup %2924  ;;  %v1827_v58 = vsub.f32 1.0, %v1826_v60  ;;  %v4901_v22 = vmul.f32 %v4795_v35, %v2067_v15  ;;  %v1857_v60 = vsub.f32 1.0, %v1856_v45  ;;  %v2396_v24 = vmul.f32 %v4872_v49, %v4760_v63  ;;  %v4944_v51 = vpop.xlane.xlu2 %1370 }
 0x270   :  { %6175 = vst [vmem:[#allocation107_spill] sm:$0xff] %v4872_v49  ;;  %v4889_v1 = vpop.eup %2926  ;;  %v2381_v43 = vmul.f32 %v4882_v39, %v4762_v42  ;;  %v4917_v15 = vmul.f32 %v4805_v17, %v2082_v0  ;;  %v4920_v45 = vmul.f32 %v4816_v12, %v2052_v54  ;;  %v1842_v3 = vsub.f32 1.0, %v1841_v52  ;;  %v4946_v19 = vpop.xlane.xlu0 %1475 }
 0x271   :  { %6176 = vst [vmem:[#allocation108_spill] sm:$0xff] %v4875_v57  ;;  %v4898_v57 = vpop.eup %2928  ;;  %v4923_v56 = vmul.f32 %v4826_v33, %v1827_v58  ;;  %v2376_v63 = vand.u32 2147483648, %v4752_v30  ;;  %v4934_v0 = vmul.f32 %v4844_v10, %v1857_v60  ;;  %v4936_v54 = vor.u32 1.1754944e-38, %v2406_v26  ;;  %v4952_v21 = vpop.xlane.xlu1 %1424 }
 0x272   :  { %6177 = vst [vmem:[#allocation109_spill] sm:$0xff] %v4877_v13  ;;  %v4906_v62 = vpop.eup %2930  ;;  %v2111_v28 = vmul.f32 %v4898_v57, %v4837_v53  ;;  %v2106_v52 = vand.u32 2147483648, %v4814_v41  ;;  %v2397_v30 = vsub.f32 1.0, %v2396_v24  ;;  %v2382_v23 = vsub.f32 1.0, %v2381_v43 }
 0x273   :  { %6178 = vst [vmem:[#allocation110_spill] sm:$0xff] %v4882_v39  ;;  %v4931_v2 = vpop.eup %2932  ;;  %v2126_v58 = vmul.f32 %v4906_v62, %v4824_v32  ;;  %v2367_v12 = vsub.f32 1.0, %v2366_v14  ;;  %v2136_v60 = vand.u32 2147483648, %v4824_v32  ;;  %2936 = vrcp.f32 %v4944_v51 }
 0x274   :  { %6179 = vst [vmem:[#allocation111_spill] sm:$0xff] %v4891_v55  ;;  %v4941_v42 = vpop.eup %2934  ;;  %v1871_v26 = vmul.f32 %v4931_v2, %v4880_v31  ;;  %v2112_v24 = vsub.f32 1.0, %v2111_v28  ;;  %v2151_v14 = vand.u32 2147483648, %v4886_v6  ;;  %2938 = vrcp.f32 %v4952_v21 }
 0x275   :  { %6180 = vst [vmem:[#allocation112_spill] sm:$0xff] %v4893_v38  ;;  %v2096_v38 = vmul.f32 %v4889_v1, %v4814_v41  ;;  %v4958_v13 = vmul.f32 %v4858_v37, %v1842_v3  ;;  %v2127_v35 = vsub.f32 1.0, %v2126_v58  ;;  %v4965_v44 = vmul.f32 %v4872_v49, %v2397_v30 }
 0x276   :  { %6181 = vst [vmem:[#allocation113_spill] sm:$0xff] %v4901_v22  ;;  %v2141_v22 = vmul.f32 %v4941_v42, %v4886_v6  ;;  %v4968_v25 = vmul.f32 %v4864_v29, %v2367_v12  ;;  %v4970_v28 = vor.u32 1.1754944e-38, %v2376_v63  ;;  %v4975_v55 = vmul.f32 %v4882_v39, %v2382_v23 }
 0x277   :  { %6182 = vst [vmem:[#allocation114_spill] sm:$0xff] %v4908_v36  ;;  %v2097_v43 = vsub.f32 1.0, %v2096_v38  ;;  %v4972_v38 = vor.u32 1.1754944e-38, %v2106_v52  ;;  %v4980_v27 = vor.u32 1.1754944e-38, %v2136_v60  ;;  %v1872_v58 = vsub.f32 1.0, %v1871_v26 }
 0x278   :  { %6183 = vst [vmem:[#allocation115_spill] sm:$0xff] %v4917_v15  ;;  %v4983_v30 = vmul.f32 %v4898_v57, %v2112_v24  ;;  %v4988_v63 = vor.u32 1.1754944e-38, %v2151_v14  ;;  %v2128_v23 = vmul.f32 %v4906_v62, %v2127_v35  ;;  %2940 = vrcp.f32 %v4946_v19  ;;  %v5017_v49 = vpop.xlane.xlu0 %1448 }
 0x279   :  { %6184 = vst [vmem:[#allocation116_spill] sm:$0xff] %v4920_v45  ;;  %v2121_v45 = vand.u32 2147483648, %v4837_v53  ;;  %v4986_v12 = vmul.f32 %v4889_v1, %v2097_v43  ;;  %v1879_v60 = vand.u32 2147483647, %v4880_v31  ;;  %v5002_v43 = vpop.xlane.xlu2 %1478  ;;  %vm2131_vm7 = vweird.f32 %v4906_v62  ;;  %v5011_v29 = vpop.xlane.xlu1 %1346 }
 0x27a   :  { %6185 = vst [vmem:[#allocation117_spill] sm:$0xff] %v4936_v54  ;;  %v1881_v54 = vand.u32 2147483648, %v4880_v31  ;;  %v2134_v35 = vand.u32 2147483647, %v4824_v32  ;;  %2942 = vrcp.f32 %v5002_v43  ;;  %vm1876_vm9 = vweird.f32 %v4931_v2  ;;  %vm5048_vm0 = vmor %vm2130_vm14, %vm2131_vm7 }
 0x27b   :  { %6186 = vst [vmem:[#allocation118_spill] sm:$0xff] %v4960_v50  ;;  %v4977_v3 = vor.u32 1.1754944e-38, %v2121_v45  ;;  %v2142_v45 = vsub.f32 1.0, %v2141_v22  ;;  %v1873_v22 = vmul.f32 %v4931_v2, %v1872_v58  ;;  %v2166_v50 = vand.u32 2147483648, %v4952_v21  ;;  %vm5071_vm7 = vmor %vm1875_vm6, %vm1876_vm9 }
 0x27c   :  { %6187 = vst [vmem:[#allocation119_spill] sm:$0xff] %v4965_v44  ;;  %v4990_v52 = vor.u32 1.1754944e-38, %v1881_v54  ;;  %v2149_v54 = vand.u32 2147483647, %v4886_v6  ;;  %2944 = vrcp.f32 %v5011_v29  ;;  %vm5022_vm15 = vcmp.eq.f32.partialorder %v1879_v60, 8.507059e+37 }
 0x27d   :  { %6188 = vst [vmem:[#allocation120_spill] sm:$0xff] %v4968_v25  ;;  %v2143_v58 = vmul.f32 %v4941_v42, %v2142_v45  ;;  %v2129_v25 = vadd.f32 %v4906_v62, %v2128_v23  ;;  %vm1890_vm11 = vweird.f32 %v4944_v51  ;;  %v1894_v16 = vand.u32 2147483647, %v4944_v51 }
 0x27e   :  { %6189 = vst [vmem:[#allocation121_spill] sm:$0xff] %v4970_v28  ;;  %v4992_v28 = vpop.eup %2936  ;;  %2946 = vrcp.f32 %v5017_v49  ;;  %v1874_v60 = vadd.f32 %v4931_v2, %v1873_v22  ;;  %vm5037_vm10 = vcmp.eq.f32.partialorder %v2149_v54, 8.507059e+37  ;;  %v2164_v15 = vand.u32 2147483647, %v4952_v21 }
 0x27f   :  { %6190 = vst [vmem:[#allocation122_spill] sm:$0xff] %v4972_v38  ;;  %v4998_v26 = vpop.eup %2938  ;;  %v1886_v24 = vmul.f32 %v4992_v28, %v4944_v51  ;;  %vm1891_vm13 = vweird.f32 %v4992_v28  ;;  %v2167_v54 = vor.u32 1.1754944e-38, %v2166_v50  ;;  %v2144_v38 = vadd.f32 %v4941_v42, %v2143_v58 }
 0x280   :  { %6191 = vst [vmem:[#allocation123_spill] sm:$0xff] %v4975_v55  ;;  %v2156_v14 = vmul.f32 %v4998_v26, %v4952_v21  ;;  %v1896_v55 = vand.u32 2147483648, %v4944_v51  ;;  %v5031_v17 = vpop.eup %2940  ;;  %vm2146_vm5 = vweird.f32 %v4941_v42  ;;  %vm5063_vm14 = vcmp.eq.f32.partialorder %v1894_v16, 8.507059e+37  ;;  %vm5086_vm8 = vmor %vm1890_vm11, %vm1891_vm13  ;;  %v6212_v51 = vld [vmem:[#allocation11_spill] sm:$0xff] }
 0x281   :  { %v1887_v39 = vsub.f32 1.0, %v1886_v24  ;;  %v2421_v24 = vand.u32 2147483648, %v4946_v19  ;;  %v5052_v22 = vpop.eup %2942  ;;  %vm2135_vm12 = vcmp.eq.f32.partialorder %v2134_v35, 8.507059e+37  ;;  %vm2161_vm6 = vweird.f32 %v4998_v26 }
 0x282   :  { %v2157_v44 = vsub.f32 1.0, %v2156_v14  ;;  %v5075_v58 = vpop.eup %2944  ;;  %v1878_v35 = vsel %vm5071_vm7, %v4931_v2, %v1874_v60  ;;  %vm5100_vm9 = vcmp.eq.f32.partialorder %v2164_v15, 8.507059e+37  ;;  %vm6207_vm11 = vweird.f32 %v4886_v6 }
 0x283   :  { %v1888_v20 = vmul.f32 %v4992_v28, %v1887_v39  ;;  %v1897_v39 = vor.u32 1.1754944e-38, %v1896_v55  ;;  %v2411_v55 = vmul.f32 %v5031_v17, %v4946_v19  ;;  %v5061_v36 = vor.u32 1.1754944e-38, %v2421_v24  ;;  %v5095_v24 = vpop.xlane.xlu1 %1289  ;;  %vm5108_vm13 = vmor %vm6207_vm11, %vm2146_vm5 }
 0x284   :  { %v2158_v45 = vmul.f32 %v4998_v26, %v2157_v44  ;;  %v1859_v60 = vadd.f32 %v4844_v10, %v4934_v0  ;;  %v5115_v50 = vpop.eup %2946  ;;  %v1776_v15 = vand.u32 2147483648, %v5011_v29  ;;  %v2148_v6 = vsel %vm5108_vm13, %v4941_v42, %v2144_v38 }
 0x285   :  { %v1889_v14 = vadd.f32 %v4992_v28, %v1888_v20  ;;  %v2133_v20 = vsel %vm5048_vm0, %v4906_v62, %v2129_v25  ;;  %6198 = vst [vmem:[#allocation124_spill] sm:$0xff] %v5061_v36  ;;  %vm1860_vm0 = vweird.f32 %v4708_v61  ;;  %v2426_v25 = vmul.f32 %v5052_v22, %v5002_v43  ;;  %v5080_v62 = vpop.xlane.xlu2 %1388 }
 0x286   :  { %v2159_v16 = vadd.f32 %v4998_v26, %v2158_v45  ;;  %v2138_v2 = vsel %vm2135_vm12, %v4980_v27, %v2133_v20  ;;  %v2412_v31 = vsub.f32 1.0, %v2411_v55  ;;  %v1766_v36 = vmul.f32 %v5075_v58, %v5011_v29  ;;  %v5140_v55 = vpop.xlane.xlu0 %1385 }
 0x287   :  { %v1893_v44 = vsel %vm5086_vm8, %v4992_v28, %v1889_v14  ;;  %v2434_v28 = vand.u32 2147483647, %v5002_v43  ;;  %v2436_v14 = vand.u32 2147483648, %v5002_v43  ;;  %2948 = vrcp.f32 %v5080_v62 }
 0x288   :  { %vm6210_vm5 = vweird.f32 %v4952_v21  ;;  %v1883_v0 = vsel %vm5022_vm15, %v4990_v52, %v1878_v35  ;;  %v2427_v27 = vsub.f32 1.0, %v2426_v25  ;;  %2950 = vrcp.f32 %v5095_v24  ;;  %v6211_v25 = vld [vmem:[#allocation17_spill] sm:$0xff] }
 0x289   :  { %vm2162_vm8 = vmor %vm6210_vm5, %vm2161_vm6  ;;  %v1898_v42 = vsel %vm5063_vm14, %v1897_v39, %v1893_v44  ;;  %vm1845_vm12 = vweird.f32 %v4710_v11  ;;  %v2276_v20 = vmul.f32 %v5115_v50, %v5017_v49  ;;  %v2153_v52 = vsel %vm5037_vm10, %v4988_v63, %v2148_v6 }
 0x28a   :  { %v2163_v38 = vsel %vm2162_vm8, %v4998_v26, %v2159_v16  ;;  %v2467_v21 = vmul.f32 %v4119_v5, %v1898_v42  ;;  %vm2115_vm15 = vweird.f32 %v4837_v53  ;;  %v2286_v26 = vand.u32 2147483648, %v5017_v49 }
 0x28b   :  { %v2168_v34 = vsel %vm5100_vm9, %v2167_v54, %v2163_v38  ;;  %v1986_v39 = vand.u32 2147483648, %v5080_v62  ;;  %v2466_v16 = vmul.f32 %v6211_v25, %v1883_v0  ;;  %v1767_v35 = vsub.f32 1.0, %v1766_v36  ;;  %v6216_v25 = vld [vmem:[#allocation29_spill] sm:$0xff] }
 0x28c   :  { %v2485_v32 = vmul.f32 %v4117_v47, %v2168_v34  ;;  %v1491_v5 = vand.u32 2147483648, %v5095_v24  ;;  %2529 = vmatpush.msra.mxu1 %v2467_v21  ;;  %vm1861_vm14 = vweird.f32 %v4844_v10  ;;  %v1864_v54 = vand.u32 2147483647, %v4708_v61 }
 0x28d   :  { %v5156_v23 = vor.u32 1.1754944e-38, %v1776_v15  ;;  %v2428_v63 = vmul.f32 %v5052_v22, %v2427_v27  ;;  %v1971_v44 = vand.u32 2147483648, %v5140_v55  ;;  %v2484_v45 = vmul.f32 %v6212_v51, %v2153_v52  ;;  %v5161_v47 = vpop.eup %2948  ;;  %vm5172_vm7 = vmor %vm1860_vm0, %vm1861_vm14 }
 0x28e   :  { %2547 = vmatpush.msra.mxu2 %v2485_v32  ;;  %vm1830_vm10 = vweird.f32 %v4701_v18  ;;  %v5165_v36 = vmul.f32 %v5031_v17, %v2412_v31  ;;  %v5167_v6 = vor.u32 1.1754944e-38, %v2436_v14  ;;  %v2277_v0 = vsub.f32 1.0, %v2276_v20  ;;  %2530 = vmatpush.msra.mxu1 %v2466_v16  ;;  %v5176_v27 = vpop.eup %2950  ;;  %v6215_v31 = vld [vmem:[#allocation34_spill] sm:$0xff]  ;;  %v5212_v32 = vpop.xlane.xlu1 %1445 }
 0x28f   :  { %2952 = vrcp.f32 %v5140_v55  ;;  %v5178_v42 = vor.u32 1.1754944e-38, %v2286_v26  ;;  %v5180_v38 = vor.u32 1.1754944e-38, %v1986_v39  ;;  %v2483_v14 = vmul.f32 %v6215_v31, %v2138_v2  ;;  %v5231_v51 = vpop.xlane.xlu0 %1442 }
 0x290   :  { %2548 = vmatpush.msra.mxu2 %v2484_v45  ;;  %v1863_v20 = vsel %vm5172_vm7, %v4844_v10, %v1859_v60  ;;  %v5187_v21 = vmul.f32 %v5075_v58, %v1767_v35  ;;  %v5189_v61 = vor.u32 1.1754944e-38, %v1491_v5  ;;  %vm1865_vm0 = vcmp.eq.f32.partialorder %v1864_v54, 8.507059e+37  ;;  %v5201_v10 = vpop.xlane.xlu2 %1343 }
 0x291   :  { %v1844_v34 = vadd.f32 %v4858_v37, %v4958_v13  ;;  %vm2100_vm6 = vweird.f32 %v4814_v41  ;;  %v5195_v52 = vadd.f32 %v5052_v22, %v2428_v63  ;;  %v1976_v2 = vmul.f32 %v5161_v47, %v5080_v62 }
 0x292   :  { %v5199_v26 = vor.u32 1.1754944e-38, %v1971_v44  ;;  %2549 = vmatpush.msra.mxu2 %v2483_v14  ;;  %v1868_v60 = vsel %vm1865_vm0, %v4895_v46, %v1863_v20  ;;  %vm1815_vm9 = vweird.f32 %v4605_v4  ;;  %v5206_v39 = vmul.f32 %v5115_v50, %v2277_v0  ;;  %v6220_v14 = vld [vmem:[#allocation21_spill] sm:$0xff] }
 0x293   :  { %v5210_v13 = vmul.f32 %v5176_v27, %v5095_v24  ;;  %v2465_v16 = vmul.f32 %v6216_v25, %v1868_v60  ;;  %vm1846_vm11 = vweird.f32 %v4858_v37  ;;  %v1849_v46 = vand.u32 2147483647, %v4710_v11 }
 0x294   :  { %vm5218_vm13 = vmor %vm1845_vm12, %vm1846_vm11  ;;  %v2114_v5 = vadd.f32 %v4898_v57, %v4983_v30  ;;  %vm2116_vm5 = vweird.f32 %v4898_v57  ;;  %v2119_v54 = vand.u32 2147483647, %v4837_v53  ;;  %2954 = vrcp.f32 %v5201_v10 }
 0x295   :  { %v5227_v63 = vpop.eup %2952  ;;  %v1761_v44 = vand.u32 2147483648, %v5201_v10  ;;  %2531 = vmatpush.msra.mxu1 %v2465_v16  ;;  %v1848_v11 = vsel %vm5218_vm13, %v4858_v37, %v1844_v34  ;;  %vm2117_vm8 = vmor %vm2115_vm15, %vm2116_vm5  ;;  %v1829_v30 = vadd.f32 %v4826_v33, %v4923_v56  ;;  %vm2085_vm12 = vweird.f32 %v4671_v7  ;;  %v6219_v56 = vld [vmem:[#allocation30_spill] sm:$0xff] }
 0x296   :  { %v1977_v45 = vsub.f32 1.0, %v1976_v2  ;;  %vm1850_vm14 = vcmp.eq.f32.partialorder %v1849_v46, 8.507059e+37  ;;  %v2118_v0 = vsel %vm2117_vm8, %v4898_v57, %v2114_v5  ;;  %vm2120_vm7 = vcmp.eq.f32.partialorder %v2119_v54, 8.507059e+37 }
 0x297   :  { %2956 = vrcp.f32 %v5212_v32  ;;  %v1853_v15 = vsel %vm1850_vm14, %v4903_v9, %v1848_v11  ;;  %v2123_v31 = vsel %vm2120_vm7, %v4977_v3, %v2118_v0  ;;  %vm1831_vm0 = vweird.f32 %v4826_v33  ;;  %v6227_v0 = vld [vmem:[#allocation115_spill] sm:$0xff] }
 0x298   :  { %v5248_v53 = vmul.f32 %v5227_v63, %v5140_v55  ;;  %2958 = vrcp.f32 %v5231_v51  ;;  %v2464_v37 = vmul.f32 %v6219_v56, %v1853_v15  ;;  %v2482_v20 = vmul.f32 %v6220_v14, %v2123_v31  ;;  %vm5255_vm15 = vmor %vm1830_vm10, %vm1831_vm0  ;;  %v6228_v15 = vld [vmem:[#allocation95_spill] sm:$0xff]  ;;  %v5296_v56 = vpop.xlane.xlu1 %1337 }
 0x299   :  { %v1482_v9 = vsub.f32 1.0, %v5210_v13  ;;  %v1833_v3 = vsel %vm5255_vm15, %v4826_v33, %v1829_v30  ;;  %v1834_v34 = vand.u32 2147483647, %v4701_v18  ;;  %v2099_v2 = vadd.f32 %v4889_v1, %v4986_v12  ;;  %v6223_v12 = vld [vmem:[#allocation114_spill] sm:$0xff] }
 0x29a   :  { %vm1800_vm11 = vweird.f32 %v4607_v40  ;;  %v2271_v60 = vand.u32 2147483648, %v5212_v32  ;;  %v5268_v25 = vor.u32 1.1754944e-38, %v1761_v44  ;;  %2532 = vmatpush.msra.mxu1 %v2464_v37  ;;  %2550 = vmatpush.msra.mxu2 %v2482_v20  ;;  %vm2101_vm10 = vweird.f32 %v4889_v1  ;;  %v5272_v35 = vpop.eup %2954  ;;  %v6226_v30 = vld [vmem:[#allocation122_spill] sm:$0xff]  ;;  %v6229_v37 = vld [vmem:[#allocation31_spill] sm:$0xff] }
 0x29b   :  { %v2104_v16 = vand.u32 2147483647, %v4814_v41  ;;  %vm2070_vm13 = vweird.f32 %v4669_v8  ;;  %v5276_v18 = vmul.f32 %v5161_v47, %v1977_v45  ;;  %vm1835_vm5 = vcmp.eq.f32.partialorder %v1834_v34, 8.507059e+37  ;;  %vm2102_vm8 = vmor %vm2100_vm6, %vm2101_vm10  ;;  %v6225_v41 = vld [vmem:[#allocation55_spill] sm:$0xff]  ;;  %v6230_v20 = vld [vmem:[#allocation94_spill] sm:$0xff] }
 0x29c   :  { %v1814_v33 = vadd.f32 %v4728_v59, %v4829_v48  ;;  %vm1816_vm14 = vweird.f32 %v4728_v59  ;;  %v1838_v46 = vsel %vm1835_vm5, %v6223_v12, %v1833_v3  ;;  %v2103_v5 = vsel %vm2102_vm8, %v4889_v1, %v2099_v2  ;;  %v5304_v3 = vpop.xlane.xlu2 %1340  ;;  %v6232_v12 = vld [vmem:[#allocation63_spill] sm:$0xff] }
 0x29d   :  { %vm2105_vm7 = vcmp.eq.f32.partialorder %v2104_v16, 8.507059e+37  ;;  %vm1817_vm0 = vmor %vm1815_vm9, %vm1816_vm14  ;;  %v6224_v54 = vand.u32 2147483647, %v4605_v4  ;;  %v5289_v44 = vpop.eup %2956  ;;  %v2463_v11 = vmul.f32 %v6225_v41, %v1838_v46  ;;  %v2084_v31 = vadd.f32 %v6228_v15, %v6227_v0  ;;  %v6231_v16 = vld [vmem:[#allocation47_spill] sm:$0xff]  ;;  %v6237_v0 = vld [vmem:[#allocation54_spill] sm:$0xff] }
 0x29e   :  { %v2108_v45 = vsel %vm2105_vm7, %v6226_v30, %v2103_v5  ;;  %v1818_v48 = vsel %vm1817_vm0, %v4728_v59, %v1814_v33  ;;  %v5298_v1 = vpop.eup %2958  ;;  %vm2086_vm6 = vweird.f32 %v6228_v15  ;;  %v2089_v57 = vand.u32 2147483647, %v4671_v7  ;;  %v6234_v7 = vld [vmem:[#allocation111_spill] sm:$0xff]  ;;  %v6235_v30 = vld [vmem:[#allocation101_spill] sm:$0xff] }
 0x29f   :  { %vm1820_vm15 = vcmp.eq.f32.partialorder %v6224_v54, 8.507059e+37  ;;  %v2481_v14 = vmul.f32 %v6229_v37, %v2108_v45  ;;  %v1962_v34 = vsub.f32 1.0, %v5248_v53  ;;  %v1751_v59 = vmul.f32 %v5272_v35, %v5201_v10  ;;  %2533 = vmatpush.msra.mxu1 %v2463_v11  ;;  %vm2087_vm9 = vmor %vm2085_vm12, %vm2086_vm6  ;;  %v5318_v53 = vpop.xlane.xlu0 %1436  ;;  %v6233_v54 = vld [vmem:[#allocation67_spill] sm:$0xff]  ;;  %v6236_v45 = vld [vmem:[#allocation76_spill] sm:$0xff] }
 0x2a0   :  { %v1823_v4 = vsel %vm1820_vm15, %v6230_v20, %v1818_v48  ;;  %v2256_v2 = vand.u32 2147483648, %v5231_v51  ;;  %vm1785_vm10 = vweird.f32 %v6232_v12  ;;  %v2261_v46 = vmul.f32 %v5289_v44, %v5212_v32  ;;  %v6238_v37 = vld [vmem:[#allocation113_spill] sm:$0xff] }
 0x2a1   :  { %v2462_v33 = vmul.f32 %v6231_v16, %v1823_v4  ;;  %2551 = vmatpush.msra.mxu2 %v2481_v14  ;;  %v2088_v5 = vsel %vm2087_vm9, %v6228_v15, %v2084_v31  ;;  %vm2090_vm5 = vcmp.eq.f32.partialorder %v2089_v57, 8.507059e+37  ;;  %2960 = vrcp.f32 %v5296_v56  ;;  %v6239_v14 = vld [vmem:[#allocation92_spill] sm:$0xff] }
 0x2a2   :  { %vm2055_vm8 = vweird.f32 %v6233_v54  ;;  %v2246_v41 = vmul.f32 %v5298_v1, %v5231_v51  ;;  %v2093_v11 = vsel %vm2090_vm5, %v6234_v7, %v2088_v5  ;;  %2962 = vrcp.f32 %v5304_v3 }
 0x2a3   :  { %2534 = vmatpush.msra.mxu1 %v2462_v33  ;;  %v1799_v48 = vadd.f32 %v6236_v45, %v6235_v30  ;;  %v2480_v15 = vmul.f32 %v6237_v0, %v2093_v11  ;;  %vm1801_vm12 = vweird.f32 %v6236_v45  ;;  %v1804_v31 = vand.u32 2147483647, %v4607_v40  ;;  %v6243_v0 = vld [vmem:[#allocation62_spill] sm:$0xff] }
 0x2a4   :  { %v2069_v20 = vadd.f32 %v6239_v14, %v6238_v37  ;;  %v1752_v4 = vsub.f32 1.0, %v1751_v59  ;;  %vm1802_vm14 = vmor %vm1800_vm11, %vm1801_vm12  ;;  %vm2071_vm7 = vweird.f32 %v6239_v14  ;;  %v2074_v57 = vand.u32 2147483647, %v4669_v8  ;;  %v6240_v59 = vld [vmem:[#allocation96_spill] sm:$0xff]  ;;  %v6245_v37 = vld [vmem:[#allocation53_spill] sm:$0xff] }
 0x2a5   :  { %2964 = vrcp.f32 %v5318_v53  ;;  %v1483_v16 = vmul.f32 %v5176_v27, %v1482_v9  ;;  %vm1485_vm0 = vweird.f32 %v5095_v24  ;;  %v2262_v33 = vsub.f32 1.0, %v2261_v46  ;;  %2552 = vmatpush.msra.mxu2 %v2480_v15  ;;  %vm2072_vm11 = vmor %vm2070_vm13, %vm2071_vm7  ;;  %v6241_v8 = vld [vmem:[#allocation48_spill] sm:$0xff] }
 0x2a6   :  { %v1803_v5 = vsel %vm1802_vm14, %v6236_v45, %v1799_v48  ;;  %vm1805_vm15 = vcmp.eq.f32.partialorder %v1804_v31, 8.507059e+37  ;;  %v2247_v40 = vsub.f32 1.0, %v2246_v41  ;;  %v2073_v11 = vsel %vm2072_vm11, %v6239_v14, %v2069_v20  ;;  %v6242_v41 = vld [vmem:[#allocation109_spill] sm:$0xff]  ;;  %v6246_v14 = vld [vmem:[#allocation99_spill] sm:$0xff] }
 0x2a7   :  { %v1808_v7 = vsel %vm1805_vm15, %v6240_v59, %v1803_v5  ;;  %vm2075_vm6 = vcmp.eq.f32.partialorder %v2074_v57, 8.507059e+37  ;;  %v5346_v30 = vpop.eup %2960  ;;  %vm1770_vm9 = vweird.f32 %v5011_v29  ;;  %v5351_v13 = vmul.f32 %v5227_v63, %v1962_v34  ;;  %v6247_v20 = vld [vmem:[#allocation73_spill] sm:$0xff]  ;;  %v6248_v59 = vld [vmem:[#allocation116_spill] sm:$0xff] }
 0x2a8   :  { %v5355_v9 = vor.u32 1.1754944e-38, %v2271_v60  ;;  %v2461_v46 = vmul.f32 %v6241_v8, %v1808_v7  ;;  %v2078_v45 = vsel %vm2075_vm6, %v6242_v41, %v2073_v11  ;;  %v5359_v48 = vpop.eup %2962  ;;  %vm2040_vm13 = vweird.f32 %v6243_v0  ;;  %v6258_v8 = vld [vmem:[#allocation52_spill] sm:$0xff]  ;;  %v5482_v41 = vpop.xlane.xlu2 %1439 }
 0x2a9   :  { %v5363_v15 = vmul.f32 %v5272_v35, %v1752_v4  ;;  %v5365_v31 = vor.u32 1.1754944e-38, %v2256_v2  ;;  %v2479_v34 = vmul.f32 %v6245_v37, %v2078_v45  ;;  %v1784_v57 = vadd.f32 %v6247_v20, %v6246_v14  ;;  %v6249_v4 = vld [vmem:[#allocation98_spill] sm:$0xff] }
 0x2aa   :  { %v5372_v60 = vmul.f32 %v5289_v44, %v2262_v33  ;;  %2535 = vmatpush.msra.mxu1 %v2461_v46  ;;  %vm1786_vm14 = vweird.f32 %v6247_v20  ;;  %v1789_v5 = vand.u32 2147483647, %v6232_v12  ;;  %v2054_v7 = vadd.f32 %v6249_v4, %v6248_v59  ;;  %v6256_v59 = vld [vmem:[#allocation112_spill] sm:$0xff] }
 0x2ab   :  { %6244 = vst [vmem:[#allocation17_spill] sm:$0xff] %v5365_v31  ;;  %v5378_v2 = vpop.eup %2964  ;;  %v5381_v11 = vmul.f32 %v5298_v1, %v2247_v40  ;;  %2553 = vmatpush.msra.mxu2 %v2479_v34  ;;  %vm5386_vm7 = vmor %vm1785_vm10, %vm1786_vm14  ;;  %vm2056_vm15 = vweird.f32 %v6249_v4  ;;  %v2059_v46 = vand.u32 2147483647, %v6233_v54  ;;  %vm5394_vm11 = vcmp.eq.f32.partialorder %v2434_v28, 8.507059e+37  ;;  %v6254_v34 = vld [vmem:[#allocation60_spill] sm:$0xff] }
 0x2ac   :  { %v5400_v40 = vmul.f32 %v5346_v30, %v5296_v56  ;;  %v1788_v45 = vsel %vm5386_vm7, %v6247_v20, %v1784_v57  ;;  %vm2057_vm10 = vmor %vm2055_vm8, %vm2056_vm15  ;;  %v1484_v37 = vadd.f32 %v5176_v27, %v1483_v16  ;;  %vm2025_vm6 = vweird.f32 %v6254_v34  ;;  %v6255_v57 = vld [vmem:[#allocation97_spill] sm:$0xff]  ;;  %v6257_v16 = vld [vmem:[#allocation46_spill] sm:$0xff] }
 0x2ad   :  { %v5412_v28 = vmul.f32 %v5359_v48, %v5304_v3  ;;  %vm1790_vm14 = vcmp.eq.f32.partialorder %v1789_v5, 8.507059e+37  ;;  %v2058_v14 = vsel %vm2057_vm10, %v6249_v4, %v2054_v7  ;;  %vm2060_vm12 = vcmp.eq.f32.partialorder %v2059_v46, 8.507059e+37  ;;  %v6270_v5 = vld [vmem:[#allocation89_spill] sm:$0xff] }
 0x2ae   :  { %v2216_v20 = vmul.f32 %v5378_v2, %v5318_v53  ;;  %v1793_v54 = vsel %vm1790_vm14, %v6255_v57, %v1788_v45  ;;  %v2063_v33 = vsel %vm2060_vm12, %v6256_v59, %v2058_v14  ;;  %vm1486_vm8 = vweird.f32 %v5176_v27  ;;  %v6262_v14 = vld [vmem:[#allocation39_spill] sm:$0xff] }
 0x2af   :  { %v2460_v12 = vmul.f32 %v6257_v16, %v1793_v54  ;;  %v2478_v31 = vmul.f32 %v6258_v8, %v2063_v33  ;;  %vm5425_vm7 = vmor %vm1485_vm0, %vm1486_vm8  ;;  %v1489_v4 = vand.u32 2147483647, %v5095_v24  ;;  %v1769_v7 = vadd.f32 %v5075_v58, %v5187_v21  ;;  %v6261_v24 = vld [vmem:[#allocation93_spill] sm:$0xff] }
 0x2b0   :  { %v1722_v46 = vsub.f32 1.0, %v5400_v40  ;;  %v1488_v45 = vsel %vm5425_vm7, %v5176_v27, %v1484_v37  ;;  %vm1771_vm12 = vweird.f32 %v5075_v58  ;;  %v1774_v8 = vand.u32 2147483647, %v5011_v29  ;;  %v6266_v29 = vld [vmem:[#allocation20_spill] sm:$0xff] }
 0x2b1   :  { %2536 = vmatpush.msra.mxu1 %v2460_v12  ;;  %2554 = vmatpush.msra.mxu2 %v2478_v31  ;;  %vm1490_vm0 = vcmp.eq.f32.partialorder %v1489_v4, 8.507059e+37  ;;  %vm1772_vm15 = vmor %vm1770_vm9, %vm1771_vm12  ;;  %v2039_v57 = vadd.f32 %v6262_v14, %v6261_v24  ;;  %vm2041_vm10 = vweird.f32 %v6262_v14  ;;  %v2044_v21 = vand.u32 2147483647, %v6243_v0  ;;  %v6263_v31 = vld [vmem:[#allocation61_spill] sm:$0xff]  ;;  %v6269_v0 = vld [vmem:[#allocation86_spill] sm:$0xff] }
 0x2b2   :  { %v2217_v40 = vsub.f32 1.0, %v2216_v20  ;;  %v1493_v27 = vsel %vm1490_vm0, %v5189_v61, %v1488_v45  ;;  %v1773_v37 = vsel %vm1772_vm15, %v5075_v58, %v1769_v7  ;;  %vm1775_vm14 = vcmp.eq.f32.partialorder %v1774_v8, 8.507059e+37  ;;  %vm2042_vm8 = vmor %vm2040_vm13, %vm2041_vm10  ;;  %v6267_v61 = vld [vmem:[#allocation83_spill] sm:$0xff]  ;;  %v6268_v58 = vld [vmem:[#allocation58_spill] sm:$0xff]  ;;  %v5463_v7 = vpop.xlane.xlu1 %1433 }
 0x2b3   :  { %vm2010_vm7 = vweird.f32 %v6263_v31  ;;  %vm6264_vm9 = vweird.f32 %v5052_v22  ;;  %vm6265_vm12 = vweird.f32 %v5002_v43  ;;  %v2440_v12 = vmul.f32 %v6266_v29, %v1493_v27  ;;  %v6271_v4 = vld [vmem:[#allocation71_spill] sm:$0xff]  ;;  %v6272_v45 = vld [vmem:[#allocation45_spill] sm:$0xff] }
 0x2b4   :  { %vm2432_vm5 = vmor %vm6265_vm12, %vm6264_vm9  ;;  %v1778_v54 = vsel %vm1775_vm14, %v5156_v23, %v1773_v37  ;;  %v2043_v20 = vsel %vm2042_vm8, %v6262_v14, %v2039_v57  ;;  %vm2045_vm0 = vcmp.eq.f32.partialorder %v2044_v21, 8.507059e+37  ;;  %vm2400_vm15 = vweird.f32 %v6267_v61  ;;  %v6273_v14 = vld [vmem:[#allocation57_spill] sm:$0xff]  ;;  %v6278_v37 = vld [vmem:[#allocation32_spill] sm:$0xff] }
 0x2b5   :  { %v2459_v59 = vmul.f32 %v6268_v58, %v1778_v54  ;;  %v2048_v33 = vsel %vm2045_vm0, %v6269_v0, %v2043_v20  ;;  %v2433_v16 = vsel %vm2432_vm5, %v5052_v22, %v5195_v52  ;;  %v2024_v43 = vadd.f32 %v6271_v4, %v6270_v5  ;;  %2520 = vmatpush.msra.mxu0 %v2440_v12  ;;  %v6280_v12 = vld [vmem:[#allocation80_spill] sm:$0xff]  ;;  %v6292_v27 = vld [vmem:[#allocation107_spill] sm:$0xff] }
 0x2b6   :  { %v2477_v23 = vmul.f32 %v6272_v45, %v2048_v33  ;;  %v2438_v8 = vsel %vm5394_vm11, %v5167_v6, %v2433_v16  ;;  %vm2026_vm13 = vweird.f32 %v6271_v4  ;;  %v2029_v24 = vand.u32 2147483647, %v6254_v34  ;;  %v6283_v33 = vld [vmem:[#allocation124_spill] sm:$0xff] }
 0x2b7   :  { %2537 = vmatpush.msra.mxu1 %v2459_v59  ;;  %v2503_v57 = vmul.f32 %v6273_v14, %v2438_v8  ;;  %vm5474_vm5 = vmor %vm2025_vm6, %vm2026_vm13  ;;  %v2414_v52 = vadd.f32 %v5031_v17, %v5165_v36  ;;  %vm2416_vm10 = vweird.f32 %v5031_v17  ;;  %v2419_v6 = vand.u32 2147483647, %v4946_v19  ;;  %v6282_v59 = vld [vmem:[#allocation43_spill] sm:$0xff]  ;;  %v6286_v45 = vld [vmem:[#allocation84_spill] sm:$0xff] }
 0x2b8   :  { %v6276_v21 = vmov 1.0   ;;  %vm1995_vm11 = vweird.f32 %v6278_v37  ;;  %v1737_v34 = vsub.f32 1.0, %v5412_v28  ;;  %2555 = vmatpush.msra.mxu2 %v2477_v23  ;;  %v2028_v29 = vsel %vm5474_vm5, %v6271_v4, %v2024_v43  ;;  %v6288_v14 = vld [vmem:[#allocation72_spill] sm:$0xff] }
 0x2b9   :  { %2669 = vmatmul.msk.f32.vlgmr.msra.gmra.mxu0 %vm3306_vm3, %v6276_v21  ;;  %vm2030_vm6 = vcmp.eq.f32.partialorder %v2029_v24, 8.507059e+37  ;;  %vm6279_vm14 = vweird.f32 %v4946_v19  ;;  %2966 = vrcp.f32 %v5463_v7  ;;  %v2218_v36 = vmul.f32 %v5378_v2, %v2217_v40  ;;  %v6287_v24 = vld [vmem:[#allocation91_spill] sm:$0xff] }
 0x2ba   :  { %vm2417_vm8 = vmor %vm6279_vm14, %vm2416_vm10  ;;  %2565 = vmatpush.msrb.mxu0 %v2503_v57  ;;  %v2033_v54 = vsel %vm2030_vm6, %v6280_v12, %v2028_v29  ;;  %vm2420_vm3 = vcmp.eq.f32.partialorder %v2419_v6, 8.507059e+37  ;;  %v6281_v28 = vand.u32 2147483648, %v5296_v56  ;;  %2968 = vrcp.f32 %v5482_v41  ;;  %v6291_v6 = vld [vmem:[#allocation119_spill] sm:$0xff] }
 0x2bb   :  { %v2418_v20 = vsel %vm2417_vm8, %v5031_v17, %v2414_v52  ;;  %v2476_v0 = vmul.f32 %v6282_v59, %v2033_v54  ;;  %v6284_v19 = vand.u32 2147483648, %v5304_v3  ;;  %v2226_v4 = vand.u32 2147483648, %v5318_v53  ;;  %v6285_v17 = vld [vmem:[#allocation27_spill] sm:$0xff] }
 0x2bc   :  { %v5500_v58 = vor.u32 1.1754944e-38, %v6281_v28  ;;  %v2423_v16 = vsel %vm2420_vm3, %v6283_v33, %v2418_v20  ;;  %vm2385_vm9 = vweird.f32 %v6286_v45  ;;  %v5514_v23 = vmul.f32 %v5346_v30, %v1722_v46  ;;  %v6295_v20 = vld [vmem:[#allocation74_spill] sm:$0xff]  ;;  %v6296_v28 = vld [vmem:[#allocation68_spill] sm:$0xff]  ;;  %v6301_v54 = vld [vmem:[#allocation123_spill] sm:$0xff] }
 0x2bd   :  { %v5507_v5 = vor.u32 1.1754944e-38, %v6284_v19  ;;  %v2502_v43 = vmul.f32 %v6285_v17, %v2423_v16  ;;  %v5517_v8 = vmul.f32 %v5359_v48, %v1737_v34  ;;  %2556 = vmatpush.msra.mxu2 %v2476_v0  ;;  %v2009_v57 = vadd.f32 %v6288_v14, %v6287_v24  ;;  %v6303_v33 = vld [vmem:[#allocation13_spill] sm:$0xff] }
 0x2be   :  { %vm2011_vm12 = vweird.f32 %v6288_v14  ;;  %vm1755_vm0 = vweird.f32 %v5201_v10  ;;  %v5524_v22 = vadd.f32 %v5378_v2, %v2218_v36  ;;  %v2014_v52 = vand.u32 2147483647, %v6263_v31 }
 0x2bf   :  { %2566 = vmatpush.msrb.mxu0 %v2502_v43  ;;  %vm5528_vm13 = vmor %vm2010_vm7, %vm2011_vm12  ;;  %v2399_v34 = vadd.f32 %v6292_v27, %v6291_v6  ;;  %vm2401_vm5 = vweird.f32 %v6292_v27  ;;  %v5536_v29 = vpop.eup %2966  ;;  %vm1980_vm10 = vweird.f32 %v5080_v62  ;;  %v2404_v31 = vand.u32 2147483647, %v6267_v61  ;;  %v6297_v43 = vld [vmem:[#allocation87_spill] sm:$0xff] }
 0x2c0   :  { %v2013_v12 = vsel %vm5528_vm13, %v6288_v14, %v2009_v57  ;;  %vm5545_vm7 = vmor %vm2400_vm15, %vm2401_vm5  ;;  %v1994_v59 = vadd.f32 %v6296_v28, %v6295_v20  ;;  %v2201_v0 = vmul.f32 %v5536_v29, %v5463_v7  ;;  %vm2015_vm6 = vcmp.eq.f32.partialorder %v2014_v52, 8.507059e+37  ;;  %v5558_v19 = vpop.eup %2968  ;;  %v6298_v14 = vld [vmem:[#allocation81_spill] sm:$0xff]  ;;  %v6299_v52 = vld [vmem:[#allocation44_spill] sm:$0xff] }
 0x2c1   :  { %v2403_v16 = vsel %vm5545_vm7, %v6292_v27, %v2399_v34  ;;  %v2239_v17 = vand.u32 2147483647, %v5482_v41  ;;  %v2018_v24 = vsel %vm2015_vm6, %v6297_v43, %v2013_v12  ;;  %vm1996_vm15 = vweird.f32 %v6296_v28  ;;  %v6300_v27 = vld [vmem:[#allocation117_spill] sm:$0xff]  ;;  %v6302_v20 = vld [vmem:[#allocation110_spill] sm:$0xff] }
 0x2c2   :  { %v1999_v61 = vand.u32 2147483647, %v6278_v37  ;;  %vm2370_vm14 = vweird.f32 %v6298_v14  ;;  %v2202_v57 = vsub.f32 1.0, %v2201_v0  ;;  %v2231_v46 = vmul.f32 %v5558_v19, %v5482_v41  ;;  %vm1997_vm3 = vmor %vm1995_vm11, %vm1996_vm15  ;;  %v6305_v37 = vld [vmem:[#allocation40_spill] sm:$0xff] }
 0x2c3   :  { %v2475_v6 = vmul.f32 %v6299_v52, %v2018_v24  ;;  %vm2405_vm8 = vcmp.eq.f32.partialorder %v2404_v31, 8.507059e+37  ;;  %vm1965_vm12 = vweird.f32 %v5140_v55  ;;  %v1998_v12 = vsel %vm1997_vm3, %v6296_v28, %v1994_v59  ;;  %v6304_v31 = vld [vmem:[#allocation75_spill] sm:$0xff]  ;;  %v6306_v59 = vld [vmem:[#allocation65_spill] sm:$0xff] }
 0x2c4   :  { %v2408_v34 = vsel %vm2405_vm8, %v6300_v27, %v2403_v16  ;;  %vm2000_vm13 = vcmp.eq.f32.partialorder %v1999_v61, 8.507059e+37  ;;  %v2384_v43 = vadd.f32 %v6302_v20, %v6301_v54  ;;  %v2232_v0 = vsub.f32 1.0, %v2231_v46  ;;  %v6312_v54 = vld [vmem:[#allocation33_spill] sm:$0xff] }
 0x2c5   :  { %v2241_v36 = vand.u32 2147483648, %v5482_v41  ;;  %2557 = vmatpush.msra.mxu2 %v2475_v6  ;;  %v2501_v24 = vmul.f32 %v6303_v33, %v2408_v34  ;;  %v2003_v52 = vsel %vm2000_vm13, %v6304_v31, %v1998_v12  ;;  %vm2386_vm11 = vweird.f32 %v6302_v20  ;;  %v6307_v6 = vld [vmem:[#allocation66_spill] sm:$0xff] }
 0x2c6   :  { %v2474_v40 = vmul.f32 %v6305_v37, %v2003_v52  ;;  %v2389_v16 = vand.u32 2147483647, %v6286_v45  ;;  %v1754_v28 = vadd.f32 %v5272_v35, %v5363_v15  ;;  %vm2355_vm5 = vweird.f32 %v6306_v59  ;;  %vm2387_vm7 = vmor %vm2385_vm9, %vm2386_vm11  ;;  %v6308_v45 = vld [vmem:[#allocation64_spill] sm:$0xff]  ;;  %v6309_v34 = vld [vmem:[#allocation118_spill] sm:$0xff] }
 0x2c7   :  { %v5585_v61 = vmul.f32 %v5536_v29, %v2202_v57  ;;  %v2233_v46 = vmul.f32 %v5558_v19, %v2232_v0  ;;  %2567 = vmatpush.msrb.mxu0 %v2501_v24  ;;  %vm1756_vm6 = vweird.f32 %v5272_v35  ;;  %v1759_v33 = vand.u32 2147483647, %v5201_v10  ;;  %v6313_v24 = vld [vmem:[#allocation59_spill] sm:$0xff]  ;;  %v6315_v52 = vld [vmem:[#allocation105_spill] sm:$0xff]  ;;  %v6321_v10 = vld [vmem:[#allocation28_spill] sm:$0xff] }
 0x2c8   :  { %vm2340_vm15 = vweird.f32 %v6307_v6  ;;  %2558 = vmatpush.msra.mxu2 %v2474_v40  ;;  %v2388_v15 = vsel %vm2387_vm7, %v6302_v20, %v2384_v43  ;;  %vm2390_vm8 = vcmp.eq.f32.partialorder %v2389_v16, 8.507059e+37  ;;  %vm1757_vm3 = vmor %vm1755_vm0, %vm1756_vm6  ;;  %v1979_v57 = vadd.f32 %v5161_v47, %v5276_v18 }
 0x2c9   :  { %vm1981_vm13 = vweird.f32 %v5161_v47  ;;  %vm2325_vm9 = vweird.f32 %v6308_v45  ;;  %v5601_v27 = vadd.f32 %v5558_v19, %v2233_v46  ;;  %v2393_v12 = vsel %vm2390_vm8, %v6309_v34, %v2388_v15  ;;  %v6320_v34 = vld [vmem:[#allocation121_spill] sm:$0xff] }
 0x2ca   :  { %v1758_v40 = vsel %vm1757_vm3, %v5272_v35, %v1754_v28  ;;  %vm1760_vm11 = vcmp.eq.f32.partialorder %v1759_v33, 8.507059e+37  ;;  %vm5607_vm7 = vmor %vm1980_vm10, %vm1981_vm13  ;;  %v2500_v18 = vmul.f32 %v6312_v54, %v2393_v12  ;;  %v1984_v0 = vand.u32 2147483647, %v5080_v62  ;;  %v6314_v35 = vld [vmem:[#allocation120_spill] sm:$0xff] }
 0x2cb   :  { %v1763_v20 = vsel %vm1760_vm11, %v5268_v25, %v1758_v40  ;;  %v1983_v43 = vsel %vm5607_vm7, %v5161_v47, %v1979_v57  ;;  %v2369_v37 = vadd.f32 %v6315_v52, %v6314_v35  ;;  %vm2371_vm0 = vweird.f32 %v6315_v52  ;;  %v6316_v25 = vld [vmem:[#allocation37_spill] sm:$0xff]  ;;  %v6318_v33 = vld [vmem:[#allocation88_spill] sm:$0xff]  ;;  %v6319_v57 = vld [vmem:[#allocation14_spill] sm:$0xff] }
 0x2cc   :  { %v2458_v31 = vmul.f32 %v6313_v24, %v1763_v20  ;;  %v2374_v16 = vand.u32 2147483647, %v6298_v14  ;;  %vm1740_vm10 = vweird.f32 %v5304_v3  ;;  %2568 = vmatpush.msrb.mxu0 %v2500_v18  ;;  %vm1985_vm6 = vcmp.eq.f32.partialorder %v1984_v0, 8.507059e+37  ;;  %vm2372_vm8 = vmor %vm2370_vm14, %vm2371_vm0  ;;  %v6317_v14 = vld [vmem:[#allocation106_spill] sm:$0xff]  ;;  %v6326_v35 = vld [vmem:[#allocation104_spill] sm:$0xff] }
 0x2cd   :  { %v1964_v47 = vadd.f32 %v5227_v63, %v5351_v13  ;;  %vm1966_vm3 = vweird.f32 %v5227_v63  ;;  %v1969_v62 = vand.u32 2147483647, %v5140_v55  ;;  %vm2310_vm13 = vweird.f32 %v6316_v25  ;;  %v6322_v18 = vld [vmem:[#allocation38_spill] sm:$0xff] }
 0x2ce   :  { %2538 = vmatpush.msra.mxu1 %v2458_v31  ;;  %v1988_v28 = vsel %vm1985_vm6, %v5180_v38, %v1983_v43  ;;  %v2373_v46 = vsel %vm2372_vm8, %v6315_v52, %v2369_v37  ;;  %vm2375_vm11 = vcmp.eq.f32.partialorder %v2374_v16, 8.507059e+37  ;;  %vm1967_vm7 = vmor %vm1965_vm12, %vm1966_vm3  ;;  %v2354_v15 = vadd.f32 %v6318_v33, %v6317_v14  ;;  %v6323_v43 = vld [vmem:[#allocation108_spill] sm:$0xff]  ;;  %v6324_v0 = vld [vmem:[#allocation90_spill] sm:$0xff] }
 0x2cf   :  { %v2473_v13 = vmul.f32 %v6319_v57, %v1988_v28  ;;  %v2378_v12 = vsel %vm2375_vm11, %v6320_v34, %v2373_v46  ;;  %v1968_v40 = vsel %vm1967_vm7, %v5227_v63, %v1964_v47  ;;  %vm1970_vm14 = vcmp.eq.f32.partialorder %v1969_v62, 8.507059e+37  ;;  %v6325_v31 = vld [vmem:[#allocation36_spill] sm:$0xff]  ;;  %v6327_v52 = vld [vmem:[#allocation85_spill] sm:$0xff]  ;;  %v6328_v37 = vld [vmem:[#allocation102_spill] sm:$0xff] }
 0x2d0   :  { %vm1725_vm0 = vweird.f32 %v5296_v56  ;;  %v2499_v38 = vmul.f32 %v6321_v10, %v2378_v12  ;;  %v1973_v54 = vsel %vm1970_vm14, %v5199_v26, %v1968_v40  ;;  %vm2356_vm6 = vweird.f32 %v6318_v33  ;;  %v6331_v28 = vld [vmem:[#allocation51_spill] sm:$0xff]  ;;  %v6334_v34 = vld [vmem:[#allocation49_spill] sm:$0xff]  ;;  %v6335_v40 = vld [vmem:[#allocation100_spill] sm:$0xff] }
 0x2d1   :  { %v2359_v55 = vand.u32 2147483647, %v6306_v59  ;;  %2559 = vmatpush.msra.mxu2 %v2473_v13  ;;  %v2472_v20 = vmul.f32 %v6322_v18, %v1973_v54  ;;  %vm2357_vm12 = vmor %vm2355_vm5, %vm2356_vm6  ;;  %v2339_v63 = vadd.f32 %v6324_v0, %v6323_v43  ;;  %vm2341_vm8 = vweird.f32 %v6324_v0  ;;  %v6332_v14 = vld [vmem:[#allocation103_spill] sm:$0xff]  ;;  %v6336_v10 = vld [vmem:[#allocation82_spill] sm:$0xff] }
 0x2d2   :  { %v2344_v24 = vand.u32 2147483647, %v6307_v6  ;;  %2569 = vmatpush.msrb.mxu0 %v2499_v38  ;;  %v2358_v26 = vsel %vm2357_vm12, %v6318_v33, %v2354_v15  ;;  %vm2342_vm7 = vmor %vm2340_vm15, %vm2341_vm8  ;;  %v2324_v59 = vadd.f32 %v6327_v52, %v6326_v35  ;;  %vm2326_vm5 = vweird.f32 %v6327_v52  ;;  %v6337_v38 = vld [vmem:[#allocation70_spill] sm:$0xff] }
 0x2d3   :  { %vm2360_vm11 = vcmp.eq.f32.partialorder %v2359_v55, 8.507059e+37  ;;  %vm2280_vm14 = vweird.f32 %v5017_v49  ;;  %vm2236_vm6 = vweird.f32 %v5558_v19  ;;  %2560 = vmatpush.msra.mxu2 %v2472_v20  ;;  %v2343_v47 = vsel %vm2342_vm7, %v6324_v0, %v2339_v63  ;;  %vm5664_vm12 = vmor %vm2325_vm9, %vm2326_vm5  ;;  %v6338_v18 = vld [vmem:[#allocation50_spill] sm:$0xff] }
 0x2d4   :  { %v2363_v16 = vsel %vm2360_vm11, %v6328_v37, %v2358_v26  ;;  %vm2345_vm3 = vcmp.eq.f32.partialorder %v2344_v24, 8.507059e+37  ;;  %v2329_v62 = vand.u32 2147483647, %v6308_v45  ;;  %v2328_v15 = vsel %vm5664_vm12, %v6327_v52, %v2324_v59  ;;  %2671 = vmatmul.msk.f32.vlgmr.msra.gmra.mxu2 %vm3301_vm2, %v6276_v21  ;;  %v6340_v26 = vld [vmem:[#allocation79_spill] sm:$0xff]  ;;  %v6343_v52 = vld [vmem:[#allocation78_spill] sm:$0xff]  ;;  %v6344_v59 = vld [vmem:[#allocation69_spill] sm:$0xff] }
 0x2d5   :  { %v2498_v46 = vmul.f32 %v6331_v28, %v2363_v16  ;;  %v2348_v33 = vsel %vm2345_vm3, %v6332_v14, %v2343_v47  ;;  %v1739_v57 = vadd.f32 %v5359_v48, %v5517_v8  ;;  %vm2235_vm15 = vweird.f32 %v5482_v41  ;;  %v6345_v37 = vld [vmem:[#allocation42_spill] sm:$0xff]  ;;  %v6361_v41 = vld [vmem:[#allocation16_spill] sm:$0xff] }
 0x2d6   :  { %v2497_v12 = vmul.f32 %v6334_v34, %v2348_v33  ;;  %vm2330_vm9 = vcmp.eq.f32.partialorder %v2329_v62, 8.507059e+37  ;;  %vm1741_vm8 = vweird.f32 %v5359_v48  ;;  %v1744_v45 = vand.u32 2147483647, %v5304_v3  ;;  %v6348_v33 = vld [vmem:[#allocation77_spill] sm:$0xff] }
 0x2d7   :  { %vm2265_vm3 = vweird.f32 %v5212_v32  ;;  %2570 = vmatpush.msrb.mxu0 %v2498_v46  ;;  %v2333_v8 = vsel %vm2330_vm9, %v6335_v40, %v2328_v15  ;;  %vm1742_vm7 = vmor %vm1740_vm10, %vm1741_vm8  ;;  %v2309_v54 = vadd.f32 %v6337_v38, %v6336_v10  ;;  %vm2311_vm2 = vweird.f32 %v6337_v38  ;;  %v6347_v46 = vld [vmem:[#allocation18_spill] sm:$0xff]  ;;  %v6359_v10 = vld [vmem:[#allocation17_spill] sm:$0xff] }
 0x2d8   :  { %v2314_v55 = vand.u32 2147483647, %v6316_v25  ;;  %v2496_v20 = vmul.f32 %v6338_v18, %v2333_v8  ;;  %v1743_v43 = vsel %vm1742_vm7, %v5359_v48, %v1739_v57  ;;  %vm1745_vm12 = vcmp.eq.f32.partialorder %v1744_v45, 8.507059e+37  ;;  %vm2312_vm9 = vmor %vm2310_vm13, %vm2311_vm2  ;;  %v6339_v48 = vld [vmem:[#allocation15_spill] sm:$0xff] }
 0x2d9   :  { %v1724_v3 = vadd.f32 %v5346_v30, %v5514_v23  ;;  %vm2220_vm10 = vweird.f32 %v5318_v53  ;;  %vm2206_vm8 = vweird.f32 %v5536_v29  ;;  %2571 = vmatpush.msrb.mxu0 %v2497_v12  ;;  %v1748_v0 = vsel %vm1745_vm12, %v5507_v5, %v1743_v43 }
 0x2da   :  { %v2313_v63 = vsel %vm2312_vm9, %v6337_v38, %v2309_v54  ;;  %vm2315_vm11 = vcmp.eq.f32.partialorder %v2314_v55, 8.507059e+37  ;;  %vm1726_vm5 = vweird.f32 %v5346_v30  ;;  %v2457_v24 = vmul.f32 %v6339_v48, %v1748_v0  ;;  %v6365_v0 = vld [vmem:[#allocation19_spill] sm:$0xff] }
 0x2db   :  { %v2318_v25 = vsel %vm2315_vm11, %v6340_v26, %v2313_v63  ;;  %vm5708_vm13 = vmor %vm1725_vm0, %vm1726_vm5  ;;  %v1729_v35 = vand.u32 2147483647, %v5296_v56  ;;  %v2294_v5 = vadd.f32 %v6344_v59, %v6343_v52  ;;  %vm2205_vm7 = vweird.f32 %v5463_v7  ;;  %2572 = vmatpush.msrb.mxu0 %v2496_v20  ;;  %v6364_v20 = vld [vmem:[#allocation12_spill] sm:$0xff]  ;;  %v6366_v63 = vld [vmem:[#allocation35_spill] sm:$0xff] }
 0x2dc   :  { %v2495_v16 = vmul.f32 %v6345_v37, %v2318_v25  ;;  %v1728_v47 = vsel %vm5708_vm13, %v5346_v30, %v1724_v3  ;;  %vm2296_vm11 = vweird.f32 %v6344_v59  ;;  %v2299_v6 = vand.u32 2147483647, %v6325_v31  ;;  %2539 = vmatpush.msra.mxu1 %v2457_v24 }
 0x2dd   :  { %vm1730_vm0 = vcmp.eq.f32.partialorder %v1729_v35, 8.507059e+37  ;;  %vm6346_vm2 = vweird.f32 %v6325_v31  ;;  %v2279_v56 = vadd.f32 %v5115_v50, %v5206_v39  ;;  %vm2281_vm12 = vweird.f32 %v5115_v50  ;;  %v2504_v35 = vld [vmem:[#allocation6] sm:$0xff] }
 0x2de   :  { %vm2297_vm5 = vmor %vm6346_vm2, %vm2296_vm11  ;;  %v2284_v62 = vand.u32 2147483647, %v5017_v49  ;;  %2573 = vmatpush.msrb.mxu0 %v2495_v16  ;;  %v1733_v28 = vsel %vm1730_vm0, %v5500_v58, %v1728_v47  ;;  %vm2300_vm9 = vcmp.eq.f32.partialorder %v2299_v6, 8.507059e+37  ;;  %v2264_v31 = vadd.f32 %v5289_v44, %v5372_v60  ;;  %v6351_v49 = vld [vmem:[#allocation41_spill] sm:$0xff] }
 0x2df   :  { %v2298_v30 = vsel %vm2297_vm5, %v6344_v59, %v2294_v5  ;;  %vm2282_vm13 = vmor %vm2280_vm14, %vm2281_vm12  ;;  %v2456_v14 = vmul.f32 %v6347_v46, %v1733_v28  ;;  %vm2266_vm14 = vweird.f32 %v5289_v44  ;;  %v2269_v60 = vand.u32 2147483647, %v5212_v32 }
 0x2e0   :  { %v2303_v39 = vsel %vm2300_vm9, %v6348_v33, %v2298_v30  ;;  %v2283_v15 = vsel %vm2282_vm13, %v5115_v50, %v2279_v56  ;;  %vm2285_vm11 = vcmp.eq.f32.partialorder %v2284_v62, 8.507059e+37  ;;  %vm5741_vm0 = vmor %vm2235_vm15, %vm2236_vm6  ;;  %v2204_v50 = vadd.f32 %v5536_v29, %v5585_v61 }
 0x2e1   :  { %v2494_v57 = vmul.f32 %v6351_v49, %v2303_v39  ;;  %v2288_v13 = vsel %vm2285_vm11, %v5178_v42, %v2283_v15  ;;  %2540 = vmatpush.msra.mxu1 %v2456_v14  ;;  %vm2267_vm2 = vmor %vm2265_vm3, %vm2266_vm14  ;;  %v2249_v34 = vadd.f32 %v5298_v1, %v5381_v11  ;;  %vm2251_vm6 = vweird.f32 %v5298_v1  ;;  %v6352_v42 = vld [vmem:[#allocation56_spill] sm:$0xff] }
 0x2e2   :  { %v2254_v12 = vand.u32 2147483647, %v5231_v51  ;;  %v2493_v45 = vmul.f32 %v6352_v42, %v2288_v13  ;;  %v2268_v40 = vsel %vm2267_vm2, %v5289_v44, %v2264_v31  ;;  %vm2270_vm15 = vcmp.eq.f32.partialorder %v2269_v60, 8.507059e+37  ;;  %2670 = vmatmul.msk.f32.vlgmr.msra.gmra.mxu1 %vm3311_vm4, %v6276_v21  ;;  %vm2207_vm4 = vmor %vm2205_vm7, %vm2206_vm8 }
 0x2e3   :  { %2574 = vmatpush.msrb.mxu0 %v2494_v57  ;;  %vm6353_vm5 = vweird.f32 %v5231_v51  ;;  %v2238_v32 = vsel %vm5741_vm0, %v5558_v19, %v5601_v27  ;;  %vm6355_vm3 = vweird.f32 %v5378_v2  ;;  %v2242_v51 = vor.u32 1.1754944e-38, %v2241_v36  ;;  %v6358_v19 = vld [vmem:[#allocation26_spill] sm:$0xff] }
 0x2e4   :  { %vm2252_vm12 = vmor %vm6353_vm5, %vm2251_vm6  ;;  %v2273_v44 = vsel %vm2270_vm15, %v5355_v9, %v2268_v40  ;;  %vm2255_vm13 = vcmp.eq.f32.partialorder %v2254_v12, 8.507059e+37  ;;  %vm2240_vm11 = vcmp.eq.f32.partialorder %v2239_v17, 8.507059e+37  ;;  %v2227_v36 = vor.u32 1.1754944e-38, %v2226_v4 }
 0x2e5   :  { %vm5772_vm9 = vmor %vm2220_vm10, %vm6355_vm3  ;;  %v2253_v8 = vsel %vm2252_vm12, %v5298_v1, %v2249_v34  ;;  %2575 = vmatpush.msrb.mxu0 %v2493_v45  ;;  %v2492_v27 = vmul.f32 %v6358_v19, %v2273_v44  ;;  %v2243_v1 = vsel %vm2240_vm11, %v2242_v51, %v2238_v32  ;;  %v6360_v9 = vand.u32 2147483647, %v5318_v53 }
 0x2e6   :  { %v2258_v38 = vsel %vm2255_vm13, %v6359_v10, %v2253_v8  ;;  %v2223_v54 = vsel %vm5772_vm9, %v5378_v2, %v5524_v22  ;;  %v2208_v55 = vsel %vm2207_vm4, %v5536_v29, %v2204_v50  ;;  %v6362_v18 = vand.u32 2147483648, %v5463_v7 }
 0x2e7   :  { %vm2225_vm10 = vcmp.eq.f32.partialorder %v6360_v9, 8.507059e+37  ;;  %2576 = vmatpush.msrb.mxu0 %v2492_v27  ;;  %v2491_v17 = vmul.f32 %v6361_v41, %v2258_v38  ;;  %v6363_v4 = vand.u32 2147483647, %v5463_v7  ;;  %v2490_v43 = vmul.f32 %v6364_v20, %v2243_v1 }
 0x2e8   :  { %v2212_v2 = vor.u32 1.1754944e-38, %v6362_v18  ;;  %v2228_v22 = vsel %vm2225_vm10, %v2227_v36, %v2223_v54 }
 0x2e9   :  { %vm2210_vm0 = vcmp.eq.f32.partialorder %v6363_v4, 8.507059e+37  ;;  %2577 = vmatpush.msrb.mxu0 %v2491_v17  ;;  %v2489_v53 = vmul.f32 %v6365_v0, %v2228_v22 }
 0x2ea   :  { %v2213_v3 = vsel %vm2210_vm0, %v2212_v2, %v2208_v55 }
 0x2eb   :  { %2578 = vmatpush.msrb.mxu0 %v2490_v43  ;;  %v2488_v48 = vmul.f32 %v6366_v63, %v2213_v3 }
 0x2ed   :  { %2579 = vmatpush.msrb.mxu0 %v2489_v53 }
 0x2ef   :  { %2580 = vmatpush.msrb.mxu0 %v2488_v48 }
 0x2f0   :  { %2672 = vmatmul.msk.f32.vlgmr.msrb.gmra.mxu0 %vm3294_vm1, %v6276_v21  ;;  %vm6368_vm1 = vcmask 64512  }
 0x336   :  { %v2522_v7 = vpop.f32.mrf.mxu0 }
 0x357   :  { %v2562_v25 = vpop.f32.mrf.mxu2 }
 0x35f   :  { %v2542_v24 = vpop.f32.mrf.mxu1 }
 0x360   :  { %v2543_v26 = vadd.f32 %v2542_v24, %v2522_v7 }
 0x362   :  { %v2563_v23 = vadd.f32 %v2562_v25, %v2543_v26 }
 0x36d   :  { %v2582_v52 = vpop.f32.mrf.mxu0 }
 0x36e   :  { %v2583_v21 = vadd.f32 %v2582_v52, %v2563_v23 }
 0x370   :  { %v2585_v59 = vadd.f32 %v2583_v21, %v2504_v35 }
 0x372   :  { %2586 = vst.msk [vmem:[#allocation6] sm:$0xff] %vm6368_vm1, %v2585_v59 }
 0x373   :  { %2608 = dma.vmem_to_hbm [thread:$0]  %s2604_s22, 128, %s2606_s0, [#allocation7]  }
 0x374   :  { %3044 = dma.done.wait [#allocation4], 128  }
 0x375   :  { %3045 = vsyncadd [#allocation4], 4294967168 }
 0x376   :  { %3046 = dma.done.wait [#allocation7], 128  }
 0x377   :  { %3047 = vsyncadd [#allocation7], 4294967168 }
 0x378   :  { %2617 = vsyncpa [#allocation3], 1 }
 0x379   :  { %2618 = vsyncpa [#allocation4], 1 }
 0x37a   :  { %2619 = vsyncpa [#allocation7], 1 }

</bundles_post_ra>
